<compile_context>
chip_gen: v6e
topology: v6e:2x2x1
jax: 0.10.0
libtpu: 0.0.40
codegen_flags: <defaults>
</compile_context>

<pallas_src>
import jax
import jax.numpy as jnp
from jax import lax
from jax.experimental import pallas as pl
from jax.experimental.pallas import tpu as pltpu


def _default_vmem_limit():
    # ~48 MiB on v7x (64 MiB physical), ~96 MiB on v5e/v6e (128 MiB physical).
    try:
        cap = pltpu.get_tpu_info().vmem_capacity_bytes
        return int(min(max(cap - 16 * 1024 * 1024, 32 * 1024 * 1024),
                       96 * 1024 * 1024))
    except Exception:
        return 48 * 1024 * 1024


VMEM_LIMIT = _default_vmem_limit()


# ----------------------------------------------------------------------------
# Tiling helpers
# ----------------------------------------------------------------------------

def _round_up(x, m):
    return ((x + m - 1) // m) * m


def _pick_tk(K):
    kp = _round_up(K, 128)
    if kp <= 768:                       # single K step for small reductions
        return kp
    for tk in (768, 512, 384, 256, 128):  # prefer a divisor of K
        if K % tk == 0:
            return tk
    return 512                          # otherwise pad K up to a 512 multiple


def _pick_m_tiling(M, cap=1024):
    """Pick (tm, Mp): tm | Mp, tm % 8 == 0, minimal padding, >=2 M blocks
    when M is large (so v7x's second TensorCore gets work)."""
    Mp = _round_up(M, 8)
    limit = min(cap, Mp)
    if Mp >= 256:
        limit = min(limit, max(128, (Mp // 2) - (Mp // 2) % 8))
    tm = limit - limit % 8
    while tm > 8 and Mp % tm != 0:
        tm -= 8
    tm = max(tm, 8)
    if tm < 128 and Mp > 1024:          # awkward M: accept a little zero padding
        tm = 512
        Mp = _round_up(Mp, tm)
    return tm, Mp


def _prep_operands(a, b):
    """Cast to bf16 (MXU inputs) and zero-pad both operands to tile multiples."""
    M, K = a.shape
    K2, N = b.shape
    assert K == K2
    tm, Mp = _pick_m_tiling(M)
    tn = _round_up(N, 128) if N <= 1024 else 512
    tk = _pick_tk(K)
    Np, Kp = _round_up(N, tn), _round_up(K, tk)
    a = a.astype(jnp.bfloat16)
    b = b.astype(jnp.bfloat16)
    if (Mp, Kp) != (M, K):
        a = jnp.pad(a, ((0, Mp - M), (0, Kp - K)))
    if (Kp, Np) != (K, N):
        b = jnp.pad(b, ((0, Kp - K), (0, Np - N)))
    return a, b, (M, K, N), (tm, tk, tn), (Mp, Kp, Np)


# ----------------------------------------------------------------------------
# Pallas kernels
# ----------------------------------------------------------------------------

def _mm_kernel(a_ref, b_ref, o_ref):
    """Tiled matmul; accumulate directly into the resident f32 output block."""
    @pl.when(pl.program_id(2) == 0)
    def _():
        o_ref[...] = jnp.zeros_like(o_ref)

    o_ref[...] += jnp.dot(a_ref[...], b_ref[...],
                          preferred_element_type=jnp.float32)


def _mm_bias_kernel(a_ref, b_ref, bias_ref, o_ref):
    """Tiled matmul with the bias add fused into the last-K epilogue."""
    k = pl.program_id(2)

    @pl.when(k == 0)
    def _():
        o_ref[...] = jnp.zeros_like(o_ref)

    o_ref[...] += jnp.dot(a_ref[...], b_ref[...],
                          preferred_element_type=jnp.float32)

    @pl.when(k == pl.num_programs(2) - 1)
    def _():
        o_ref[...] += bias_ref[...]


def _mm_stats_kernel(a_ref, b_ref, o_ref, st_ref, acc_ref):
    """Matmul (f32 VMEM accumulator) -> bf16 output + per-column sum / sumsq."""
    k = pl.program_id(2)

    @pl.when(k == 0)
    def _():
        acc_ref[...] = jnp.zeros_like(acc_ref)

    acc_ref[...] += jnp.dot(a_ref[...], b_ref[...],
                            preferred_element_type=jnp.float32)

    @pl.when(k == pl.num_programs(2) - 1)
    def _():
        acc = acc_ref[...]                                   # (tm, tn) f32
        o_ref[...] = acc.astype(o_ref.dtype)                 # bf16 out
        s = jnp.sum(acc, axis=0, keepdims=True)              # (1, tn)
        ss = jnp.sum(acc * acc, axis=0, keepdims=True)       # (1, tn)
        st_ref[0] = jnp.concatenate([s, ss], axis=0)         # (2, tn)


def _scale_shift_relu_kernel(x_ref, s_ref, t_ref, o_ref):
    y = x_ref[...].astype(jnp.float32) * s_ref[...] + t_ref[...]
    o_ref[...] = jnp.maximum(y, 0.0).astype(o_ref.dtype)


# ----------------------------------------------------------------------------
# Pallas wrappers
# ----------------------------------------------------------------------------

def pallas_matmul(a, b, bias=None):
    """a:(M,K) @ b:(K,N) [+ bias] -> (M,N) f32.  bf16 MXU inputs, f32 accum."""
    a, b, (M, K, N), (tm, tk, tn), (Mp, Kp, Np) = _prep_operands(a, b)
    grid = (Mp // tm, Np // tn, Kp // tk)
    a_spec = pl.BlockSpec((tm, tk), lambda i, j, k: (i, k))
    b_spec = pl.BlockSpec((tk, tn), lambda i, j, k: (k, j))
    o_spec = pl.BlockSpec((tm, tn), lambda i, j, k: (i, j))
    cp = pltpu.CompilerParams(
        dimension_semantics=("parallel", "parallel", "arbitrary"),
        vmem_limit_bytes=VMEM_LIMIT)

    if bias is None:
        out = pl.pallas_call(
            _mm_kernel,
            out_shape=jax.ShapeDtypeStruct((Mp, Np), jnp.float32),
            grid_spec=pltpu.PrefetchScalarGridSpec(
                num_scalar_prefetch=0, grid=grid,
                in_specs=[a_spec, b_spec], out_specs=o_spec),
            compiler_params=cp,
        )(a, b)
    else:
        bias2 = bias.astype(jnp.float32).reshape(1, -1)
        if Np != N:
            bias2 = jnp.pad(bias2, ((0, 0), (0, Np - N)))
        out = pl.pallas_call(
            _mm_bias_kernel,
            out_shape=jax.ShapeDtypeStruct((Mp, Np), jnp.float32),
            grid_spec=pltpu.PrefetchScalarGridSpec(
                num_scalar_prefetch=0, grid=grid,
                in_specs=[a_spec, b_spec,
                          pl.BlockSpec((1, tn), lambda i, j, k: (0, j))],
                out_specs=o_spec),
            compiler_params=cp,
        )(a, b, bias2)
    return out[:M, :N] if (Mp, Np) != (M, N) else out


def pallas_matmul_colstats(a, b):
    """Matmul -> bf16 output (padded to Mp rows) + per-column sum / sumsq over
    the true M rows (padding rows are zero, so they contribute nothing)."""
    a, b, (M, K, N), (tm, tk, tn), (Mp, Kp, Np) = _prep_operands(a, b)
    gm, gn, gk = Mp // tm, Np // tn, Kp // tk
    out, stats = pl.pallas_call(
        _mm_stats_kernel,
        out_shape=(jax.ShapeDtypeStruct((Mp, Np), jnp.bfloat16),
                   jax.ShapeDtypeStruct((gm, 2, Np), jnp.float32)),
        grid_spec=pltpu.PrefetchScalarGridSpec(
            num_scalar_prefetch=0,
            grid=(gm, gn, gk),
            in_specs=[pl.BlockSpec((tm, tk), lambda i, j, k: (i, k)),
                      pl.BlockSpec((tk, tn), lambda i, j, k: (k, j))],
            out_specs=[pl.BlockSpec((tm, tn), lambda i, j, k: (i, j)),
                       pl.BlockSpec((1, 2, tn), lambda i, j, k: (i, 0, j))],
            scratch_shapes=[pltpu.VMEM((tm, tn), jnp.float32)]),
        compiler_params=pltpu.CompilerParams(
            dimension_semantics=("parallel", "parallel", "arbitrary"),
            vmem_limit_bytes=VMEM_LIMIT),
    )(a, b)
    col_sum = jnp.sum(stats[:, 0, :N], axis=0)
    col_sumsq = jnp.sum(stats[:, 1, :N], axis=0)
    if Np != N:
        out = out[:, :N]
    return out, col_sum, col_sumsq          # out keeps padded Mp rows


def pallas_scale_shift_relu(x, scale, shift):
    """(M,C)*scale[C] + shift[C], ReLU -> bf16.  Tiled over M, 'parallel'."""
    M, C = x.shape
    tm, Mp = _pick_m_tiling(M)
    xp = jnp.pad(x, ((0, Mp - M), (0, 0))) if Mp != M else x
    out = pl.pallas_call(
        _scale_shift_relu_kernel,
        out_shape=jax.ShapeDtypeStruct((Mp, C), jnp.bfloat16),
        grid_spec=pltpu.PrefetchScalarGridSpec(
            num_scalar_prefetch=0,
            grid=(Mp // tm,),
            in_specs=[pl.BlockSpec((tm, C), lambda i: (i, 0)),
                      pl.BlockSpec((1, C), lambda i: (0, 0)),
                      pl.BlockSpec((1, C), lambda i: (0, 0))],
            out_specs=pl.BlockSpec((tm, C), lambda i: (i, 0)),
        ),
        compiler_params=pltpu.CompilerParams(
            dimension_semantics=("parallel",),
            vmem_limit_bytes=VMEM_LIMIT),
    )(xp,
      scale.reshape(1, -1).astype(jnp.float32),
      shift.reshape(1, -1).astype(jnp.float32))
    return out                               # padded Mp rows (caller slices)


# ----------------------------------------------------------------------------
# TextCNN: fused Conv1d(k=1,3,5) -> BatchNorm1d (training stats) -> ReLU
# ----------------------------------------------------------------------------

def im2col_k5(x_blc):
    """(B, L, Cin) -> (B*L, 5*Cin), built in the input dtype (bf16)."""
    B, L, Cin = x_blc.shape
    xp = jnp.pad(x_blc, ((0, 0), (2, 2), (0, 0)))
    cols = [xp[:, j:j + L, :] for j in range(5)]
    return jnp.concatenate(cols, axis=-1).reshape(B * L, 5 * Cin)


def textcnn_forward(x_blc, p, eps=1e-5):
    B, L, _ = x_blc.shape
    M = B * L
    xcol = im2col_k5(x_blc.astype(jnp.bfloat16))              # (B*L, 5*Cin) bf16
    # Single fused matmul for all three kernel sizes; BN stats from the epilogue.
    y, col_sum, col_sumsq = pallas_matmul_colstats(xcol, p["w_fused"])
    mean = col_sum / M                                        # training-mode BN
    var = jnp.maximum(col_sumsq / M - mean * mean, 0.0)       # biased, like PyTorch
    scale = p["gamma"] * lax.rsqrt(var + eps)
    shift = p["beta"] - mean * scale
    z = pallas_scale_shift_relu(y, scale, shift)              # (Mp, 768) bf16
    return z[:M].reshape(B, L, -1)                            # (B, L, 768)


# ----------------------------------------------------------------------------
# Shared bidirectional LSTM (PyTorch nn.LSTM, batch_first=False semantics)
# ----------------------------------------------------------------------------

def bilstm_pair(feat_a, feat_b, p):
    """Run the shared BiLSTM on both feature streams with ONE input-projection
    matmul (streams stacked on the LSTM batch axis, fwd/bwd weights on N);
    the bias add is fused into the matmul epilogue."""
    T, L, C = feat_a.shape
    H = p["w_hh_stack"].shape[-1]
    x2 = jnp.concatenate([feat_a, feat_b], axis=1)            # (T, 2L, C) bf16
    M = T * 2 * L
    xp = pallas_matmul(x2.reshape(M, C), p["w_ih_cat"], bias=p["b_cat"])
    xp = xp.reshape(T, 2 * L, 2, 4 * H)                       # [:, :, 0]=fwd, 1=bwd
    gates_in = jnp.stack([xp[:, :, 0, :], xp[:, :, 1, :][::-1]], axis=1)
    w_hh = p["w_hh_stack"]                                    # (2, 4H, H)

    # TODO(synk): the sequential recurrence (128-dim h @ W_hh) stays in lax.scan;
    # it is latency-bound and too small to benefit from a Pallas kernel here.
    def step(carry, gt):
        h, c = carry                                          # (2, 2L, H)
        gates = gt + jnp.einsum("dbh,dgh->dbg", h, w_hh)
        i, f, g, o = jnp.split(gates, 4, axis=-1)             # PyTorch gate order
        c = jax.nn.sigmoid(f) * c + jax.nn.sigmoid(i) * jnp.tanh(g)
        h = jax.nn.sigmoid(o) * jnp.tanh(c)
        return (h, c), h

    h0 = jnp.zeros((2, 2 * L, H), jnp.float32)
    c0 = jnp.zeros((2, 2 * L, H), jnp.float32)
    _, hs = lax.scan(step, (h0, c0), gates_in)                # (T, 2, 2L, H)
    out = jnp.concatenate([hs[:, 0], hs[:, 1][::-1]], axis=-1)  # (T, 2L, 2H)
    return out[:, :L, :], out[:, L:, :]                       # each (T, L, 256)


# ----------------------------------------------------------------------------
# KANLinear (efficient-kan semantics: SiLU base branch + B-spline branch)
# ----------------------------------------------------------------------------
# TODO(synk): KANLinear definition was not supplied with the module; standard
# efficient-kan defaults are used (grid_size=5, spline_order=3, range [-1,1],
# SiLU base activation, standalone spline scaler, no bias).

GRID_SIZE = 5
SPLINE_ORDER = 3
NUM_BASIS = GRID_SIZE + SPLINE_ORDER


def make_kan_grid(in_features, grid_range=(-1.0, 1.0)):
    h = (grid_range[1] - grid_range[0]) / GRID_SIZE
    g = (jnp.arange(-SPLINE_ORDER, GRID_SIZE + SPLINE_ORDER + 1,
                    dtype=jnp.float32) * h + grid_range[0])
    return jnp.broadcast_to(g[None, :], (in_features, g.shape[0]))


def b_splines(x, grid):
    # x: (N, in), grid: (in, GRID_SIZE + 2*SPLINE_ORDER + 1)
    x = x[..., None]
    bases = ((x >= grid[:, :-1]) & (x < grid[:, 1:])).astype(jnp.float32)
    for k in range(1, SPLINE_ORDER + 1):
        bases = ((x - grid[:, : -(k + 1)])
                 / (grid[:, k:-1] - grid[:, : -(k + 1)]) * bases[:, :, :-1]
                 + (grid[:, k + 1:] - x)
                 / (grid[:, k + 1:] - grid[:, 1:-k]) * bases[:, :, 1:])
    return bases                                              # (N, in, 8)


def kan_linear_fused(x, p):
    """Base (SiLU) and spline branches fused into one matmul along K.
    Both activation pieces are materialized directly in bf16."""
    N = x.shape[0]
    sb = b_splines(x, p["grid"]).reshape(N, -1).astype(jnp.bfloat16)   # (N, in*8)
    base = jax.nn.silu(x).astype(jnp.bfloat16)                          # (N, in)
    a = jnp.concatenate([base, sb], axis=1)                             # (N, in*9)
    return pallas_matmul(a, p["w_fused"])                               # (N, out) f32


def kan_linear_small(x, p):
    """out_features=2: lane-sparse output -> keep in plain XLA (no Pallas launch)."""
    N = x.shape[0]
    base = jax.nn.silu(x) @ p["base_weight"].T
    sb = b_splines(x, p["grid"]).reshape(N, -1)
    return base + sb @ p["scaled_spline_t"]


# ----------------------------------------------------------------------------
# Full model forward
# ----------------------------------------------------------------------------

def plan_ankh_prostt5_forward(ankh, prost, params):
    # ankh: (B, L, 1536), prost: (B, L, 1024)
    ankh_feat = textcnn_forward(ankh, params["cnn_esm2"])     # (B, L, 768) bf16
    prost_feat = textcnn_forward(prost, params["cnn_prot"])   # (B, L, 768) bf16

    # nn.LSTM default batch_first=False: dim 0 is treated as the sequence axis
    # (exactly as the PyTorch forward does, even though it is the batch axis).
    fea1, fea2 = bilstm_pair(ankh_feat, prost_feat, params["lstm"])
    fin = jnp.concatenate([fea1, fea2], axis=2)               # (B, L, 512) f32

    B, L, _ = fin.shape
    h = kan_linear_fused(fin.reshape(B * L, 512), params["kan1"])   # (B*L, 128)
    logits = kan_linear_small(h, params["kan2"])                    # (B*L, 2)
    out = jax.nn.softmax(logits, axis=-1)
    return out.reshape(B, L, 2)


# ----------------------------------------------------------------------------
# Deterministic parameter construction (fused layouts built once, not per call)
# ----------------------------------------------------------------------------

def init_params(key):
    keys = list(jax.random.split(key, 64))
    it = iter(keys)

    def nrm(shape, scale=0.05):
        return jax.random.normal(next(it), shape, jnp.float32) * scale

    def uni(shape, bound):
        return jax.random.uniform(next(it), shape, jnp.float32, -bound, bound)

    def textcnn(in_dim, out_dim=256, ks=(1, 3, 5)):
        convs = [nrm((out_dim, in_dim, k), scale=0.02) for k in ks]
        # Conv1d bias is omitted: it cancels exactly under training-mode BN
        # (mean subtraction removes the per-channel constant; var is unaffected).
        kmax = max(ks)
        # TODO(synk): the k=1/k=3 columns only use the central Cin / 3*Cin rows;
        # zero-padded rows waste ~40% of MXU pushes where the matmul is
        # compute-bound (v7x / v5e at large M).
        w_fused = jnp.zeros((kmax * in_dim, out_dim * len(ks)), jnp.float32)
        for idx, (k, w) in enumerate(zip(ks, convs)):
            off = (kmax - k) // 2
            for j in range(k):
                w_fused = w_fused.at[(off + j) * in_dim:(off + j + 1) * in_dim,
                                     idx * out_dim:(idx + 1) * out_dim].set(w[:, :, j].T)
        gamma = jnp.ones((out_dim,), jnp.float32)    # shared BN, PyTorch defaults
        beta = jnp.zeros((out_dim,), jnp.float32)
        return {"w_fused": w_fused.astype(jnp.bfloat16),   # stored pre-cast (MXU input)
                "gamma": jnp.tile(gamma, len(ks)),
                "beta": jnp.tile(beta, len(ks))}

    H = 128
    bound = 1.0 / (H ** 0.5)
    w_ih_f = uni((4 * H, 768), bound)
    w_hh_f = uni((4 * H, H), bound)
    b_ih_f = uni((4 * H,), bound)
    b_hh_f = uni((4 * H,), bound)
    w_ih_b = uni((4 * H, 768), bound)
    w_hh_b = uni((4 * H, H), bound)
    b_ih_b = uni((4 * H,), bound)
    b_hh_b = uni((4 * H,), bound)
    lstm = {
        "w_ih_cat": jnp.concatenate([w_ih_f.T, w_ih_b.T],
                                    axis=1).astype(jnp.bfloat16),   # (768, 1024)
        "b_cat": jnp.concatenate([b_ih_f + b_hh_f, b_ih_b + b_hh_b]),
        "w_hh_stack": jnp.stack([w_hh_f, w_hh_b], axis=0),          # (2, 512, 128)
    }

    def kan(in_f, out_f, fuse):
        base_w = nrm((out_f, in_f), scale=0.05)
        spline_w = nrm((out_f, in_f, NUM_BASIS), scale=0.05)
        scaler = nrm((out_f, in_f), scale=0.1) + 1.0
        grid = make_kan_grid(in_f)
        scaled = (spline_w * scaler[..., None]).reshape(out_f, -1)   # (out, in*8)
        if fuse:
            w_fused = jnp.concatenate([base_w.T, scaled.T], axis=0)
            return {"grid": grid, "w_fused": w_fused.astype(jnp.bfloat16)}
        return {"grid": grid, "base_weight": base_w, "scaled_spline_t": scaled.T}

    return {
        "cnn_esm2": textcnn(1536),
        "cnn_prot": textcnn(1024),
        "lstm": lstm,
        "kan1": kan(512, 128, fuse=True),
        "kan2": kan(128, 2, fuse=False),
    }


# ----------------------------------------------------------------------------

if __name__ == "__main__":
    key = jax.random.PRNGKey(0)
    k_param, k_a, k_p = jax.random.split(key, 3)

    B, L = 2, 8
    ankh = jax.random.normal(k_a, (B, L, 1536), jnp.float32)
    prost = jax.random.normal(k_p, (B, L, 1024), jnp.float32)
    params = init_params(k_param)

    fwd = jax.jit(plan_ankh_prostt5_forward)
    out = jax.block_until_ready(fwd(ankh, prost, params))

    assert out.shape == (B, L, 2)
    assert bool(jnp.all(jnp.isfinite(out)))
    # rows of softmax output must sum to 1
    assert bool(jnp.allclose(jnp.sum(out, axis=-1), 1.0, atol=1e-5))

    print("KERNEL_OK")
</pallas_src>

<mosaic_0001>
module attributes {stable_mosaic.version = 11 : i64} {
  func.func @_mm_stats_kernel(%arg0: i32, %arg1: i32, %arg2: i32, %arg3: memref<16x768xbf16, #tpu.memory_space<vmem>>, %arg4: memref<768x768xbf16, #tpu.memory_space<vmem>>, %arg5: memref<16x768xbf16, #tpu.memory_space<vmem>>, %arg6: memref<1x2x768xf32, #tpu.memory_space<vmem>>, %arg7: memref<16x768xf32, #tpu.memory_space<vmem>>) attributes {dimension_semantics = [#tpu.dimension_semantics<parallel>, #tpu.dimension_semantics<parallel>, #tpu.dimension_semantics<arbitrary>], iteration_bounds = array<i64: 1, 1, 10>, scalar_prefetch = 0 : i64, scratch_operands = 1 : i64, tpu.core_type = #tpu.core_type<tc>, window_params = [{transform_indices = @transform_0, window_bounds = array<i64: 16, 768>}, {transform_indices = @transform_1, window_bounds = array<i64: 768, 768>}, {transform_indices = @transform_2, window_bounds = array<i64: 16, 768>}, {transform_indices = @transform_3, window_bounds = array<i64: 1, 2, 768>}]} {
    %c0_i32 = arith.constant 0 : i32
    %0 = arith.cmpi eq, %arg2, %c0_i32 : i32
    %1 = arith.extui %0 : i1 to i32
    %c0_i32_0 = arith.constant 0 : i32
    %2 = arith.cmpi ne, %1, %c0_i32_0 : i32
    scf.if %2 {
      %cst_9 = arith.constant 0.000000e+00 : f32
      %12 = vector.broadcast %cst_9 : f32 to vector<16x768xf32>
      %c0_10 = arith.constant 0 : index
      %c0_11 = arith.constant 0 : index
      %13 = vector.load %arg7[%c0_10, %c0_11] : memref<16x768xf32, #tpu.memory_space<vmem>>, vector<16x768xf32>
      tpu.vector_store %arg7[%c0_10, %c0_11], %12 {strides = array<i32>} : memref<16x768xf32, #tpu.memory_space<vmem>>, vector<16x768xf32>,
    } else {
    }
    %c0 = arith.constant 0 : index
    %c0_1 = arith.constant 0 : index
    %3 = vector.load %arg7[%c0, %c0_1] : memref<16x768xf32, #tpu.memory_space<vmem>>, vector<16x768xf32>
    %c0_2 = arith.constant 0 : index
    %c0_3 = arith.constant 0 : index
    %4 = vector.load %arg3[%c0_2, %c0_3] : memref<16x768xbf16, #tpu.memory_space<vmem>>, vector<16x768xbf16>
    %c0_4 = arith.constant 0 : index
    %c0_5 = arith.constant 0 : index
    %5 = vector.load %arg4[%c0_4, %c0_5] : memref<768x768xbf16, #tpu.memory_space<vmem>>, vector<768x768xbf16>
    %cst = arith.constant dense<0.000000e+00> : vector<16x768xf32>
    %6 = tpu.matmul %4, %5, %cst {dimension_numbers = #tpu.dot_dimension_numbers<[1], [0], [0], [1], [0, 0, 1, 1], [], []>} : vector<16x768xbf16>, vector<768x768xbf16>, vector<16x768xf32> -> vector<16x768xf32>
    %7 = arith.addf %3, %6 : vector<16x768xf32>
    %c0_6 = arith.constant 0 : index
    %c0_7 = arith.constant 0 : index
    %8 = vector.load %arg7[%c0_6, %c0_7] : memref<16x768xf32, #tpu.memory_space<vmem>>, vector<16x768xf32>
    tpu.vector_store %arg7[%c0_6, %c0_7], %7 {strides = array<i32>} : memref<16x768xf32, #tpu.memory_space<vmem>>, vector<16x768xf32>,
    %c9_i32 = arith.constant 9 : i32
    %9 = arith.cmpi eq, %arg2, %c9_i32 : i32
    %10 = arith.extui %9 : i1 to i32
    %c0_i32_8 = arith.constant 0 : i32
    %11 = arith.cmpi ne, %10, %c0_i32_8 : i32
    scf.if %11 {
      %c0_9 = arith.constant 0 : index
      %c0_10 = arith.constant 0 : index
      %12 = vector.load %arg7[%c0_9, %c0_10] : memref<16x768xf32, #tpu.memory_space<vmem>>, vector<16x768xf32>
      %13 = arith.truncf %12 : vector<16x768xf32> to vector<16x768xbf16>
      %c0_11 = arith.constant 0 : index
      %c0_12 = arith.constant 0 : index
      %14 = vector.load %arg5[%c0_11, %c0_12] : memref<16x768xbf16, #tpu.memory_space<vmem>>, vector<16x768xbf16>
      tpu.vector_store %arg5[%c0_11, %c0_12], %13 {strides = array<i32>} : memref<16x768xbf16, #tpu.memory_space<vmem>>, vector<16x768xbf16>,
      %cst_13 = arith.constant dense<0.000000e+00> : vector<768xf32>
      %15 = vector.multi_reduction <add>, %12, %cst_13 [0] : vector<16x768xf32> to vector<768xf32>
      %16 = vector.shape_cast %15 : vector<768xf32> to vector<1x768xf32>
      %17 = arith.mulf %12, %12 : vector<16x768xf32>
      %cst_14 = arith.constant dense<0.000000e+00> : vector<768xf32>
      %18 = vector.multi_reduction <add>, %17, %cst_14 [0] : vector<16x768xf32> to vector<768xf32>
      %19 = vector.shape_cast %18 : vector<768xf32> to vector<1x768xf32>
      %20 = tpu.concatenate %16, %19 in 0 : vector<1x768xf32>, vector<1x768xf32> -> vector<2x768xf32>
      %c0_15 = arith.constant 0 : index
      %c0_16 = arith.constant 0 : index
      %c0_17 = arith.constant 0 : index
      %21 = vector.load %arg6[%c0_15, %c0_16, %c0_17] : memref<1x2x768xf32, #tpu.memory_space<vmem>>, vector<1x2x768xf32>
      %22 = vector.shape_cast %21 : vector<1x2x768xf32> to vector<2x768xf32>
      %23 = vector.shape_cast %20 : vector<2x768xf32> to vector<1x2x768xf32>
      tpu.vector_store %arg6[%c0_15, %c0_16, %c0_17], %23 {strides = array<i32>} : memref<1x2x768xf32, #tpu.memory_space<vmem>>, vector<1x2x768xf32>,
    } else {
    }
    return
  }
  func.func @transform_0(%arg0: i32, %arg1: i32, %arg2: i32) -> (i32, i32) {
    %c0_i32 = arith.constant 0 : i32
    return %arg0, %arg2 : i32, i32
  }
  func.func @transform_1(%arg0: i32, %arg1: i32, %arg2: i32) -> (i32, i32) {
    %c0_i32 = arith.constant 0 : i32
    return %arg2, %arg1 : i32, i32
  }
  func.func @transform_2(%arg0: i32, %arg1: i32, %arg2: i32) -> (i32, i32) {
    %c0_i32 = arith.constant 0 : i32
    return %arg0, %arg1 : i32, i32
  }
  func.func @transform_3(%arg0: i32, %arg1: i32, %arg2: i32) -> (i32, i32, i32) {
    %c0_i32 = arith.constant 0 : i32
    %c0_i32_0 = arith.constant 0 : i32
    return %arg0, %c0_i32, %arg1 : i32, i32, i32
  }
}

module attributes {stable_mosaic.version = 11 : i64} {
  func.func @_scale_shift_relu_kernel(%arg0: i32, %arg1: memref<16x768xbf16, #tpu.memory_space<vmem>>, %arg2: memref<1x768xf32, #tpu.memory_space<vmem>>, %arg3: memref<1x768xf32, #tpu.memory_space<vmem>>, %arg4: memref<16x768xbf16, #tpu.memory_space<vmem>>) attributes {dimension_semantics = [#tpu.dimension_semantics<parallel>], iteration_bounds = array<i64: 1>, scalar_prefetch = 0 : i64, scratch_operands = 0 : i64, tpu.core_type = #tpu.core_type<tc>, window_params = [{transform_indices = @transform_0, window_bounds = array<i64: 16, 768>}, {pipeline_mode = #tpu.pipeline_mode<synchronous>, transform_indices = @transform_1, window_bounds = array<i64: 1, 768>}, {pipeline_mode = #tpu.pipeline_mode<synchronous>, transform_indices = @transform_2, window_bounds = array<i64: 1, 768>}, {transform_indices = @transform_3, window_bounds = array<i64: 16, 768>}]} {
    %c0 = arith.constant 0 : index
    %c0_0 = arith.constant 0 : index
    %0 = vector.load %arg1[%c0, %c0_0] : memref<16x768xbf16, #tpu.memory_space<vmem>>, vector<16x768xbf16>
    %1 = arith.extf %0 : vector<16x768xbf16> to vector<16x768xf32>
    %c0_1 = arith.constant 0 : index
    %c0_2 = arith.constant 0 : index
    %2 = vector.load %arg2[%c0_1, %c0_2] : memref<1x768xf32, #tpu.memory_space<vmem>>, vector<1x768xf32>
    %3 = vector.broadcast %2 : vector<1x768xf32> to vector<16x768xf32>
    %4 = arith.mulf %1, %3 : vector<16x768xf32>
    %c0_3 = arith.constant 0 : index
    %c0_4 = arith.constant 0 : index
    %5 = vector.load %arg3[%c0_3, %c0_4] : memref<1x768xf32, #tpu.memory_space<vmem>>, vector<1x768xf32>
    %6 = vector.broadcast %5 : vector<1x768xf32> to vector<16x768xf32>
    %7 = arith.addf %4, %6 : vector<16x768xf32>
    %cst = arith.constant 0.000000e+00 : f32
    %8 = vector.broadcast %cst : f32 to vector<16x768xf32>
    %9 = arith.maximumf %7, %8 : vector<16x768xf32>
    %10 = arith.truncf %9 : vector<16x768xf32> to vector<16x768xbf16>
    %c0_5 = arith.constant 0 : index
    %c0_6 = arith.constant 0 : index
    %11 = vector.load %arg4[%c0_5, %c0_6] : memref<16x768xbf16, #tpu.memory_space<vmem>>, vector<16x768xbf16>
    tpu.vector_store %arg4[%c0_5, %c0_6], %10 {strides = array<i32>} : memref<16x768xbf16, #tpu.memory_space<vmem>>, vector<16x768xbf16>,
    return
  }
  func.func @transform_0(%arg0: i32) -> (i32, i32) {
    %c0_i32 = arith.constant 0 : i32
    %c0_i32_0 = arith.constant 0 : i32
    return %arg0, %c0_i32 : i32, i32
  }
  func.func @transform_1(%arg0: i32) -> (i32, i32) {
    %c0_i32 = arith.constant 0 : i32
    %c0_i32_0 = arith.constant 0 : i32
    %c0_i32_1 = arith.constant 0 : i32
    return %c0_i32, %c0_i32_0 : i32, i32
  }
  func.func @transform_2(%arg0: i32) -> (i32, i32) {
    %c0_i32 = arith.constant 0 : i32
    %c0_i32_0 = arith.constant 0 : i32
    %c0_i32_1 = arith.constant 0 : i32
    return %c0_i32, %c0_i32_0 : i32, i32
  }
  func.func @transform_3(%arg0: i32) -> (i32, i32) {
    %c0_i32 = arith.constant 0 : i32
    %c0_i32_0 = arith.constant 0 : i32
    return %arg0, %c0_i32 : i32, i32
  }
}

module attributes {stable_mosaic.version = 11 : i64} {
  func.func @_mm_stats_kernel(%arg0: i32, %arg1: i32, %arg2: i32, %arg3: memref<16x512xbf16, #tpu.memory_space<vmem>>, %arg4: memref<512x768xbf16, #tpu.memory_space<vmem>>, %arg5: memref<16x768xbf16, #tpu.memory_space<vmem>>, %arg6: memref<1x2x768xf32, #tpu.memory_space<vmem>>, %arg7: memref<16x768xf32, #tpu.memory_space<vmem>>) attributes {dimension_semantics = [#tpu.dimension_semantics<parallel>, #tpu.dimension_semantics<parallel>, #tpu.dimension_semantics<arbitrary>], iteration_bounds = array<i64: 1, 1, 10>, scalar_prefetch = 0 : i64, scratch_operands = 1 : i64, tpu.core_type = #tpu.core_type<tc>, window_params = [{transform_indices = @transform_0, window_bounds = array<i64: 16, 512>}, {transform_indices = @transform_1, window_bounds = array<i64: 512, 768>}, {transform_indices = @transform_2, window_bounds = array<i64: 16, 768>}, {transform_indices = @transform_3, window_bounds = array<i64: 1, 2, 768>}]} {
    %c0_i32 = arith.constant 0 : i32
    %0 = arith.cmpi eq, %arg2, %c0_i32 : i32
    %1 = arith.extui %0 : i1 to i32
    %c0_i32_0 = arith.constant 0 : i32
    %2 = arith.cmpi ne, %1, %c0_i32_0 : i32
    scf.if %2 {
      %cst_9 = arith.constant 0.000000e+00 : f32
      %12 = vector.broadcast %cst_9 : f32 to vector<16x768xf32>
      %c0_10 = arith.constant 0 : index
      %c0_11 = arith.constant 0 : index
      %13 = vector.load %arg7[%c0_10, %c0_11] : memref<16x768xf32, #tpu.memory_space<vmem>>, vector<16x768xf32>
      tpu.vector_store %arg7[%c0_10, %c0_11], %12 {strides = array<i32>} : memref<16x768xf32, #tpu.memory_space<vmem>>, vector<16x768xf32>,
    } else {
    }
    %c0 = arith.constant 0 : index
    %c0_1 = arith.constant 0 : index
    %3 = vector.load %arg7[%c0, %c0_1] : memref<16x768xf32, #tpu.memory_space<vmem>>, vector<16x768xf32>
    %c0_2 = arith.constant 0 : index
    %c0_3 = arith.constant 0 : index
    %4 = vector.load %arg3[%c0_2, %c0_3] : memref<16x512xbf16, #tpu.memory_space<vmem>>, vector<16x512xbf16>
    %c0_4 = arith.constant 0 : index
    %c0_5 = arith.constant 0 : index
    %5 = vector.load %arg4[%c0_4, %c0_5] : memref<512x768xbf16, #tpu.memory_space<vmem>>, vector<512x768xbf16>
    %cst = arith.constant dense<0.000000e+00> : vector<16x768xf32>
    %6 = tpu.matmul %4, %5, %cst {dimension_numbers = #tpu.dot_dimension_numbers<[1], [0], [0], [1], [0, 0, 1, 1], [], []>} : vector<16x512xbf16>, vector<512x768xbf16>, vector<16x768xf32> -> vector<16x768xf32>
    %7 = arith.addf %3, %6 : vector<16x768xf32>
    %c0_6 = arith.constant 0 : index
    %c0_7 = arith.constant 0 : index
    %8 = vector.load %arg7[%c0_6, %c0_7] : memref<16x768xf32, #tpu.memory_space<vmem>>, vector<16x768xf32>
    tpu.vector_store %arg7[%c0_6, %c0_7], %7 {strides = array<i32>} : memref<16x768xf32, #tpu.memory_space<vmem>>, vector<16x768xf32>,
    %c9_i32 = arith.constant 9 : i32
    %9 = arith.cmpi eq, %arg2, %c9_i32 : i32
    %10 = arith.extui %9 : i1 to i32
    %c0_i32_8 = arith.constant 0 : i32
    %11 = arith.cmpi ne, %10, %c0_i32_8 : i32
    scf.if %11 {
      %c0_9 = arith.constant 0 : index
      %c0_10 = arith.constant 0 : index
      %12 = vector.load %arg7[%c0_9, %c0_10] : memref<16x768xf32, #tpu.memory_space<vmem>>, vector<16x768xf32>
      %13 = arith.truncf %12 : vector<16x768xf32> to vector<16x768xbf16>
      %c0_11 = arith.constant 0 : index
      %c0_12 = arith.constant 0 : index
      %14 = vector.load %arg5[%c0_11, %c0_12] : memref<16x768xbf16, #tpu.memory_space<vmem>>, vector<16x768xbf16>
      tpu.vector_store %arg5[%c0_11, %c0_12], %13 {strides = array<i32>} : memref<16x768xbf16, #tpu.memory_space<vmem>>, vector<16x768xbf16>,
      %cst_13 = arith.constant dense<0.000000e+00> : vector<768xf32>
      %15 = vector.multi_reduction <add>, %12, %cst_13 [0] : vector<16x768xf32> to vector<768xf32>
      %16 = vector.shape_cast %15 : vector<768xf32> to vector<1x768xf32>
      %17 = arith.mulf %12, %12 : vector<16x768xf32>
      %cst_14 = arith.constant dense<0.000000e+00> : vector<768xf32>
      %18 = vector.multi_reduction <add>, %17, %cst_14 [0] : vector<16x768xf32> to vector<768xf32>
      %19 = vector.shape_cast %18 : vector<768xf32> to vector<1x768xf32>
      %20 = tpu.concatenate %16, %19 in 0 : vector<1x768xf32>, vector<1x768xf32> -> vector<2x768xf32>
      %c0_15 = arith.constant 0 : index
      %c0_16 = arith.constant 0 : index
      %c0_17 = arith.constant 0 : index
      %21 = vector.load %arg6[%c0_15, %c0_16, %c0_17] : memref<1x2x768xf32, #tpu.memory_space<vmem>>, vector<1x2x768xf32>
      %22 = vector.shape_cast %21 : vector<1x2x768xf32> to vector<2x768xf32>
      %23 = vector.shape_cast %20 : vector<2x768xf32> to vector<1x2x768xf32>
      tpu.vector_store %arg6[%c0_15, %c0_16, %c0_17], %23 {strides = array<i32>} : memref<1x2x768xf32, #tpu.memory_space<vmem>>, vector<1x2x768xf32>,
    } else {
    }
    return
  }
  func.func @transform_0(%arg0: i32, %arg1: i32, %arg2: i32) -> (i32, i32) {
    %c0_i32 = arith.constant 0 : i32
    return %arg0, %arg2 : i32, i32
  }
  func.func @transform_1(%arg0: i32, %arg1: i32, %arg2: i32) -> (i32, i32) {
    %c0_i32 = arith.constant 0 : i32
    return %arg2, %arg1 : i32, i32
  }
  func.func @transform_2(%arg0: i32, %arg1: i32, %arg2: i32) -> (i32, i32) {
    %c0_i32 = arith.constant 0 : i32
    return %arg0, %arg1 : i32, i32
  }
  func.func @transform_3(%arg0: i32, %arg1: i32, %arg2: i32) -> (i32, i32, i32) {
    %c0_i32 = arith.constant 0 : i32
    %c0_i32_0 = arith.constant 0 : i32
    return %arg0, %c0_i32, %arg1 : i32, i32, i32
  }
}

module attributes {stable_mosaic.version = 11 : i64} {
  func.func @_mm_bias_kernel(%arg0: i32, %arg1: i32, %arg2: i32, %arg3: memref<32x768xbf16, #tpu.memory_space<vmem>>, %arg4: memref<768x1024xbf16, #tpu.memory_space<vmem>>, %arg5: memref<1x1024xf32, #tpu.memory_space<vmem>>, %arg6: memref<32x1024xf32, #tpu.memory_space<vmem>>) attributes {dimension_semantics = [#tpu.dimension_semantics<parallel>, #tpu.dimension_semantics<parallel>, #tpu.dimension_semantics<arbitrary>], iteration_bounds = array<i64: 1, 1, 1>, scalar_prefetch = 0 : i64, scratch_operands = 0 : i64, tpu.core_type = #tpu.core_type<tc>, window_params = [{transform_indices = @transform_0, window_bounds = array<i64: 32, 768>}, {transform_indices = @transform_1, window_bounds = array<i64: 768, 1024>}, {transform_indices = @transform_2, window_bounds = array<i64: 1, 1024>}, {transform_indices = @transform_3, window_bounds = array<i64: 32, 1024>}]} {
    %c0_i32 = arith.constant 0 : i32
    %0 = arith.cmpi eq, %arg2, %c0_i32 : i32
    %1 = arith.extui %0 : i1 to i32
    %c0_i32_0 = arith.constant 0 : i32
    %2 = arith.cmpi ne, %1, %c0_i32_0 : i32
    scf.if %2 {
      %cst_10 = arith.constant 0.000000e+00 : f32
      %12 = vector.broadcast %cst_10 : f32 to vector<32x1024xf32>
      %c0_11 = arith.constant 0 : index
      %c0_12 = arith.constant 0 : index
      %13 = vector.load %arg6[%c0_11, %c0_12] : memref<32x1024xf32, #tpu.memory_space<vmem>>, vector<32x1024xf32>
      tpu.vector_store %arg6[%c0_11, %c0_12], %12 {strides = array<i32>} : memref<32x1024xf32, #tpu.memory_space<vmem>>, vector<32x1024xf32>,
    } else {
    }
    %c0 = arith.constant 0 : index
    %c0_1 = arith.constant 0 : index
    %3 = vector.load %arg6[%c0, %c0_1] : memref<32x1024xf32, #tpu.memory_space<vmem>>, vector<32x1024xf32>
    %c0_2 = arith.constant 0 : index
    %c0_3 = arith.constant 0 : index
    %4 = vector.load %arg3[%c0_2, %c0_3] : memref<32x768xbf16, #tpu.memory_space<vmem>>, vector<32x768xbf16>
    %c0_4 = arith.constant 0 : index
    %c0_5 = arith.constant 0 : index
    %5 = vector.load %arg4[%c0_4, %c0_5] : memref<768x1024xbf16, #tpu.memory_space<vmem>>, vector<768x1024xbf16>
    %cst = arith.constant dense<0.000000e+00> : vector<32x1024xf32>
    %6 = tpu.matmul %4, %5, %cst {dimension_numbers = #tpu.dot_dimension_numbers<[1], [0], [0], [1], [0, 0, 1, 1], [], []>} : vector<32x768xbf16>, vector<768x1024xbf16>, vector<32x1024xf32> -> vector<32x1024xf32>
    %7 = arith.addf %3, %6 : vector<32x1024xf32>
    %c0_6 = arith.constant 0 : index
    %c0_7 = arith.constant 0 : index
    %8 = vector.load %arg6[%c0_6, %c0_7] : memref<32x1024xf32, #tpu.memory_space<vmem>>, vector<32x1024xf32>
    tpu.vector_store %arg6[%c0_6, %c0_7], %7 {strides = array<i32>} : memref<32x1024xf32, #tpu.memory_space<vmem>>, vector<32x1024xf32>,
    %c0_i32_8 = arith.constant 0 : i32
    %9 = arith.cmpi eq, %arg2, %c0_i32_8 : i32
    %10 = arith.extui %9 : i1 to i32
    %c0_i32_9 = arith.constant 0 : i32
    %11 = arith.cmpi ne, %10, %c0_i32_9 : i32
    scf.if %11 {
      %c0_10 = arith.constant 0 : index
      %c0_11 = arith.constant 0 : index
      %12 = vector.load %arg6[%c0_10, %c0_11] : memref<32x1024xf32, #tpu.memory_space<vmem>>, vector<32x1024xf32>
      %c0_12 = arith.constant 0 : index
      %c0_13 = arith.constant 0 : index
      %13 = vector.load %arg5[%c0_12, %c0_13] : memref<1x1024xf32, #tpu.memory_space<vmem>>, vector<1x1024xf32>
      %14 = vector.broadcast %13 : vector<1x1024xf32> to vector<32x1024xf32>
      %15 = arith.addf %12, %14 : vector<32x1024xf32>
      %c0_14 = arith.constant 0 : index
      %c0_15 = arith.constant 0 : index
      %16 = vector.load %arg6[%c0_14, %c0_15] : memref<32x1024xf32, #tpu.memory_space<vmem>>, vector<32x1024xf32>
      tpu.vector_store %arg6[%c0_14, %c0_15], %15 {strides = array<i32>} : memref<32x1024xf32, #tpu.memory_space<vmem>>, vector<32x1024xf32>,
    } else {
    }
    return
  }
  func.func @transform_0(%arg0: i32, %arg1: i32, %arg2: i32) -> (i32, i32) {
    %c0_i32 = arith.constant 0 : i32
    return %arg0, %arg2 : i32, i32
  }
  func.func @transform_1(%arg0: i32, %arg1: i32, %arg2: i32) -> (i32, i32) {
    %c0_i32 = arith.constant 0 : i32
    return %arg2, %arg1 : i32, i32
  }
  func.func @transform_2(%arg0: i32, %arg1: i32, %arg2: i32) -> (i32, i32) {
    %c0_i32 = arith.constant 0 : i32
    %c0_i32_0 = arith.constant 0 : i32
    return %c0_i32, %arg1 : i32, i32
  }
  func.func @transform_3(%arg0: i32, %arg1: i32, %arg2: i32) -> (i32, i32) {
    %c0_i32 = arith.constant 0 : i32
    return %arg0, %arg1 : i32, i32
  }
}

module attributes {stable_mosaic.version = 11 : i64} {
  func.func @_mm_kernel(%arg0: i32, %arg1: i32, %arg2: i32, %arg3: memref<16x768xbf16, #tpu.memory_space<vmem>>, %arg4: memref<768x128xbf16, #tpu.memory_space<vmem>>, %arg5: memref<16x128xf32, #tpu.memory_space<vmem>>) attributes {dimension_semantics = [#tpu.dimension_semantics<parallel>, #tpu.dimension_semantics<parallel>, #tpu.dimension_semantics<arbitrary>], iteration_bounds = array<i64: 1, 1, 6>, scalar_prefetch = 0 : i64, scratch_operands = 0 : i64, tpu.core_type = #tpu.core_type<tc>, window_params = [{transform_indices = @transform_0, window_bounds = array<i64: 16, 768>}, {transform_indices = @transform_1, window_bounds = array<i64: 768, 128>}, {transform_indices = @transform_2, window_bounds = array<i64: 16, 128>}]} {
    %c0_i32 = arith.constant 0 : i32
    %0 = arith.cmpi eq, %arg2, %c0_i32 : i32
    %1 = arith.extui %0 : i1 to i32
    %c0_i32_0 = arith.constant 0 : i32
    %2 = arith.cmpi ne, %1, %c0_i32_0 : i32
    scf.if %2 {
      %cst_8 = arith.constant 0.000000e+00 : f32
      %9 = vector.broadcast %cst_8 : f32 to vector<16x128xf32>
      %c0_9 = arith.constant 0 : index
      %c0_10 = arith.constant 0 : index
      %10 = vector.load %arg5[%c0_9, %c0_10] : memref<16x128xf32, #tpu.memory_space<vmem>>, vector<16x128xf32>
      tpu.vector_store %arg5[%c0_9, %c0_10], %9 {strides = array<i32>} : memref<16x128xf32, #tpu.memory_space<vmem>>, vector<16x128xf32>,
    } else {
    }
    %c0 = arith.constant 0 : index
    %c0_1 = arith.constant 0 : index
    %3 = vector.load %arg5[%c0, %c0_1] : memref<16x128xf32, #tpu.memory_space<vmem>>, vector<16x128xf32>
    %c0_2 = arith.constant 0 : index
    %c0_3 = arith.constant 0 : index
    %4 = vector.load %arg3[%c0_2, %c0_3] : memref<16x768xbf16, #tpu.memory_space<vmem>>, vector<16x768xbf16>
    %c0_4 = arith.constant 0 : index
    %c0_5 = arith.constant 0 : index
    %5 = vector.load %arg4[%c0_4, %c0_5] : memref<768x128xbf16, #tpu.memory_space<vmem>>, vector<768x128xbf16>
    %cst = arith.constant dense<0.000000e+00> : vector<16x128xf32>
    %6 = tpu.matmul %4, %5, %cst {dimension_numbers = #tpu.dot_dimension_numbers<[1], [0], [0], [1], [0, 0, 1, 1], [], []>} : vector<16x768xbf16>, vector<768x128xbf16>, vector<16x128xf32> -> vector<16x128xf32>
    %7 = arith.addf %3, %6 : vector<16x128xf32>
    %c0_6 = arith.constant 0 : index
    %c0_7 = arith.constant 0 : index
    %8 = vector.load %arg5[%c0_6, %c0_7] : memref<16x128xf32, #tpu.memory_space<vmem>>, vector<16x128xf32>
    tpu.vector_store %arg5[%c0_6, %c0_7], %7 {strides = array<i32>} : memref<16x128xf32, #tpu.memory_space<vmem>>, vector<16x128xf32>,
    return
  }
  func.func @transform_0(%arg0: i32, %arg1: i32, %arg2: i32) -> (i32, i32) {
    %c0_i32 = arith.constant 0 : i32
    return %arg0, %arg2 : i32, i32
  }
  func.func @transform_1(%arg0: i32, %arg1: i32, %arg2: i32) -> (i32, i32) {
    %c0_i32 = arith.constant 0 : i32
    return %arg2, %arg1 : i32, i32
  }
  func.func @transform_2(%arg0: i32, %arg1: i32, %arg2: i32) -> (i32, i32) {
    %c0_i32 = arith.constant 0 : i32
    return %arg0, %arg1 : i32, i32
  }
}

</mosaic_0001>

<bundles_post_ra>
// kernel: plan_ankh_prostt5_forward.7
= control target key start
LH: loop header
LB: loop body
LE: loop exit
PB: predicated region body
PF: predicated region fallthrough
CT: control target
= control target key end

     0   :  { %v34_v0 = vlaneseq  ;;  %s252_s0 = inlined_call_operand.vmem [shape: bf16[16,768], index: 0, kind: input, shape index: {}]   ;;  %s253_s1 = inlined_call_operand.vmem [shape: f32[1,768], index: 1, kind: input, shape index: {}]   ;;  %s254_s2 = inlined_call_operand.vmem [shape: f32[1,768], index: 2, kind: input, shape index: {}]   ;;  %s255_s3 = inlined_call_operand.vmem [shape: bf16[16,768], index: 3, kind: output, shape index: {}]  }
   0x1   :  { %v14_v1 = vld [vmem:[%s252_s0] sm:$0xff]  ;;  %v15_v5 = vld [vmem:[%s252_s0 + $0x8] sm:$0xff]  ;;  %v16_v6 = vld [vmem:[%s252_s0 + $0x10] sm:$0xff] }
   0x2   :  { %v20_v2 = vunpack.c.l.bf16 %v14_v1  ;;  %v21_v3 = vunpack.c.h.bf16 %v14_v1  ;;  %v35_v4 = vshrl.u32 %v34_v0, 7  ;;  %v17_v7 = vld [vmem:[%s252_s0 + $0x18] sm:$0xff]  ;;  %v32_v8 = vld [vmem:[%s253_s1] sm:$0x3f]  ;;  %v22_v10 = vunpack.c.l.bf16 %v15_v5  ;;  %v19_v55 = vld [vmem:[%s252_s0 + $0x28] sm:$0xff] }
   0x3   :  { %v76_v9 = vld [vmem:[%s254_s2] sm:$0x3f]  ;;  %v23_v11 = vunpack.c.h.bf16 %v15_v5  ;;  %v24_v12 = vunpack.c.l.bf16 %v16_v6  ;;  %v25_v13 = vunpack.c.h.bf16 %v16_v6  ;;  %v26_v20 = vunpack.c.l.bf16 %v17_v7 }
   0x4   :  { %v36_v14 = vsub.s32 0, %v35_v4  ;;  %v40_v15 = vsub.s32 1, %v35_v4  ;;  %v44_v16 = vsub.s32 2, %v35_v4  ;;  %v48_v17 = vsub.s32 3, %v35_v4  ;;  %v18_v46 = vld [vmem:[%s252_s0 + $0x20] sm:$0xff] }
   0x5   :  { %v52_v18 = vsub.s32 4, %v35_v4  ;;  %v56_v19 = vsub.s32 5, %v35_v4  ;;  %v27_v21 = vunpack.c.h.bf16 %v17_v7  ;;  %v28_v59 = vunpack.c.l.bf16 %v18_v46 }
   0x6   :  { %v37_v22 = vrot.slane %v32_v8, %v36_v14  ;;  %v41_v23 = vrot.slane %v32_v8, %v40_v15  ;;  %v81_v24 = vrot.slane %v76_v9, %v36_v14  ;;  %v85_v25 = vrot.slane %v76_v9, %v40_v15 }
   0x7   :  { %v45_v26 = vrot.slane %v32_v8, %v44_v16  ;;  %v49_v27 = vrot.slane %v32_v8, %v48_v17  ;;  %v89_v28 = vrot.slane %v76_v9, %v44_v16  ;;  %v93_v29 = vrot.slane %v76_v9, %v48_v17 }
   0x8   :  { %v64_v30 = vmul.f32 %v37_v22, %v20_v2  ;;  %v65_v31 = vmul.f32 %v41_v23, %v21_v3  ;;  %v53_v32 = vrot.slane %v32_v8, %v52_v18  ;;  %v57_v33 = vrot.slane %v32_v8, %v56_v19 }
   0x9   :  { %v66_v34 = vmul.f32 %v45_v26, %v22_v10  ;;  %v67_v35 = vmul.f32 %v49_v27, %v23_v11  ;;  %v97_v36 = vrot.slane %v76_v9, %v52_v18  ;;  %v101_v37 = vrot.slane %v76_v9, %v56_v19 }
   0xa   :  { %v108_v38 = vadd.f32 %v81_v24, %v64_v30  ;;  %v109_v39 = vadd.f32 %v85_v25, %v65_v31  ;;  %v68_v40 = vmul.f32 %v53_v32, %v24_v12  ;;  %v69_v41 = vmul.f32 %v57_v33, %v25_v13 }
   0xb   :  { %v110_v42 = vadd.f32 %v89_v28, %v66_v34  ;;  %v111_v43 = vadd.f32 %v93_v29, %v67_v35  ;;  %v70_v44 = vmul.f32 %v37_v22, %v26_v20  ;;  %v71_v45 = vmul.f32 %v41_v23, %v27_v21 }
   0xc   :  { %v120_v47 = vmax.f32 %v108_v38, 0.0  ;;  %v121_v48 = vmax.f32 %v109_v39, 0.0  ;;  %v112_v49 = vadd.f32 %v97_v36, %v68_v40  ;;  %v113_v50 = vadd.f32 %v101_v37, %v69_v41 }
   0xd   :  { %v122_v51 = vmax.f32 %v110_v42, 0.0  ;;  %v123_v52 = vmax.f32 %v111_v43, 0.0  ;;  %v114_v53 = vadd.f32 %v81_v24, %v70_v44  ;;  %v115_v54 = vadd.f32 %v85_v25, %v71_v45 }
   0xe   :  { %v184_v56 = vpack.c.bf16 %v121_v48, %v120_v47  ;;  %v124_v57 = vmax.f32 %v112_v49, 0.0  ;;  %v125_v58 = vmax.f32 %v113_v50, 0.0  ;;  %v29_v63 = vunpack.c.h.bf16 %v18_v46 }
   0xf   :  { %v185_v60 = vpack.c.bf16 %v123_v52, %v122_v51  ;;  %v126_v61 = vmax.f32 %v114_v53, 0.0  ;;  %v127_v62 = vmax.f32 %v115_v54, 0.0  ;;  %v72_v1 = vmul.f32 %v45_v26, %v28_v59 }
  0x10   :  { %168 = vst [vmem:[%s255_s3] sm:$0xff] %v184_v56  ;;  %v186_v0 = vpack.c.bf16 %v125_v58, %v124_v57  ;;  %v30_v2 = vunpack.c.l.bf16 %v19_v55  ;;  %v31_v3 = vunpack.c.h.bf16 %v19_v55  ;;  %v73_v5 = vmul.f32 %v49_v27, %v29_v63 }
  0x11   :  { %169 = vst [vmem:[%s255_s3 + $0x8] sm:$0xff] %v185_v60  ;;  %v187_v4 = vpack.c.bf16 %v127_v62, %v126_v61  ;;  %v116_v6 = vadd.f32 %v89_v28, %v72_v1 }
  0x12   :  { %170 = vst [vmem:[%s255_s3 + $0x10] sm:$0xff] %v186_v0  ;;  %v74_v7 = vmul.f32 %v53_v32, %v30_v2  ;;  %v75_v8 = vmul.f32 %v57_v33, %v31_v3  ;;  %v117_v9 = vadd.f32 %v93_v29, %v73_v5 }
  0x13   :  { %171 = vst [vmem:[%s255_s3 + $0x18] sm:$0xff] %v187_v4  ;;  %v128_v10 = vmax.f32 %v116_v6, 0.0 }
  0x14   :  { %v118_v11 = vadd.f32 %v97_v36, %v74_v7  ;;  %v119_v12 = vadd.f32 %v101_v37, %v75_v8  ;;  %v129_v13 = vmax.f32 %v117_v9, 0.0 }
  0x16   :  { %v130_v14 = vmax.f32 %v118_v11, 0.0  ;;  %v131_v15 = vmax.f32 %v119_v12, 0.0  ;;  %v188_v16 = vpack.c.bf16 %v129_v13, %v128_v10 }
  0x18   :  { %v189_v17 = vpack.c.bf16 %v131_v15, %v130_v14  ;;  %172 = vst [vmem:[%s255_s3 + $0x20] sm:$0xff] %v188_v16 }
  0x1a   :  { %173 = vst [vmem:[%s255_s3 + $0x28] sm:$0xff] %v189_v17 }

// kernel: plan_ankh_prostt5_forward.6
= control target key start
LH: loop header
LB: loop body
LE: loop exit
PB: predicated region body
PF: predicated region fallthrough
CT: control target
= control target key end

     0   :  { %9 = vsyncpa [#allocation5], 0  ;;  %s4274_s0 = inlined_call_operand.vmem [shape: bf16[16,7680], index: 0, kind: input, shape index: {}]   ;;  %s4275_s1 = inlined_call_operand.hbm [shape: bf16[7680,768], index: 1, kind: input, shape index: {}]   ;;  %s4276_s2 = inlined_call_operand.vmem [shape: bf16[16,768], index: 2, kind: output, shape index: {0}]   ;;  %s4277_s3 = inlined_call_operand.vmem [shape: f32[1,2,768], index: 3, kind: output, shape index: {1}]  }
   0x1   :  { %11 = vsyncpa [#allocation5 + $0x1], 0  ;;  %s3807_s12 = smov 0   ;;  %s3809_s13 = smov 0  }
   0x2   :  { %s3811_s14 = smov 0   ;;  %s3813_s15 = smov 0  }
   0x3   :  { %s3815_s16 = smov 0   ;;  %s3817_s17 = smov 0  }
   0x4 LB: > { %s2877_s18 = sadd.s32 4294967295, %s3780_s17   ;;  %s29_s19 = sadd.s32 1, %s3776_s16  ;;  %s3780_s17 = sphi %s3817_s17, %s17_s17   ;;  %s3776_s16 = sphi %s3815_s16, %s4284_s16   ;;  %s3772_s15 = sphi %s3813_s15, %s4283_s15   ;;  %s3768_s14 = sphi %s3811_s14, %s4282_s14   ;;  %s3764_s13 = sphi %s3809_s13, %s4281_s13   ;;  %s3760_s12 = sphi %s3807_s12, %s4280_s12  }
   0x5   : > { %p30_p0 = scmp.ge.s32.totalorder %s29_s19, 10  ;;  %s45_s20 = sadd.s32 1, %s3768_s14 }
   0x6   : > { %p52_p1 = scmp.ne.s32.totalorder %s3768_s14, %s3764_s13  ;;  %p53_p2 = scmp.eq.s32.totalorder %s3780_s17, 0 }
   0x7   : > { %s4286_s19 = smov (%p30_p0, %s29_s19), 0  ;;  %p86_p4 = scmp.ne.s32.totalorder %s3764_s13, %s3760_s12 }
   0x8   : > { %p3843_p3 = por %p53_p2, %p52_p1  ;;  %s41_s22 = ssub.s32 %s3776_s16, %s4286_s19 }
   0x9   : > { %p87_p5 = scmp.eq.s32.totalorder %s2877_s18, 0  ;;  %p43_p6 = scmp.eq.s32.totalorder %s41_s22, 0 }
   0xa   : > { %p2879_p8 = scmp.ge.s32.totalorder %s3780_s17, 10 }
   0xb   : > { %p3850_p7 = por %p87_p5, %p86_p4 }
   0xc   : > { %s3855_s24 = scalar_select %p43_p6, %s3768_s14, %s45_s20  }
   0xd   : > { %162 = sbr.rel (%p2879_p8) target bundleno = 43 (0x2b), region = 16 }
  0x12   : > { %165 = sbr.rel (!%p3843_p3) target bundleno = 26 (0x1a), region = 20  ;;  %s167_s25 = sand.u32 (%p3843_p3), 1, %s3768_s14  }
  0x13   : > { %s3192_s26 = smul.u32 (%p3843_p3), 24, %s3776_s16 }
  0x14   : > { %s3199_s27 = smul.u32 (%p3843_p3), 48, %s167_s25 }
  0x15   : > { %s175_s30 = scalar_lea.vmem (%p3843_p3), %s4274_s0, %s3192_s26 }
  0x16   : > { %v188_v0 = vld [vmem:[%s175_s30] sm:$0xff] (%p3843_p3)  ;;  %v190_v1 = vld [vmem:[%s175_s30 + $0x8] sm:$0xff] (%p3843_p3)  ;;  %v192_v2 = vld [vmem:[%s175_s30 + $0x10] sm:$0xff] (%p3843_p3)  ;;  %s169_s4 = scalar_lea.vmem (%p3843_p3), [#allocation3], %s3199_s27 }
  0x17   : > { %189 = vst [vmem:[%s169_s4] sm:$0xff] %v188_v0  ;;  %191 = vst [vmem:[%s169_s4 + $0x8] sm:$0xff] %v190_v1  ;;  %v194_v3 = vld [vmem:[%s175_s30 + $0xf0] sm:$0xff]  ;;  %v196_v4 = vld [vmem:[%s175_s30 + $0xf8] sm:$0xff] }
  0x18   : > { %193 = vst [vmem:[%s169_s4 + $0x10] sm:$0xff] %v192_v2  ;;  %v198_v5 = vld [vmem:[%s175_s30 + $0x100] sm:$0xff]  ;;  %195 = vst [vmem:[%s169_s4 + $0x18] sm:$0xff] %v194_v3 }
  0x19   : > { %197 = vst [vmem:[%s169_s4 + $0x20] sm:$0xff] %v196_v4  ;;  %199 = vst [vmem:[%s169_s4 + $0x28] sm:$0xff] %v198_v5 }
  0x1a PF: > { %s206_s5 = sand.u32 1, %s3768_s14   ;;  %s3206_s7 = smul.u32 36864, %s3776_s16 }
  0x1b   : > { %s3200_s6 = smul.u32 2304, %s206_s5  ;;  %s207_s18 = scalar_lea.sflag [#allocation5], %s206_s5 }
  0x1c   : > { %s219_s10 = scalar_lea.hbm %s4275_s1, %s3206_s7  ;;  %s3782_s22 = smov [#allocation4]  }
  0x1d   : > { %s210_s11 = scalar_lea.vmem [#allocation4], %s3200_s6  ;;  %s3720_s25 = sshll.u32 %s3782_s22, 4  ;;  %s3721_s25 = int_to_ptr.vmem [resolvable:$false] %s3720_s25 }
  0x1e   : > { %s220_s12 = sshll.u32 %s210_s11, 4  ;;  %s3722_s26 = scalar_lea.vmem %s3721_s25, 73728  ;;  %s221_s12 = int_to_ptr.vmem [resolvable:$true] %s220_s12 }
  0x1f   : > { %s3716_s20 = scalar_lea.vmem %s221_s12, 36864  ;;  %p3723_p12 = scmp.lt.s32.totalorder %s221_s12, %s3721_s25 }
  0x20   : > { %p3717_p9 = scmp.ne.s32.totalorder %s221_s12, %s3716_s20  ;;  %p3724_p13 = scmp.lt.s32.totalorder %s3722_s26, %s3716_s20 }
  0x22   : > { %p3718_p10 = pnand %p3717_p9, %p3843_p3  ;;  %p3725_p0 = por %p3724_p13, %p3723_p12 }
  0x24   : > { %p3719_p11 = pneg %p3718_p10 }
  0x26   : > { %p3726_p1 = pnand %p3725_p0, %p3719_p11 }
  0x28   : > { %3729 = shalt.err (!%p3726_p1)
}
  0x29   : > { %s3783_s27 = smov 384   ;;  %s3784_s28 = smov 24  }
  0x2a   : > { %3204 = dma.hbm_to_vmem [thread:$0]  (%p3843_p3), %s219_s10, 36864, %s221_s12, %s207_s18, %s3783_s27, %s3783_s27, %s3784_s28  }
  0x2b PF: > { %p2882_p2 = scmp.ge.s32.totalorder %s3780_s17, 1  ;;  %p228_p4 = scmp.lt.s32.totalorder %s3780_s17, 11 }
  0x2d   : > { %p229_p5 = pnand %p2882_p2, %p228_p4 }
  0x2e   : > { %s235_s29 = sand.u32 (!%p229_p5), 1, %s3764_s13  }
  0x2f   : > { %232 = sbr.rel (%p229_p5) target bundleno = 630 (0x276), region = 47  ;;  %s242_s6 = scalar_lea.sflag (!%p229_p5), [#allocation5], %s235_s29 }
  0x30   : > { %s3202_s30 = smul.u32 (!%p229_p5), 48, %s235_s29 }
  0x31   : > { %s3203_s4 = smul.u32 (!%p229_p5), 2304, %s235_s29 }
  0x32   : > { %s3877_s5 = scalar_lea.vmem (!%p229_p5), [#allocation3], %s3202_s30 }
  0x33   : > { %s3879_s7 = scalar_lea.vmem (!%p229_p5), [#allocation4], %s3203_s4 }
  0x34   : > { %3755 = dma.done.wait (%p3850_p7), %s242_s6, 36864  }
  0x35   : > { %3757 = vsyncadd (%p3850_p7), %s242_s6, 4294930432  ;;  %p2883_p3 = scmp.ne.s32.totalorder %s3772_s15, 0 }
  0x37   : > { %315 = sbr.rel (%p2883_p3) target bundleno = 67 (0x43), region = 59 }
  0x3c   : > { %v3785_v6 = vmov 0.0  }
  0x3d   : > { %316 = vst [vmem:[#allocation2 + $0x30] sm:$0xff] %v3785_v6  ;;  %317 = vst [vmem:[#allocation2] sm:$0xff] %v3785_v6 }
  0x3e   : > { %318 = vst [vmem:[#allocation2 + $0x58] sm:$0xff] %v3785_v6  ;;  %319 = vst [vmem:[#allocation2 + $0x18] sm:$0xff] %v3785_v6 }
  0x3f   : > { %320 = vst [vmem:[#allocation2 + $0x50] sm:$0xff] %v3785_v6  ;;  %321 = vst [vmem:[#allocation2 + $0x20] sm:$0xff] %v3785_v6 }
  0x40   : > { %322 = vst [vmem:[#allocation2 + $0x8] sm:$0xff] %v3785_v6  ;;  %323 = vst [vmem:[#allocation2 + $0x38] sm:$0xff] %v3785_v6 }
  0x41   : > { %324 = vst [vmem:[#allocation2 + $0x28] sm:$0xff] %v3785_v6  ;;  %325 = vst [vmem:[#allocation2 + $0x48] sm:$0xff] %v3785_v6 }
  0x42   : > { %326 = vst [vmem:[#allocation2 + $0x10] sm:$0xff] %v3785_v6  ;;  %327 = vst [vmem:[#allocation2 + $0x40] sm:$0xff] %v3785_v6 }
  0x43 PF: > { %v3259_v7 = vld [vmem:[%s3879_s7 + $0x154] ss:$24 sps:$4 sm:$0xff]   ;;  %v3263_v9 = vld [vmem:[%s3879_s7 + $0x150] ss:$24 sps:$4 sm:$0xff]   ;;  %v3265_v11 = vld [vmem:[%s3879_s7 + $0x124] ss:$24 sps:$4 sm:$0xff]  }
  0x44   : > { %v3261_v8 = vld [vmem:[%s3879_s7 + $0x454] ss:$24 sps:$4 sm:$0xff]   ;;  %2104 = vmatprep.subr.bf16.mxu0 %v3259_v7  ;;  %v3264_v10 = vld [vmem:[%s3879_s7 + $0x450] ss:$24 sps:$4 sm:$0xff]   ;;  %v3267_v12 = vld [vmem:[%s3879_s7 + $0x424] ss:$24 sps:$4 sm:$0xff]  }
  0x45   : > { %2147 = vmatprep.subr.bf16.mxu1 %v3261_v8  ;;  %2105 = vmatpush1.bf16.msra.mxu0 %v3263_v9  ;;  %v3269_v13 = vld [vmem:[%s3879_s7 + $0x120] ss:$24 sps:$4 sm:$0xff]   ;;  %v3271_v15 = vld [vmem:[%s3879_s7 + $0xf4] ss:$24 sps:$4 sm:$0xff]   ;;  %v3275_v17 = vld [vmem:[%s3879_s7 + $0xf0] ss:$24 sps:$4 sm:$0xff]  }
  0x46   : > { %2148 = vmatpush1.bf16.msra.mxu1 %v3264_v10  ;;  %2106 = vmatprep.subr.bf16.mxu0 %v3265_v11  ;;  %v3270_v14 = vld [vmem:[%s3879_s7 + $0x420] ss:$24 sps:$4 sm:$0xff]   ;;  %v3273_v16 = vld [vmem:[%s3879_s7 + $0x3f4] ss:$24 sps:$4 sm:$0xff]   ;;  %v3276_v18 = vld [vmem:[%s3879_s7 + $0x3f0] ss:$24 sps:$4 sm:$0xff]  }
  0x47   : > { %2149 = vmatprep.subr.bf16.mxu1 %v3267_v12  ;;  %v3277_v19 = vld [vmem:[%s3879_s7 + $0xc4] ss:$24 sps:$4 sm:$0xff]   ;;  %v3281_v21 = vld [vmem:[%s3879_s7 + $0xc0] ss:$24 sps:$4 sm:$0xff]   ;;  %v3283_v23 = vld [vmem:[%s3879_s7 + $0x94] ss:$24 sps:$4 sm:$0xff]  }
  0x48   : > { %v3279_v20 = vld [vmem:[%s3879_s7 + $0x3c4] ss:$24 sps:$4 sm:$0xff]   ;;  %v3282_v22 = vld [vmem:[%s3879_s7 + $0x3c0] ss:$24 sps:$4 sm:$0xff]   ;;  %v3285_v24 = vld [vmem:[%s3879_s7 + $0x394] ss:$24 sps:$4 sm:$0xff]  }
  0x49   : > { %2107 = vmatpush1.bf16.msra.mxu0 %v3269_v13  ;;  %v3287_v25 = vld [vmem:[%s3879_s7 + $0x90] ss:$24 sps:$4 sm:$0xff]   ;;  %v3289_v27 = vld [vmem:[%s3879_s7 + $0x64] ss:$24 sps:$4 sm:$0xff]   ;;  %v3293_v29 = vld [vmem:[%s3879_s7 + $0x60] ss:$24 sps:$4 sm:$0xff]  }
  0x4a   : > { %2150 = vmatpush1.bf16.msra.mxu1 %v3270_v14  ;;  %2108 = vmatprep.subr.bf16.mxu0 %v3271_v15  ;;  %v3288_v26 = vld [vmem:[%s3879_s7 + $0x390] ss:$24 sps:$4 sm:$0xff]   ;;  %v3291_v28 = vld [vmem:[%s3879_s7 + $0x364] ss:$24 sps:$4 sm:$0xff]   ;;  %v3294_v30 = vld [vmem:[%s3879_s7 + $0x360] ss:$24 sps:$4 sm:$0xff]  }
  0x4b   : > { %2151 = vmatprep.subr.bf16.mxu1 %v3273_v16  ;;  %v3295_v31 = vld [vmem:[%s3879_s7 + $0x34] ss:$24 sps:$4 sm:$0xff]   ;;  %v3299_v33 = vld [vmem:[%s3879_s7 + $0x30] ss:$24 sps:$4 sm:$0xff]   ;;  %v3301_v35 = vld [vmem:[%s3879_s7 + $0x4] ss:$24 sps:$4 sm:$0xff]  }
  0x4c   : > { %v3297_v32 = vld [vmem:[%s3879_s7 + $0x334] ss:$24 sps:$4 sm:$0xff]   ;;  %v3300_v34 = vld [vmem:[%s3879_s7 + $0x330] ss:$24 sps:$4 sm:$0xff]   ;;  %v3303_v36 = vld [vmem:[%s3879_s7 + $0x304] ss:$24 sps:$4 sm:$0xff]  }
  0x4d   : > { %2109 = vmatpush1.bf16.msra.mxu0 %v3275_v17  ;;  %v3305_v37 = vld [vmem:[%s3879_s7] ss:$24 sps:$4 sm:$0xff]   ;;  %v3307_v39 = vld [vmem:[%s3879_s7 + $0x2d4] ss:$24 sps:$4 sm:$0xff]   ;;  %v3311_v41 = vld [vmem:[%s3879_s7 + $0x2d0] ss:$24 sps:$4 sm:$0xff]  }
  0x4e   : > { %2152 = vmatpush1.bf16.msra.mxu1 %v3276_v18  ;;  %2110 = vmatprep.subr.bf16.mxu0 %v3277_v19  ;;  %v3306_v38 = vld [vmem:[%s3879_s7 + $0x300] ss:$24 sps:$4 sm:$0xff]   ;;  %v3309_v40 = vld [vmem:[%s3879_s7 + $0x5d4] ss:$24 sps:$4 sm:$0xff]   ;;  %v3312_v42 = vld [vmem:[%s3879_s7 + $0x5d0] ss:$24 sps:$4 sm:$0xff]  }
  0x4f   : > { %2153 = vmatprep.subr.bf16.mxu1 %v3279_v20  ;;  %v3313_v43 = vld [vmem:[%s3879_s7 + $0x2a4] ss:$24 sps:$4 sm:$0xff]   ;;  %v3317_v45 = vld [vmem:[%s3879_s7 + $0x2a0] ss:$24 sps:$4 sm:$0xff]   ;;  %v3319_v47 = vld [vmem:[%s3879_s7 + $0x274] ss:$24 sps:$4 sm:$0xff]  }
  0x50   : > { %v3315_v44 = vld [vmem:[%s3879_s7 + $0x5a4] ss:$24 sps:$4 sm:$0xff]   ;;  %v3318_v46 = vld [vmem:[%s3879_s7 + $0x5a0] ss:$24 sps:$4 sm:$0xff]   ;;  %v3321_v48 = vld [vmem:[%s3879_s7 + $0x574] ss:$24 sps:$4 sm:$0xff]  }
  0x51   : > { %2111 = vmatpush1.bf16.msra.mxu0 %v3281_v21  ;;  %v3323_v49 = vld [vmem:[%s3879_s7 + $0x270] ss:$24 sps:$4 sm:$0xff]   ;;  %v3325_v51 = vld [vmem:[%s3879_s7 + $0x244] ss:$24 sps:$4 sm:$0xff]   ;;  %v3329_v53 = vld [vmem:[%s3879_s7 + $0x240] ss:$24 sps:$4 sm:$0xff]  }
  0x52   : > { %2154 = vmatpush1.bf16.msra.mxu1 %v3282_v22  ;;  %2112 = vmatprep.subr.bf16.mxu0 %v3283_v23  ;;  %v3324_v50 = vld [vmem:[%s3879_s7 + $0x570] ss:$24 sps:$4 sm:$0xff]   ;;  %v3327_v52 = vld [vmem:[%s3879_s7 + $0x544] ss:$24 sps:$4 sm:$0xff]   ;;  %v3330_v54 = vld [vmem:[%s3879_s7 + $0x540] ss:$24 sps:$4 sm:$0xff]  }
  0x53   : > { %2155 = vmatprep.subr.bf16.mxu1 %v3285_v24  ;;  %v3355_v55 = vld [vmem:[%s3877_s5 + $0x4] ss:$24 sps:$4 sm:$0xff]   ;;  %v3335_v59 = vld [vmem:[%s3879_s7 + $0x210] ss:$24 sps:$4 sm:$0xff]   ;;  %v3341_v63 = vld [vmem:[%s3879_s7 + $0x1e0] ss:$24 sps:$4 sm:$0xff]  }
  0x54   : > { %v3331_v56 = vld [vmem:[%s3879_s7 + $0x214] ss:$24 sps:$4 sm:$0xff]   ;;  %2136 = vmatprep.mubr.bf16.mxu0 %v3355_v55  ;;  %v3336_v60 = vld [vmem:[%s3879_s7 + $0x510] ss:$24 sps:$4 sm:$0xff]   ;;  %v3337_v61 = vld [vmem:[%s3879_s7 + $0x1e4] ss:$24 sps:$4 sm:$0xff]  }
  0x55   : > { %2113 = vmatpush1.bf16.msra.mxu0 %v3287_v25  ;;  %v3937_v57 = vld [vmem:[%s3877_s5 + $0xc] ss:$24 sps:$4 sm:$0xff]   ;;  %v3342_v0 = vld [vmem:[%s3879_s7 + $0x4e0] ss:$24 sps:$4 sm:$0xff]   ;;  %v3347_v3 = vld [vmem:[%s3879_s7 + $0x1b0] ss:$24 sps:$4 sm:$0xff]  }
  0x56   : > { %2156 = vmatpush1.bf16.msra.mxu1 %v3288_v26  ;;  %2114 = vmatprep.subr.bf16.mxu0 %v3289_v27  ;;  %v3333_v58 = vld [vmem:[%s3879_s7 + $0x514] ss:$24 sps:$4 sm:$0xff]   ;;  %v3339_v62 = vld [vmem:[%s3879_s7 + $0x4e4] ss:$24 sps:$4 sm:$0xff]   ;;  %v3348_v4 = vld [vmem:[%s3879_s7 + $0x4b0] ss:$24 sps:$4 sm:$0xff]  }
  0x57   : > { %2157 = vmatprep.subr.bf16.mxu1 %v3291_v28  ;;  %2179 = vmatprep.mubr.bf16.mxu1 %v3937_v57  ;;  %v3343_v1 = vld [vmem:[%s3879_s7 + $0x1b4] ss:$24 sps:$4 sm:$0xff]   ;;  %v3349_v5 = vld [vmem:[%s3879_s7 + $0x184] ss:$24 sps:$4 sm:$0xff]   ;;  %v3353_v7 = vld [vmem:[%s3879_s7 + $0x180] ss:$24 sps:$4 sm:$0xff]  }
  0x58   : > { %v3345_v2 = vld [vmem:[%s3879_s7 + $0x4b4] ss:$24 sps:$4 sm:$0xff]   ;;  %v3351_v6 = vld [vmem:[%s3879_s7 + $0x484] ss:$24 sps:$4 sm:$0xff]   ;;  %v3354_v8 = vld [vmem:[%s3879_s7 + $0x480] ss:$24 sps:$4 sm:$0xff]  }
  0x59   : > { %2115 = vmatpush1.bf16.msra.mxu0 %v3293_v29  ;;  %v3363_v9 = vld [vmem:[%s3879_s7 + $0x754] ss:$24 sps:$4 sm:$0xff]   ;;  %v3958_v11 = vld [vmem:[%s3877_s5] ss:$24 sps:$4 sm:$0xff]   ;;  %v3369_v15 = vld [vmem:[%s3879_s7 + $0x724] ss:$24 sps:$4 sm:$0xff]  }
  0x5a   : > { %2158 = vmatpush1.bf16.msra.mxu1 %v3294_v30  ;;  %2116 = vmatprep.subr.bf16.mxu0 %v3295_v31  ;;  %v3366_v10 = vld [vmem:[%s3879_s7 + $0x15c] ss:$24 sps:$4 sm:$0xff]   ;;  %v3961_v12 = vld [vmem:[%s3877_s5 + $0x8] ss:$24 sps:$4 sm:$0xff]   ;;  %v3372_v16 = vld [vmem:[%s3879_s7 + $0x12c] ss:$24 sps:$4 sm:$0xff]  }
  0x5b   : > { %2159 = vmatprep.subr.bf16.mxu1 %v3297_v32  ;;  %v3361_v13 = vld [vmem:[%s3879_s7 + $0x750] ss:$24 sps:$4 sm:$0xff]   ;;  %v3367_v17 = vld [vmem:[%s3879_s7 + $0x720] ss:$24 sps:$4 sm:$0xff]   ;;  %v3375_v19 = vld [vmem:[%s3879_s7 + $0x6f4] ss:$24 sps:$4 sm:$0xff]  }
  0x5c   : > { %v3364_v14 = vld [vmem:[%s3879_s7 + $0x158] ss:$24 sps:$4 sm:$0xff]   ;;  %v3370_v18 = vld [vmem:[%s3879_s7 + $0x128] ss:$24 sps:$4 sm:$0xff]   ;;  %v3378_v20 = vld [vmem:[%s3879_s7 + $0xfc] ss:$24 sps:$4 sm:$0xff]  }
  0x5d   : > { %2117 = vmatpush1.bf16.msra.mxu0 %v3299_v33  ;;  %v3373_v21 = vld [vmem:[%s3879_s7 + $0x6f0] ss:$24 sps:$4 sm:$0xff]   ;;  %v3381_v23 = vld [vmem:[%s3879_s7 + $0x6c4] ss:$24 sps:$4 sm:$0xff]   ;;  %v3379_v25 = vld [vmem:[%s3879_s7 + $0x6c0] ss:$24 sps:$4 sm:$0xff]  }
  0x5e   : > { %2160 = vmatpush1.bf16.msra.mxu1 %v3300_v34  ;;  %2118 = vmatprep.subr.bf16.mxu0 %v3301_v35  ;;  %v3376_v22 = vld [vmem:[%s3879_s7 + $0xf8] ss:$24 sps:$4 sm:$0xff]   ;;  %v3384_v24 = vld [vmem:[%s3879_s7 + $0xcc] ss:$24 sps:$4 sm:$0xff]   ;;  %v3382_v26 = vld [vmem:[%s3879_s7 + $0xc8] ss:$24 sps:$4 sm:$0xff]  }
  0x5f   : > { %2161 = vmatprep.subr.bf16.mxu1 %v3303_v36  ;;  %v3387_v27 = vld [vmem:[%s3879_s7 + $0x694] ss:$24 sps:$4 sm:$0xff]   ;;  %v3385_v29 = vld [vmem:[%s3879_s7 + $0x690] ss:$24 sps:$4 sm:$0xff]   ;;  %v3393_v31 = vld [vmem:[%s3879_s7 + $0x664] ss:$24 sps:$4 sm:$0xff]  }
  0x60   : > { %v3390_v28 = vld [vmem:[%s3879_s7 + $0x9c] ss:$24 sps:$4 sm:$0xff]   ;;  %v3388_v30 = vld [vmem:[%s3879_s7 + $0x98] ss:$24 sps:$4 sm:$0xff]   ;;  %v3396_v32 = vld [vmem:[%s3879_s7 + $0x6c] ss:$24 sps:$4 sm:$0xff]  }
  0x61   : > { %2119 = vmatpush1.bf16.msra.mxu0 %v3305_v37  ;;  %v3391_v33 = vld [vmem:[%s3879_s7 + $0x660] ss:$24 sps:$4 sm:$0xff]   ;;  %v3399_v35 = vld [vmem:[%s3879_s7 + $0x634] ss:$24 sps:$4 sm:$0xff]   ;;  %v3397_v37 = vld [vmem:[%s3879_s7 + $0x630] ss:$24 sps:$4 sm:$0xff]  }
  0x62   : > { %2162 = vmatpush1.bf16.msra.mxu1 %v3306_v38  ;;  %2120 = vmatprep.subr.bf16.mxu0 %v3307_v39  ;;  %v3394_v34 = vld [vmem:[%s3879_s7 + $0x68] ss:$24 sps:$4 sm:$0xff]   ;;  %v3402_v36 = vld [vmem:[%s3879_s7 + $0x3c] ss:$24 sps:$4 sm:$0xff]   ;;  %v3400_v38 = vld [vmem:[%s3879_s7 + $0x38] ss:$24 sps:$4 sm:$0xff]  }
  0x63   : > { %2163 = vmatprep.subr.bf16.mxu1 %v3309_v40  ;;  %v3405_v39 = vld [vmem:[%s3879_s7 + $0x604] ss:$24 sps:$4 sm:$0xff]   ;;  %p3178_p6 = scmp.ne.s32.totalorder %s3772_s15, 9 }
  0x64   : > { %v3408_v40 = vld [vmem:[%s3879_s7 + $0xc] ss:$24 sps:$4 sm:$0xff]  }
  0x65   : > { %2121 = vmatpush2.bf16.msra.mxu0 %v3311_v41  ;;  %v3994_v41 = vld [vmem:[%s3877_s5 + $0x14] ss:$24 sps:$4 sm:$0xff]  }
  0x66   : > { %2164 = vmatpush2.bf16.msra.mxu1 %v3312_v42  ;;  %2122 = vmatprep.subr.bf16.mxu0 %v3313_v43  ;;  %v3403_v42 = vld [vmem:[%s3879_s7 + $0x600] ss:$24 sps:$4 sm:$0xff]  }
  0x67   : > { %2165 = vmatprep.subr.bf16.mxu1 %v3315_v44  ;;  %v3406_v43 = vld [vmem:[%s3879_s7 + $0x8] ss:$24 sps:$4 sm:$0xff]   ;;  %v3411_v44 = vld [vmem:[%s3879_s7 + $0x8d4] ss:$24 sps:$4 sm:$0xff]  }
  0x69   : > { %2123 = vmatpush2.bf16.msra.mxu0 %v3317_v45  ;;  %v3414_v45 = vld [vmem:[%s3879_s7 + $0x2dc] ss:$24 sps:$4 sm:$0xff]  }
  0x6a   : > { %2166 = vmatpush2.bf16.msra.mxu1 %v3318_v46  ;;  %2124 = vmatprep.subr.bf16.mxu0 %v3319_v47  ;;  %v3409_v46 = vld [vmem:[%s3879_s7 + $0x8d0] ss:$24 sps:$4 sm:$0xff]  }
  0x6b   : > { %2167 = vmatprep.subr.bf16.mxu1 %v3321_v48  ;;  %v3412_v47 = vld [vmem:[%s3879_s7 + $0x2d8] ss:$24 sps:$4 sm:$0xff]   ;;  %v3417_v48 = vld [vmem:[%s3879_s7 + $0x8a4] ss:$24 sps:$4 sm:$0xff]  }
  0x6d   : > { %2125 = vmatpush2.bf16.msra.mxu0 %v3323_v49  ;;  %v3420_v49 = vld [vmem:[%s3879_s7 + $0x2ac] ss:$24 sps:$4 sm:$0xff]  }
  0x6e   : > { %2168 = vmatpush2.bf16.msra.mxu1 %v3324_v50  ;;  %2126 = vmatprep.subr.bf16.mxu0 %v3325_v51  ;;  %v3415_v50 = vld [vmem:[%s3879_s7 + $0x8a0] ss:$24 sps:$4 sm:$0xff]  }
  0x6f   : > { %2169 = vmatprep.subr.bf16.mxu1 %v3327_v52  ;;  %v3418_v51 = vld [vmem:[%s3879_s7 + $0x2a8] ss:$24 sps:$4 sm:$0xff]   ;;  %v3423_v52 = vld [vmem:[%s3879_s7 + $0x874] ss:$24 sps:$4 sm:$0xff]  }
  0x71   : > { %2127 = vmatpush2.bf16.msra.mxu0 %v3329_v53  ;;  %v3426_v53 = vld [vmem:[%s3879_s7 + $0x27c] ss:$24 sps:$4 sm:$0xff]  }
  0x72   : > { %2170 = vmatpush2.bf16.msra.mxu1 %v3330_v54  ;;  %2128 = vmatprep.subr.bf16.mxu0 %v3331_v56  ;;  %v3421_v54 = vld [vmem:[%s3879_s7 + $0x870] ss:$24 sps:$4 sm:$0xff]   ;;  %v3429_v56 = vld [vmem:[%s3879_s7 + $0x844] ss:$24 sps:$4 sm:$0xff]  }
  0x73   : > { %2171 = vmatprep.subr.bf16.mxu1 %v3333_v58  ;;  %v3432_v58 = vld [vmem:[%s3879_s7 + $0x24c] ss:$24 sps:$4 sm:$0xff]  }
  0x75   : > { %2129 = vmatpush2.bf16.msra.mxu0 %v3335_v59  ;;  %v3427_v59 = vld [vmem:[%s3879_s7 + $0x840] ss:$24 sps:$4 sm:$0xff]  }
  0x76   : > { %2172 = vmatpush2.bf16.msra.mxu1 %v3336_v60  ;;  %2130 = vmatprep.subr.bf16.mxu0 %v3337_v61  ;;  %v3430_v60 = vld [vmem:[%s3879_s7 + $0x248] ss:$24 sps:$4 sm:$0xff]   ;;  %v3435_v61 = vld [vmem:[%s3879_s7 + $0x814] ss:$24 sps:$4 sm:$0xff]  }
  0x77   : > { %2173 = vmatprep.subr.bf16.mxu1 %v3339_v62  ;;  %v3438_v62 = vld [vmem:[%s3879_s7 + $0x21c] ss:$24 sps:$4 sm:$0xff]  }
  0x79   : > { %2131 = vmatpush2.bf16.msra.mxu0 %v3341_v63  ;;  %v3433_v63 = vld [vmem:[%s3879_s7 + $0x810] ss:$24 sps:$4 sm:$0xff]  }
  0x7a   : > { %2174 = vmatpush2.bf16.msra.mxu1 %v3342_v0  ;;  %2132 = vmatprep.subr.bf16.mxu0 %v3343_v1  ;;  %v3436_v0 = vld [vmem:[%s3879_s7 + $0x218] ss:$24 sps:$4 sm:$0xff]   ;;  %v3441_v1 = vld [vmem:[%s3879_s7 + $0x7e4] ss:$24 sps:$4 sm:$0xff]  }
  0x7b   : > { %2175 = vmatprep.subr.bf16.mxu1 %v3345_v2  ;;  %v3444_v2 = vld [vmem:[%s3879_s7 + $0x1ec] ss:$24 sps:$4 sm:$0xff]  }
  0x7d   : > { %2133 = vmatpush2.bf16.msra.mxu0 %v3347_v3  ;;  %v3439_v3 = vld [vmem:[%s3879_s7 + $0x7e0] ss:$24 sps:$4 sm:$0xff]  }
  0x7e   : > { %2176 = vmatpush2.bf16.msra.mxu1 %v3348_v4  ;;  %2134 = vmatprep.subr.bf16.mxu0 %v3349_v5  ;;  %v3442_v4 = vld [vmem:[%s3879_s7 + $0x1e8] ss:$24 sps:$4 sm:$0xff]   ;;  %v3447_v5 = vld [vmem:[%s3879_s7 + $0x7b4] ss:$24 sps:$4 sm:$0xff]  }
  0x7f   : > { %2177 = vmatprep.subr.bf16.mxu1 %v3351_v6  ;;  %v3450_v6 = vld [vmem:[%s3879_s7 + $0x1bc] ss:$24 sps:$4 sm:$0xff]  }
  0x81   : > { %2135 = vmatpush2.bf16.msra.mxu0 %v3353_v7  ;;  %v3445_v7 = vld [vmem:[%s3879_s7 + $0x7b0] ss:$24 sps:$4 sm:$0xff]  }
  0x82   : > { %2178 = vmatpush2.bf16.msra.mxu1 %v3354_v8  ;;  %2190 = vmatprep.subr.bf16.mxu0 %v3363_v9  ;;  %v3448_v8 = vld [vmem:[%s3879_s7 + $0x1b8] ss:$24 sps:$4 sm:$0xff]   ;;  %v3453_v9 = vld [vmem:[%s3879_s7 + $0x784] ss:$24 sps:$4 sm:$0xff]  }
  0x83   : > { %2233 = vmatprep.subr.bf16.mxu1 %v3366_v10  ;;  %v3456_v10 = vld [vmem:[%s3879_s7 + $0x18c] ss:$24 sps:$4 sm:$0xff]  }
  0x84   : > { %2137 = vmatmul.mubr.bf16.vlgmr.msra.gmra.mxu0 %v3958_v11 }
  0x85   : > { %2180 = vmatmul.mubr.bf16.vlgmr.msra.gmra.mxu1 %v3961_v12  ;;  %2191 = vmatpush1.bf16.msra.mxu0 %v3361_v13  ;;  %v3451_v13 = vld [vmem:[%s3879_s7 + $0x780] ss:$24 sps:$4 sm:$0xff]  }
  0x86   : > { %2234 = vmatpush1.bf16.msra.mxu1 %v3364_v14  ;;  %2192 = vmatprep.subr.bf16.mxu0 %v3369_v15  ;;  %v3454_v14 = vld [vmem:[%s3879_s7 + $0x188] ss:$24 sps:$4 sm:$0xff]   ;;  %v3462_v15 = vld [vmem:[%s3879_s7 + $0x45c] ss:$24 sps:$4 sm:$0xff]  }
  0x87   : > { %2235 = vmatprep.subr.bf16.mxu1 %v3372_v16  ;;  %2265 = vmatprep.mubr.bf16.mxu1 %v3355_v55  ;;  %v3424_v55 = vld [vmem:[%s3879_s7 + $0x278] ss:$24 sps:$4 sm:$0xff]   ;;  %v3465_v16 = vld [vmem:[%s3879_s7 + $0x75c] ss:$24 sps:$4 sm:$0xff]  }
  0x88   : > { %2222 = vmatprep.mubr.bf16.mxu0 %v3994_v41 }
  0x89   : > { %2193 = vmatpush1.bf16.msra.mxu0 %v3367_v17  ;;  %v4034_v17 = vld [vmem:[%s3877_s5 + $0x10] ss:$24 sps:$4 sm:$0xff]  }
  0x8a   : > { %2236 = vmatpush1.bf16.msra.mxu1 %v3370_v18  ;;  %2194 = vmatprep.subr.bf16.mxu0 %v3375_v19  ;;  %v3460_v18 = vld [vmem:[%s3879_s7 + $0x458] ss:$24 sps:$4 sm:$0xff]  }
  0x8b   : > { %2237 = vmatprep.subr.bf16.mxu1 %v3378_v20  ;;  %v3463_v19 = vld [vmem:[%s3879_s7 + $0x758] ss:$24 sps:$4 sm:$0xff]   ;;  %v3468_v20 = vld [vmem:[%s3879_s7 + $0x42c] ss:$24 sps:$4 sm:$0xff]  }
  0x8d   : > { %2195 = vmatpush1.bf16.msra.mxu0 %v3373_v21  ;;  %v3471_v21 = vld [vmem:[%s3879_s7 + $0x72c] ss:$24 sps:$4 sm:$0xff]  }
  0x8e   : > { %2238 = vmatpush1.bf16.msra.mxu1 %v3376_v22  ;;  %2196 = vmatprep.subr.bf16.mxu0 %v3381_v23  ;;  %v3466_v22 = vld [vmem:[%s3879_s7 + $0x428] ss:$24 sps:$4 sm:$0xff]  }
  0x8f   : > { %2239 = vmatprep.subr.bf16.mxu1 %v3384_v24  ;;  %v3469_v23 = vld [vmem:[%s3879_s7 + $0x728] ss:$24 sps:$4 sm:$0xff]   ;;  %v3474_v24 = vld [vmem:[%s3879_s7 + $0x3fc] ss:$24 sps:$4 sm:$0xff]  }
  0x91   : > { %2197 = vmatpush1.bf16.msra.mxu0 %v3379_v25  ;;  %v3477_v25 = vld [vmem:[%s3879_s7 + $0x6fc] ss:$24 sps:$4 sm:$0xff]  }
  0x92   : > { %2240 = vmatpush1.bf16.msra.mxu1 %v3382_v26  ;;  %2198 = vmatprep.subr.bf16.mxu0 %v3387_v27  ;;  %v3472_v26 = vld [vmem:[%s3879_s7 + $0x3f8] ss:$24 sps:$4 sm:$0xff]   ;;  %v3480_v27 = vld [vmem:[%s3879_s7 + $0x3cc] ss:$24 sps:$4 sm:$0xff]  }
  0x93   : > { %2241 = vmatprep.subr.bf16.mxu1 %v3390_v28  ;;  %v3483_v28 = vld [vmem:[%s3879_s7 + $0x6cc] ss:$24 sps:$4 sm:$0xff]  }
  0x95   : > { %2199 = vmatpush1.bf16.msra.mxu0 %v3385_v29  ;;  %v3478_v29 = vld [vmem:[%s3879_s7 + $0x3c8] ss:$24 sps:$4 sm:$0xff]  }
  0x96   : > { %2242 = vmatpush1.bf16.msra.mxu1 %v3388_v30  ;;  %2200 = vmatprep.subr.bf16.mxu0 %v3393_v31  ;;  %v3481_v30 = vld [vmem:[%s3879_s7 + $0x6c8] ss:$24 sps:$4 sm:$0xff]   ;;  %v3489_v31 = vld [vmem:[%s3879_s7 + $0x69c] ss:$24 sps:$4 sm:$0xff]  }
  0x97   : > { %2243 = vmatprep.subr.bf16.mxu1 %v3396_v32  ;;  %v3484_v32 = vld [vmem:[%s3879_s7 + $0x398] ss:$24 sps:$4 sm:$0xff]  }
  0x99   : > { %2201 = vmatpush1.bf16.msra.mxu0 %v3391_v33  ;;  %v3487_v33 = vld [vmem:[%s3879_s7 + $0x698] ss:$24 sps:$4 sm:$0xff]  }
  0x9a   : > { %2244 = vmatpush1.bf16.msra.mxu1 %v3394_v34  ;;  %2202 = vmatprep.subr.bf16.mxu0 %v3399_v35  ;;  %v3492_v34 = vld [vmem:[%s3879_s7 + $0x36c] ss:$24 sps:$4 sm:$0xff]  }
  0x9b   : > { %2245 = vmatprep.subr.bf16.mxu1 %v3402_v36  ;;  %v3495_v35 = vld [vmem:[%s3879_s7 + $0x66c] ss:$24 sps:$4 sm:$0xff]   ;;  %v3490_v36 = vld [vmem:[%s3879_s7 + $0x368] ss:$24 sps:$4 sm:$0xff]  }
  0x9d   : > { %2203 = vmatpush1.bf16.msra.mxu0 %v3397_v37  ;;  %v3493_v37 = vld [vmem:[%s3879_s7 + $0x668] ss:$24 sps:$4 sm:$0xff]  }
  0x9e   : > { %2246 = vmatpush1.bf16.msra.mxu1 %v3400_v38  ;;  %2204 = vmatprep.subr.bf16.mxu0 %v3405_v39  ;;  %v3498_v38 = vld [vmem:[%s3879_s7 + $0x33c] ss:$24 sps:$4 sm:$0xff]  }
  0x9f   : > { %2247 = vmatprep.subr.bf16.mxu1 %v3408_v40  ;;  %v3501_v39 = vld [vmem:[%s3879_s7 + $0x63c] ss:$24 sps:$4 sm:$0xff]   ;;  %v3496_v40 = vld [vmem:[%s3879_s7 + $0x338] ss:$24 sps:$4 sm:$0xff]  }
  0xa1   : > { %2205 = vmatpush1.bf16.msra.mxu0 %v3403_v42  ;;  %v3499_v42 = vld [vmem:[%s3879_s7 + $0x638] ss:$24 sps:$4 sm:$0xff]  }
  0xa2   : > { %2248 = vmatpush1.bf16.msra.mxu1 %v3406_v43  ;;  %2206 = vmatprep.subr.bf16.mxu0 %v3411_v44  ;;  %v3504_v43 = vld [vmem:[%s3879_s7 + $0x30c] ss:$24 sps:$4 sm:$0xff]  }
  0xa3   : > { %2249 = vmatprep.subr.bf16.mxu1 %v3414_v45  ;;  %v3507_v44 = vld [vmem:[%s3879_s7 + $0x60c] ss:$24 sps:$4 sm:$0xff]   ;;  %v3502_v45 = vld [vmem:[%s3879_s7 + $0x308] ss:$24 sps:$4 sm:$0xff]  }
  0xa5   : > { %2207 = vmatpush2.bf16.msra.mxu0 %v3409_v46  ;;  %v3505_v46 = vld [vmem:[%s3879_s7 + $0x608] ss:$24 sps:$4 sm:$0xff]  }
  0xa6   : > { %2250 = vmatpush2.bf16.msra.mxu1 %v3412_v47  ;;  %2208 = vmatprep.subr.bf16.mxu0 %v3417_v48  ;;  %v3510_v47 = vld [vmem:[%s3879_s7 + $0x5dc] ss:$24 sps:$4 sm:$0xff]  }
  0xa7   : > { %2251 = vmatprep.subr.bf16.mxu1 %v3420_v49  ;;  %v3513_v48 = vld [vmem:[%s3879_s7 + $0x8dc] ss:$24 sps:$4 sm:$0xff]   ;;  %v3508_v49 = vld [vmem:[%s3879_s7 + $0x5d8] ss:$24 sps:$4 sm:$0xff]  }
  0xa9   : > { %2209 = vmatpush2.bf16.msra.mxu0 %v3415_v50  ;;  %v3511_v50 = vld [vmem:[%s3879_s7 + $0x8d8] ss:$24 sps:$4 sm:$0xff]  }
  0xaa   : > { %2252 = vmatpush2.bf16.msra.mxu1 %v3418_v51  ;;  %2210 = vmatprep.subr.bf16.mxu0 %v3423_v52  ;;  %v3516_v51 = vld [vmem:[%s3879_s7 + $0x5ac] ss:$24 sps:$4 sm:$0xff]  }
  0xab   : > { %2253 = vmatprep.subr.bf16.mxu1 %v3426_v53  ;;  %v3519_v52 = vld [vmem:[%s3879_s7 + $0x8ac] ss:$24 sps:$4 sm:$0xff]   ;;  %v3514_v53 = vld [vmem:[%s3879_s7 + $0x5a8] ss:$24 sps:$4 sm:$0xff]  }
  0xad   : > { %2211 = vmatpush2.bf16.msra.mxu0 %v3421_v54  ;;  %v3517_v54 = vld [vmem:[%s3879_s7 + $0x8a8] ss:$24 sps:$4 sm:$0xff]  }
  0xae   : > { %2254 = vmatpush2.bf16.msra.mxu1 %v3424_v55  ;;  %2212 = vmatprep.subr.bf16.mxu0 %v3429_v56  ;;  %v3522_v55 = vld [vmem:[%s3879_s7 + $0x57c] ss:$24 sps:$4 sm:$0xff]  }
  0xaf   : > { %2255 = vmatprep.subr.bf16.mxu1 %v3432_v58  ;;  %v3525_v56 = vld [vmem:[%s3879_s7 + $0x87c] ss:$24 sps:$4 sm:$0xff]   ;;  %v3520_v58 = vld [vmem:[%s3879_s7 + $0x578] ss:$24 sps:$4 sm:$0xff]  }
  0xb1   : > { %2213 = vmatpush2.bf16.msra.mxu0 %v3427_v59  ;;  %v3523_v59 = vld [vmem:[%s3879_s7 + $0x878] ss:$24 sps:$4 sm:$0xff]  }
  0xb2   : > { %2256 = vmatpush2.bf16.msra.mxu1 %v3430_v60  ;;  %2214 = vmatprep.subr.bf16.mxu0 %v3435_v61  ;;  %v3528_v60 = vld [vmem:[%s3879_s7 + $0x54c] ss:$24 sps:$4 sm:$0xff]  }
  0xb3   : > { %2257 = vmatprep.subr.bf16.mxu1 %v3438_v62  ;;  %v3531_v61 = vld [vmem:[%s3879_s7 + $0x84c] ss:$24 sps:$4 sm:$0xff]   ;;  %v3526_v62 = vld [vmem:[%s3879_s7 + $0x548] ss:$24 sps:$4 sm:$0xff]  }
  0xb5   : > { %2215 = vmatpush2.bf16.msra.mxu0 %v3433_v63  ;;  %v3529_v63 = vld [vmem:[%s3879_s7 + $0x848] ss:$24 sps:$4 sm:$0xff]  }
  0xb6   : > { %2258 = vmatpush2.bf16.msra.mxu1 %v3436_v0  ;;  %2216 = vmatprep.subr.bf16.mxu0 %v3441_v1  ;;  %v3534_v0 = vld [vmem:[%s3879_s7 + $0x51c] ss:$24 sps:$4 sm:$0xff]  }
  0xb7   : > { %2259 = vmatprep.subr.bf16.mxu1 %v3444_v2  ;;  %v3537_v1 = vld [vmem:[%s3879_s7 + $0x81c] ss:$24 sps:$4 sm:$0xff]   ;;  %v3532_v2 = vld [vmem:[%s3879_s7 + $0x518] ss:$24 sps:$4 sm:$0xff]  }
  0xb9   : > { %2217 = vmatpush2.bf16.msra.mxu0 %v3439_v3  ;;  %v3535_v3 = vld [vmem:[%s3879_s7 + $0x818] ss:$24 sps:$4 sm:$0xff]  }
  0xba   : > { %2260 = vmatpush2.bf16.msra.mxu1 %v3442_v4  ;;  %2218 = vmatprep.subr.bf16.mxu0 %v3447_v5  ;;  %v3540_v4 = vld [vmem:[%s3879_s7 + $0x4ec] ss:$24 sps:$4 sm:$0xff]  }
  0xbb   : > { %2261 = vmatprep.subr.bf16.mxu1 %v3450_v6  ;;  %v3543_v5 = vld [vmem:[%s3879_s7 + $0x7ec] ss:$24 sps:$4 sm:$0xff]   ;;  %v3538_v6 = vld [vmem:[%s3879_s7 + $0x4e8] ss:$24 sps:$4 sm:$0xff]  }
  0xbd   : > { %2219 = vmatpush2.bf16.msra.mxu0 %v3445_v7  ;;  %v3541_v7 = vld [vmem:[%s3879_s7 + $0x7e8] ss:$24 sps:$4 sm:$0xff]  }
  0xbe   : > { %2262 = vmatpush2.bf16.msra.mxu1 %v3448_v8  ;;  %2220 = vmatprep.subr.bf16.mxu0 %v3453_v9  ;;  %v3546_v8 = vld [vmem:[%s3879_s7 + $0x4bc] ss:$24 sps:$4 sm:$0xff]  }
  0xbf   : > { %2263 = vmatprep.subr.bf16.mxu1 %v3456_v10  ;;  %v3549_v9 = vld [vmem:[%s3879_s7 + $0x7bc] ss:$24 sps:$4 sm:$0xff]   ;;  %v3544_v10 = vld [vmem:[%s3879_s7 + $0x4b8] ss:$24 sps:$4 sm:$0xff]  }
  0xc1   : > { %2221 = vmatpush2.bf16.msra.mxu0 %v3451_v13  ;;  %v3547_v13 = vld [vmem:[%s3879_s7 + $0x7b8] ss:$24 sps:$4 sm:$0xff]  }
  0xc2   : > { %2264 = vmatpush2.bf16.msra.mxu1 %v3454_v14  ;;  %2276 = vmatprep.subr.bf16.mxu0 %v3462_v15  ;;  %v3552_v14 = vld [vmem:[%s3879_s7 + $0x48c] ss:$24 sps:$4 sm:$0xff]  }
  0xc3   : > { %2319 = vmatprep.subr.bf16.mxu1 %v3465_v16  ;;  %v3555_v15 = vld [vmem:[%s3879_s7 + $0x78c] ss:$24 sps:$4 sm:$0xff]   ;;  %v3550_v16 = vld [vmem:[%s3879_s7 + $0x488] ss:$24 sps:$4 sm:$0xff]  }
  0xc4   : > { %2223 = vmatmul.mubr.bf16.vlgmr.msra.gmra.mxu0 %v4034_v17 }
  0xc5   : > { %2266 = vmatmul.mubr.bf16.vlgmr.msra.gmra.mxu1 %v3958_v11  ;;  %2277 = vmatpush1.bf16.msra.mxu0 %v3460_v18  ;;  %v3475_v11 = vld [vmem:[%s3879_s7 + $0x6f8] ss:$24 sps:$4 sm:$0xff]   ;;  %v3553_v18 = vld [vmem:[%s3879_s7 + $0x788] ss:$24 sps:$4 sm:$0xff]  }
  0xc6   : > { %2320 = vmatpush1.bf16.msra.mxu1 %v3463_v19  ;;  %2278 = vmatprep.subr.bf16.mxu0 %v3468_v20  ;;  %v3558_v19 = vld [vmem:[%s3879_s7 + $0x164] ss:$24 sps:$4 sm:$0xff]  }
  0xc7   : > { %2321 = vmatprep.subr.bf16.mxu1 %v3471_v21  ;;  %2308 = vmatprep.mubr.bf16.mxu0 %v3937_v57  ;;  %v3486_v57 = vld [vmem:[%s3879_s7 + $0x39c] ss:$24 sps:$4 sm:$0xff]   ;;  %v3556_v21 = vld [vmem:[%s3879_s7 + $0x160] ss:$24 sps:$4 sm:$0xff]  }
  0xc8   : > { %2351 = vmatprep.mubr.bf16.mxu1 %v3994_v41  ;;  %v3561_v20 = vld [vmem:[%s3879_s7 + $0x464] ss:$24 sps:$4 sm:$0xff]  }
  0xc9   : > { %2279 = vmatpush1.bf16.msra.mxu0 %v3466_v22  ;;  %v3559_v22 = vld [vmem:[%s3879_s7 + $0x460] ss:$24 sps:$4 sm:$0xff]  }
  0xca   : > { %2322 = vmatpush1.bf16.msra.mxu1 %v3469_v23  ;;  %2280 = vmatprep.subr.bf16.mxu0 %v3474_v24  ;;  %v3564_v23 = vld [vmem:[%s3879_s7 + $0x134] ss:$24 sps:$4 sm:$0xff]  }
  0xcb   : > { %2323 = vmatprep.subr.bf16.mxu1 %v3477_v25  ;;  %v3567_v24 = vld [vmem:[%s3879_s7 + $0x434] ss:$24 sps:$4 sm:$0xff]   ;;  %v3562_v25 = vld [vmem:[%s3879_s7 + $0x130] ss:$24 sps:$4 sm:$0xff]  }
  0xcd   : > { %2281 = vmatpush1.bf16.msra.mxu0 %v3472_v26  ;;  %v3565_v26 = vld [vmem:[%s3879_s7 + $0x430] ss:$24 sps:$4 sm:$0xff]  }
  0xce   : > { %2324 = vmatpush1.bf16.msra.mxu1 %v3475_v11  ;;  %2282 = vmatprep.subr.bf16.mxu0 %v3480_v27  ;;  %v3570_v11 = vld [vmem:[%s3879_s7 + $0x104] ss:$24 sps:$4 sm:$0xff]  }
  0xcf   : > { %2325 = vmatprep.subr.bf16.mxu1 %v3483_v28  ;;  %v3573_v27 = vld [vmem:[%s3879_s7 + $0x404] ss:$24 sps:$4 sm:$0xff]  }
  0xd0   : > { %v3700_v28 = vld [vmem:[%s3877_s5 + $0x4] ss:$24 sps:$4 sm:$0xff]  }
  0xd1   : > { %2283 = vmatpush1.bf16.msra.mxu0 %v3478_v29  ;;  %v3701_v29 = vld [vmem:[%s3877_s5 + $0xc] ss:$24 sps:$4 sm:$0xff]  }
  0xd2   : > { %2326 = vmatpush1.bf16.msra.mxu1 %v3481_v30  ;;  %2284 = vmatprep.subr.bf16.mxu0 %v3486_v57  ;;  %v3571_v30 = vld [vmem:[%s3879_s7 + $0x400] ss:$24 sps:$4 sm:$0xff]   ;;  %v3576_v57 = vld [vmem:[%s3879_s7 + $0xd4] ss:$24 sps:$4 sm:$0xff]  }
  0xd3   : > { %2327 = vmatprep.subr.bf16.mxu1 %v3489_v31  ;;  %v3579_v31 = vld [vmem:[%s3879_s7 + $0x3d4] ss:$24 sps:$4 sm:$0xff]  }
  0xd5   : > { %2285 = vmatpush1.bf16.msra.mxu0 %v3484_v32  ;;  %v3574_v32 = vld [vmem:[%s3879_s7 + $0xd0] ss:$24 sps:$4 sm:$0xff]  }
  0xd6   : > { %2328 = vmatpush1.bf16.msra.mxu1 %v3487_v33  ;;  %2286 = vmatprep.subr.bf16.mxu0 %v3492_v34  ;;  %v3577_v33 = vld [vmem:[%s3879_s7 + $0x3d0] ss:$24 sps:$4 sm:$0xff]   ;;  %v3582_v34 = vld [vmem:[%s3879_s7 + $0xa4] ss:$24 sps:$4 sm:$0xff]  }
  0xd7   : > { %2329 = vmatprep.subr.bf16.mxu1 %v3495_v35  ;;  %v3585_v35 = vld [vmem:[%s3879_s7 + $0x3a4] ss:$24 sps:$4 sm:$0xff]  }
  0xd9   : > { %2287 = vmatpush1.bf16.msra.mxu0 %v3490_v36  ;;  %v3580_v36 = vld [vmem:[%s3879_s7 + $0xa0] ss:$24 sps:$4 sm:$0xff]  }
  0xda   : > { %2330 = vmatpush1.bf16.msra.mxu1 %v3493_v37  ;;  %2288 = vmatprep.subr.bf16.mxu0 %v3498_v38  ;;  %v3583_v37 = vld [vmem:[%s3879_s7 + $0x3a0] ss:$24 sps:$4 sm:$0xff]   ;;  %v3588_v38 = vld [vmem:[%s3879_s7 + $0x74] ss:$24 sps:$4 sm:$0xff]  }
  0xdb   : > { %2331 = vmatprep.subr.bf16.mxu1 %v3501_v39  ;;  %v3591_v39 = vld [vmem:[%s3879_s7 + $0x374] ss:$24 sps:$4 sm:$0xff]  }
  0xdd   : > { %2289 = vmatpush1.bf16.msra.mxu0 %v3496_v40  ;;  %v3586_v40 = vld [vmem:[%s3879_s7 + $0x70] ss:$24 sps:$4 sm:$0xff]  }
  0xde   : > { %2332 = vmatpush1.bf16.msra.mxu1 %v3499_v42  ;;  %2290 = vmatprep.subr.bf16.mxu0 %v3504_v43  ;;  %v3589_v42 = vld [vmem:[%s3879_s7 + $0x370] ss:$24 sps:$4 sm:$0xff]   ;;  %v3594_v43 = vld [vmem:[%s3879_s7 + $0x44] ss:$24 sps:$4 sm:$0xff]  }
  0xdf   : > { %2333 = vmatprep.subr.bf16.mxu1 %v3507_v44  ;;  %v3597_v44 = vld [vmem:[%s3879_s7 + $0x344] ss:$24 sps:$4 sm:$0xff]  }
  0xe1   : > { %2291 = vmatpush1.bf16.msra.mxu0 %v3502_v45  ;;  %v3592_v45 = vld [vmem:[%s3879_s7 + $0x40] ss:$24 sps:$4 sm:$0xff]  }
  0xe2   : > { %2334 = vmatpush1.bf16.msra.mxu1 %v3505_v46  ;;  %2292 = vmatprep.subr.bf16.mxu0 %v3510_v47  ;;  %v3595_v46 = vld [vmem:[%s3879_s7 + $0x340] ss:$24 sps:$4 sm:$0xff]   ;;  %v3600_v47 = vld [vmem:[%s3879_s7 + $0x14] ss:$24 sps:$4 sm:$0xff]  }
  0xe3   : > { %2335 = vmatprep.subr.bf16.mxu1 %v3513_v48  ;;  %v3603_v48 = vld [vmem:[%s3879_s7 + $0x314] ss:$24 sps:$4 sm:$0xff]  }
  0xe5   : > { %2293 = vmatpush2.bf16.msra.mxu0 %v3508_v49  ;;  %v3598_v49 = vld [vmem:[%s3879_s7 + $0x10] ss:$24 sps:$4 sm:$0xff]  }
  0xe6   : > { %2336 = vmatpush2.bf16.msra.mxu1 %v3511_v50  ;;  %2294 = vmatprep.subr.bf16.mxu0 %v3516_v51  ;;  %v3601_v50 = vld [vmem:[%s3879_s7 + $0x310] ss:$24 sps:$4 sm:$0xff]   ;;  %v3606_v51 = vld [vmem:[%s3879_s7 + $0x2e4] ss:$24 sps:$4 sm:$0xff]  }
  0xe7   : > { %2337 = vmatprep.subr.bf16.mxu1 %v3519_v52  ;;  %v3609_v52 = vld [vmem:[%s3879_s7 + $0x5e4] ss:$24 sps:$4 sm:$0xff]  }
  0xe9   : > { %2295 = vmatpush2.bf16.msra.mxu0 %v3514_v53  ;;  %v3604_v53 = vld [vmem:[%s3879_s7 + $0x2e0] ss:$24 sps:$4 sm:$0xff]  }
  0xea   : > { %2338 = vmatpush2.bf16.msra.mxu1 %v3517_v54  ;;  %2296 = vmatprep.subr.bf16.mxu0 %v3522_v55  ;;  %v3607_v54 = vld [vmem:[%s3879_s7 + $0x5e0] ss:$24 sps:$4 sm:$0xff]   ;;  %v3612_v55 = vld [vmem:[%s3879_s7 + $0x2b4] ss:$24 sps:$4 sm:$0xff]  }
  0xeb   : > { %2339 = vmatprep.subr.bf16.mxu1 %v3525_v56  ;;  %v3615_v56 = vld [vmem:[%s3879_s7 + $0x5b4] ss:$24 sps:$4 sm:$0xff]  }
  0xed   : > { %2297 = vmatpush2.bf16.msra.mxu0 %v3520_v58  ;;  %v3610_v58 = vld [vmem:[%s3879_s7 + $0x2b0] ss:$24 sps:$4 sm:$0xff]  }
  0xee   : > { %2340 = vmatpush2.bf16.msra.mxu1 %v3523_v59  ;;  %2298 = vmatprep.subr.bf16.mxu0 %v3528_v60  ;;  %v3613_v59 = vld [vmem:[%s3879_s7 + $0x5b0] ss:$24 sps:$4 sm:$0xff]   ;;  %v3618_v60 = vld [vmem:[%s3879_s7 + $0x284] ss:$24 sps:$4 sm:$0xff]  }
  0xef   : > { %2341 = vmatprep.subr.bf16.mxu1 %v3531_v61  ;;  %v3621_v61 = vld [vmem:[%s3879_s7 + $0x584] ss:$24 sps:$4 sm:$0xff]  }
  0xf1   : > { %2299 = vmatpush2.bf16.msra.mxu0 %v3526_v62  ;;  %v3616_v62 = vld [vmem:[%s3879_s7 + $0x280] ss:$24 sps:$4 sm:$0xff]  }
  0xf2   : > { %2342 = vmatpush2.bf16.msra.mxu1 %v3529_v63  ;;  %2300 = vmatprep.subr.bf16.mxu0 %v3534_v0  ;;  %v3619_v63 = vld [vmem:[%s3879_s7 + $0x580] ss:$24 sps:$4 sm:$0xff]   ;;  %v3624_v0 = vld [vmem:[%s3879_s7 + $0x254] ss:$24 sps:$4 sm:$0xff]  }
  0xf3   : > { %2343 = vmatprep.subr.bf16.mxu1 %v3537_v1  ;;  %v3627_v1 = vld [vmem:[%s3879_s7 + $0x554] ss:$24 sps:$4 sm:$0xff]  }
  0xf5   : > { %2301 = vmatpush2.bf16.msra.mxu0 %v3532_v2  ;;  %v3622_v2 = vld [vmem:[%s3879_s7 + $0x250] ss:$24 sps:$4 sm:$0xff]  }
  0xf6   : > { %2344 = vmatpush2.bf16.msra.mxu1 %v3535_v3  ;;  %2302 = vmatprep.subr.bf16.mxu0 %v3540_v4  ;;  %v3625_v3 = vld [vmem:[%s3879_s7 + $0x550] ss:$24 sps:$4 sm:$0xff]   ;;  %v3630_v4 = vld [vmem:[%s3879_s7 + $0x224] ss:$24 sps:$4 sm:$0xff]  }
  0xf7   : > { %2345 = vmatprep.subr.bf16.mxu1 %v3543_v5  ;;  %v3633_v5 = vld [vmem:[%s3879_s7 + $0x524] ss:$24 sps:$4 sm:$0xff]  }
  0xf9   : > { %2303 = vmatpush2.bf16.msra.mxu0 %v3538_v6  ;;  %v3628_v6 = vld [vmem:[%s3879_s7 + $0x220] ss:$24 sps:$4 sm:$0xff]  }
  0xfa   : > { %2346 = vmatpush2.bf16.msra.mxu1 %v3541_v7  ;;  %2304 = vmatprep.subr.bf16.mxu0 %v3546_v8  ;;  %v3631_v7 = vld [vmem:[%s3879_s7 + $0x520] ss:$24 sps:$4 sm:$0xff]   ;;  %v3636_v8 = vld [vmem:[%s3879_s7 + $0x1f4] ss:$24 sps:$4 sm:$0xff]  }
  0xfb   : > { %2347 = vmatprep.subr.bf16.mxu1 %v3549_v9  ;;  %v3639_v9 = vld [vmem:[%s3879_s7 + $0x4f4] ss:$24 sps:$4 sm:$0xff]  }
  0xfd   : > { %2305 = vmatpush2.bf16.msra.mxu0 %v3544_v10  ;;  %v3634_v10 = vld [vmem:[%s3879_s7 + $0x1f0] ss:$24 sps:$4 sm:$0xff]  }
  0xfe   : > { %2348 = vmatpush2.bf16.msra.mxu1 %v3547_v13  ;;  %2306 = vmatprep.subr.bf16.mxu0 %v3552_v14  ;;  %v3637_v13 = vld [vmem:[%s3879_s7 + $0x4f0] ss:$24 sps:$4 sm:$0xff]   ;;  %v3642_v14 = vld [vmem:[%s3879_s7 + $0x1c4] ss:$24 sps:$4 sm:$0xff]  }
  0xff   : > { %2349 = vmatprep.subr.bf16.mxu1 %v3555_v15  ;;  %v3645_v15 = vld [vmem:[%s3879_s7 + $0x4c4] ss:$24 sps:$4 sm:$0xff]  }
 0x101   : > { %2307 = vmatpush2.bf16.msra.mxu0 %v3550_v16  ;;  %v3640_v16 = vld [vmem:[%s3879_s7 + $0x1c0] ss:$24 sps:$4 sm:$0xff]  }
 0x102   : > { %2350 = vmatpush2.bf16.msra.mxu1 %v3553_v18  ;;  %2362 = vmatprep.subr.bf16.mxu0 %v3558_v19  ;;  %v3643_v18 = vld [vmem:[%s3879_s7 + $0x4c0] ss:$24 sps:$4 sm:$0xff]   ;;  %v3648_v19 = vld [vmem:[%s3879_s7 + $0x194] ss:$24 sps:$4 sm:$0xff]  }
 0x103   : > { %2405 = vmatprep.subr.bf16.mxu1 %v3561_v20  ;;  %v3651_v20 = vld [vmem:[%s3879_s7 + $0x494] ss:$24 sps:$4 sm:$0xff]  }
 0x104   : > { %2309 = vmatmul.mubr.bf16.vlgmr.msra.gmra.mxu0 %v3961_v12  ;;  %v3568_v12 = vld [vmem:[%s3879_s7 + $0x100] ss:$24 sps:$4 sm:$0xff]  }
 0x105   : > { %2352 = vmatmul.mubr.bf16.vlgmr.msra.gmra.mxu1 %v4034_v17  ;;  %2363 = vmatpush1.bf16.msra.mxu0 %v3556_v21  ;;  %v3646_v21 = vld [vmem:[%s3879_s7 + $0x190] ss:$24 sps:$4 sm:$0xff]  }
 0x106   : > { %2406 = vmatpush1.bf16.msra.mxu1 %v3559_v22  ;;  %2364 = vmatprep.subr.bf16.mxu0 %v3564_v23  ;;  %v3649_v22 = vld [vmem:[%s3879_s7 + $0x490] ss:$24 sps:$4 sm:$0xff]   ;;  %v3654_v23 = vld [vmem:[%s3879_s7 + $0x764] ss:$24 sps:$4 sm:$0xff]  }
 0x107   : > { %2407 = vmatprep.subr.bf16.mxu1 %v3567_v24  ;;  %2394 = vmatprep.mubr.bf16.mxu0 %v3700_v28  ;;  %v3652_v24 = vld [vmem:[%s3879_s7 + $0x760] ss:$24 sps:$4 sm:$0xff]   ;;  %v3660_v28 = vld [vmem:[%s3879_s7 + $0x704] ss:$24 sps:$4 sm:$0xff]  }
 0x108   : > { %2437 = vmatprep.mubr.bf16.mxu1 %v3701_v29  ;;  %v3658_v29 = vld [vmem:[%s3879_s7 + $0x700] ss:$24 sps:$4 sm:$0xff]  }
 0x109   : > { %2365 = vmatpush1.bf16.msra.mxu0 %v3562_v25  ;;  %v3657_v25 = vld [vmem:[%s3879_s7 + $0x734] ss:$24 sps:$4 sm:$0xff]  }
 0x10a   : > { %2408 = vmatpush1.bf16.msra.mxu1 %v3565_v26  ;;  %2366 = vmatprep.subr.bf16.mxu0 %v3570_v11  ;;  %v3702_v26 = vld [vmem:[%s3877_s5] ss:$24 sps:$4 sm:$0xff]  }
 0x10b   : > { %2409 = vmatprep.subr.bf16.mxu1 %v3573_v27  ;;  %v3703_v11 = vld [vmem:[%s3877_s5 + $0x8] ss:$24 sps:$4 sm:$0xff]  }
 0x10c   : > { %v3655_v27 = vld [vmem:[%s3879_s7 + $0x730] ss:$24 sps:$4 sm:$0xff]  }
 0x10d   : > { %2367 = vmatpush1.bf16.msra.mxu0 %v3568_v12  ;;  %v3663_v12 = vld [vmem:[%s3879_s7 + $0x6d4] ss:$24 sps:$4 sm:$0xff]  }
 0x10e   : > { %2410 = vmatpush1.bf16.msra.mxu1 %v3571_v30  ;;  %2368 = vmatprep.subr.bf16.mxu0 %v3576_v57  ;;  %v3661_v30 = vld [vmem:[%s3879_s7 + $0x6d0] ss:$24 sps:$4 sm:$0xff]   ;;  %v3666_v57 = vld [vmem:[%s3879_s7 + $0x6a4] ss:$24 sps:$4 sm:$0xff]  }
 0x10f   : > { %2411 = vmatprep.subr.bf16.mxu1 %v3579_v31  ;;  %v3664_v31 = vld [vmem:[%s3879_s7 + $0x6a0] ss:$24 sps:$4 sm:$0xff]  }
 0x111   : > { %2369 = vmatpush1.bf16.msra.mxu0 %v3574_v32  ;;  %v3667_v32 = vld [vmem:[%s3879_s7 + $0x670] ss:$24 sps:$4 sm:$0xff]  }
 0x112   : > { %2412 = vmatpush1.bf16.msra.mxu1 %v3577_v33  ;;  %2370 = vmatprep.subr.bf16.mxu0 %v3582_v34  ;;  %v3672_v33 = vld [vmem:[%s3879_s7 + $0x644] ss:$24 sps:$4 sm:$0xff]   ;;  %v3670_v34 = vld [vmem:[%s3879_s7 + $0x640] ss:$24 sps:$4 sm:$0xff]  }
 0x113   : > { %2413 = vmatprep.subr.bf16.mxu1 %v3585_v35  ;;  %v3675_v35 = vld [vmem:[%s3879_s7 + $0x614] ss:$24 sps:$4 sm:$0xff]  }
 0x115   : > { %2371 = vmatpush1.bf16.msra.mxu0 %v3580_v36  ;;  %v3673_v36 = vld [vmem:[%s3879_s7 + $0x610] ss:$24 sps:$4 sm:$0xff]  }
 0x116   : > { %2414 = vmatpush1.bf16.msra.mxu1 %v3583_v37  ;;  %2372 = vmatprep.subr.bf16.mxu0 %v3588_v38  ;;  %v3678_v37 = vld [vmem:[%s3879_s7 + $0x8e4] ss:$24 sps:$4 sm:$0xff]   ;;  %v3676_v38 = vld [vmem:[%s3879_s7 + $0x8e0] ss:$24 sps:$4 sm:$0xff]  }
 0x117   : > { %2415 = vmatprep.subr.bf16.mxu1 %v3591_v39  ;;  %v3681_v39 = vld [vmem:[%s3879_s7 + $0x8b4] ss:$24 sps:$4 sm:$0xff]  }
 0x119   : > { %2373 = vmatpush1.bf16.msra.mxu0 %v3586_v40  ;;  %v3679_v40 = vld [vmem:[%s3879_s7 + $0x8b0] ss:$24 sps:$4 sm:$0xff]  }
 0x11a   : > { %2416 = vmatpush1.bf16.msra.mxu1 %v3589_v42  ;;  %2374 = vmatprep.subr.bf16.mxu0 %v3594_v43  ;;  %v3684_v42 = vld [vmem:[%s3879_s7 + $0x884] ss:$24 sps:$4 sm:$0xff]   ;;  %v3682_v43 = vld [vmem:[%s3879_s7 + $0x880] ss:$24 sps:$4 sm:$0xff]  }
 0x11b   : > { %2417 = vmatprep.subr.bf16.mxu1 %v3597_v44  ;;  %v3687_v44 = vld [vmem:[%s3879_s7 + $0x854] ss:$24 sps:$4 sm:$0xff]  }
 0x11d   : > { %2375 = vmatpush1.bf16.msra.mxu0 %v3592_v45  ;;  %v3685_v45 = vld [vmem:[%s3879_s7 + $0x850] ss:$24 sps:$4 sm:$0xff]  }
 0x11e   : > { %2418 = vmatpush1.bf16.msra.mxu1 %v3595_v46  ;;  %2376 = vmatprep.subr.bf16.mxu0 %v3600_v47  ;;  %v3690_v46 = vld [vmem:[%s3879_s7 + $0x824] ss:$24 sps:$4 sm:$0xff]   ;;  %v3688_v47 = vld [vmem:[%s3879_s7 + $0x820] ss:$24 sps:$4 sm:$0xff]  }
 0x11f   : > { %2419 = vmatprep.subr.bf16.mxu1 %v3603_v48  ;;  %v3693_v48 = vld [vmem:[%s3879_s7 + $0x7f4] ss:$24 sps:$4 sm:$0xff]  }
 0x121   : > { %2377 = vmatpush1.bf16.msra.mxu0 %v3598_v49  ;;  %v3691_v49 = vld [vmem:[%s3879_s7 + $0x7f0] ss:$24 sps:$4 sm:$0xff]  }
 0x122   : > { %2420 = vmatpush1.bf16.msra.mxu1 %v3601_v50  ;;  %2378 = vmatprep.subr.bf16.mxu0 %v3606_v51  ;;  %v3696_v51 = vld [vmem:[%s3879_s7 + $0x7c4] ss:$24 sps:$4 sm:$0xff]  }
 0x123   : > { %2421 = vmatprep.subr.bf16.mxu1 %v3609_v52  ;;  %v3694_v52 = vld [vmem:[%s3879_s7 + $0x7c0] ss:$24 sps:$4 sm:$0xff]  }
 0x125   : > { %2379 = vmatpush2.bf16.msra.mxu0 %v3604_v53 }
 0x126   : > { %2422 = vmatpush2.bf16.msra.mxu1 %v3607_v54  ;;  %2380 = vmatprep.subr.bf16.mxu0 %v3612_v55  ;;  %v3699_v55 = vld [vmem:[%s3879_s7 + $0x794] ss:$24 sps:$4 sm:$0xff]  }
 0x127   : > { %2423 = vmatprep.subr.bf16.mxu1 %v3615_v56  ;;  %v3697_v56 = vld [vmem:[%s3879_s7 + $0x790] ss:$24 sps:$4 sm:$0xff]  }
 0x129   : > { %2381 = vmatpush2.bf16.msra.mxu0 %v3610_v58 }
 0x12a   : > { %2424 = vmatpush2.bf16.msra.mxu1 %v3613_v59  ;;  %2382 = vmatprep.subr.bf16.mxu0 %v3618_v60 }
 0x12b   : > { %2425 = vmatprep.subr.bf16.mxu1 %v3621_v61 }
 0x12d   : > { %2383 = vmatpush2.bf16.msra.mxu0 %v3616_v62 }
 0x12e   : > { %2426 = vmatpush2.bf16.msra.mxu1 %v3619_v63  ;;  %2384 = vmatprep.subr.bf16.mxu0 %v3624_v0  ;;  %v328_v63 = vld [vmem:[#allocation2 + $0x30] sm:$0xff] }
 0x12f   : > { %2427 = vmatprep.subr.bf16.mxu1 %v3627_v1 }
 0x131   : > { %2385 = vmatpush2.bf16.msra.mxu0 %v3622_v2 }
 0x132   : > { %2428 = vmatpush2.bf16.msra.mxu1 %v3625_v3  ;;  %2386 = vmatprep.subr.bf16.mxu0 %v3630_v4  ;;  %v329_v4 = vld [vmem:[#allocation2] sm:$0xff] }
 0x133   : > { %2429 = vmatprep.subr.bf16.mxu1 %v3633_v5 }
 0x135   : > { %2387 = vmatpush2.bf16.msra.mxu0 %v3628_v6 }
 0x136   : > { %2430 = vmatpush2.bf16.msra.mxu1 %v3631_v7  ;;  %2388 = vmatprep.subr.bf16.mxu0 %v3636_v8 }
 0x137   : > { %2431 = vmatprep.subr.bf16.mxu1 %v3639_v9  ;;  %v334_v9 = vld [vmem:[#allocation2 + $0x8] sm:$0xff] }
 0x139   : > { %2389 = vmatpush2.bf16.msra.mxu0 %v3634_v10 }
 0x13a   : > { %2432 = vmatpush2.bf16.msra.mxu1 %v3637_v13  ;;  %2390 = vmatprep.subr.bf16.mxu0 %v3642_v14 }
 0x13b   : > { %2433 = vmatprep.subr.bf16.mxu1 %v3645_v15 }
 0x13d   : > { %2391 = vmatpush2.bf16.msra.mxu0 %v3640_v16  ;;  %v335_v16 = vld [vmem:[#allocation2 + $0x38] sm:$0xff] }
 0x13e   : > { %2434 = vmatpush2.bf16.msra.mxu1 %v3643_v18  ;;  %2392 = vmatprep.subr.bf16.mxu0 %v3648_v19 }
 0x13f   : > { %2435 = vmatprep.subr.bf16.mxu1 %v3651_v20 }
 0x141   : > { %2393 = vmatpush2.bf16.msra.mxu0 %v3646_v21 }
 0x142   : > { %2436 = vmatpush2.bf16.msra.mxu1 %v3649_v22  ;;  %2448 = vmatprep.subr.bf16.mxu0 %v3654_v23 }
 0x144   : > { %2395 = vmatmul.mubr.bf16.vlgmr.msra.gmra.mxu0 %v3702_v26  ;;  %v2138_v50 = vpop.f32.mrf.mxu0 }
 0x145   : > { %2438 = vmatmul.mubr.bf16.vlgmr.msra.gmra.mxu1 %v3703_v11  ;;  %2449 = vmatpush1.bf16.msra.mxu0 %v3652_v24  ;;  %v2181_v53 = vpop.f32.mrf.mxu1 }
 0x146   : > { %2480 = vmatprep.mubr.bf16.mxu0 %v3994_v41  ;;  %2450 = vmatprep.subr.bf16.mxu0 %v3657_v25  ;;  %v3669_v41 = vld [vmem:[%s3879_s7 + $0x674] ss:$24 sps:$4 sm:$0xff]   ;;  %v2140_v54 = vpop.f32.mrf.mxu0  ;;  %v2182_v62 = vadd.f32 %v2181_v53, %v2138_v50 }
 0x147   : > { %v2183_v58 = vpop.f32.mrf.mxu1 }
 0x148   : > { %v2142_v59 = vpop.f32.mrf.mxu0  ;;  %v2184_v1 = vadd.f32 %v2183_v58, %v2140_v54  ;;  %v332_v54 = vld [vmem:[#allocation2 + $0x50] sm:$0xff] }
 0x149   : > { %2451 = vmatpush1.bf16.msra.mxu0 %v3655_v27  ;;  %v2185_v60 = vpop.f32.mrf.mxu1 }
 0x14a   : > { %2452 = vmatprep.subr.bf16.mxu0 %v3660_v28  ;;  %v2144_v61 = vpop.f32.mrf.mxu0  ;;  %v2186_v6 = vadd.f32 %v2185_v60, %v2142_v59  ;;  %v330_v28 = vld [vmem:[#allocation2 + $0x58] sm:$0xff]  ;;  %v333_v60 = vld [vmem:[#allocation2 + $0x20] sm:$0xff] }
 0x14b   : > { %v2187_v3 = vpop.f32.mrf.mxu1 }
 0x14c   : > { %v2188_v13 = vadd.f32 %v2187_v3, %v2144_v61 }
 0x14d   : > { %2453 = vmatpush1.bf16.msra.mxu0 %v3658_v29 }
 0x14e   : > { %2454 = vmatprep.subr.bf16.mxu0 %v3663_v12 }
 0x151   : > { %2455 = vmatpush1.bf16.msra.mxu0 %v3661_v30 }
 0x152   : > { %2456 = vmatprep.subr.bf16.mxu0 %v3666_v57 }
 0x155   : > { %2457 = vmatpush1.bf16.msra.mxu0 %v3664_v31  ;;  %v331_v31 = vld [vmem:[#allocation2 + $0x18] sm:$0xff] }
 0x156   : > { %2458 = vmatprep.subr.bf16.mxu0 %v3669_v41 }
 0x159   : > { %2459 = vmatpush1.bf16.msra.mxu0 %v3667_v32 }
 0x15a   : > { %2460 = vmatprep.subr.bf16.mxu0 %v3672_v33 }
 0x15d   : > { %2461 = vmatpush1.bf16.msra.mxu0 %v3670_v34 }
 0x15e   : > { %2462 = vmatprep.subr.bf16.mxu0 %v3675_v35 }
 0x161   : > { %2463 = vmatpush1.bf16.msra.mxu0 %v3673_v36  ;;  %v336_v36 = vld [vmem:[#allocation2 + $0x28] sm:$0xff] }
 0x162   : > { %2464 = vmatprep.subr.bf16.mxu0 %v3678_v37 }
 0x165   : > { %2465 = vmatpush2.bf16.msra.mxu0 %v3676_v38 }
 0x166   : > { %2466 = vmatprep.subr.bf16.mxu0 %v3681_v39 }
 0x169   : > { %2467 = vmatpush2.bf16.msra.mxu0 %v3679_v40 }
 0x16a   : > { %2468 = vmatprep.subr.bf16.mxu0 %v3684_v42  ;;  %v337_v42 = vld [vmem:[#allocation2 + $0x48] sm:$0xff] }
 0x16d   : > { %2469 = vmatpush2.bf16.msra.mxu0 %v3682_v43 }
 0x16e   : > { %2470 = vmatprep.subr.bf16.mxu0 %v3687_v44 }
 0x171   : > { %2471 = vmatpush2.bf16.msra.mxu0 %v3685_v45 }
 0x172   : > { %2472 = vmatprep.subr.bf16.mxu0 %v3690_v46 }
 0x175   : > { %2473 = vmatpush2.bf16.msra.mxu0 %v3688_v47 }
 0x176   : > { %2474 = vmatprep.subr.bf16.mxu0 %v3693_v48 }
 0x179   : > { %2475 = vmatpush2.bf16.msra.mxu0 %v3691_v49 }
 0x17a   : > { %2476 = vmatprep.subr.bf16.mxu0 %v3696_v51 }
 0x17d   : > { %2477 = vmatpush2.bf16.msra.mxu0 %v3694_v52 }
 0x17e   : > { %2478 = vmatprep.subr.bf16.mxu0 %v3699_v55 }
 0x181   : > { %2479 = vmatpush2.bf16.msra.mxu0 %v3697_v56 }
 0x184   : > { %v2224_v0 = vpop.f32.mrf.mxu0  ;;  %2481 = vmatmul.mubr.bf16.vlgmr.msra.gmra.mxu0 %v4034_v17 }
 0x185   : > { %v2225_v2 = vadd.f32 %v2224_v0, %v2182_v62  ;;  %v2267_v21 = vpop.f32.mrf.mxu1 }
 0x186   : > { %v2226_v5 = vpop.f32.mrf.mxu0 }
 0x187   : > { %v2491_v7 = vadd.f32 %v2225_v2, %v328_v63  ;;  %v2227_v8 = vadd.f32 %v2226_v5, %v2184_v1  ;;  %v2269_v22 = vpop.f32.mrf.mxu1  ;;  %v338_v1 = vld [vmem:[#allocation2 + $0x10] sm:$0xff] }
 0x188   : > { %v2228_v10 = vpop.f32.mrf.mxu0 }
 0x189   : > { %2503 = vst [vmem:[#allocation2 + $0x30] sm:$0xff] %v2491_v7  ;;  %v2492_v14 = vadd.f32 %v2227_v8, %v329_v4  ;;  %v2229_v15 = vadd.f32 %v2228_v10, %v2186_v6  ;;  %v2271_v23 = vpop.f32.mrf.mxu1  ;;  %v339_v6 = vld [vmem:[#allocation2 + $0x40] sm:$0xff] }
 0x18a   : > { %v2230_v18 = vpop.f32.mrf.mxu0 }
 0x18b   : > { %2504 = vst [vmem:[#allocation2] sm:$0xff] %v2492_v14  ;;  %v2497_v19 = vadd.f32 %v2229_v15, %v334_v9  ;;  %v2231_v20 = vadd.f32 %v2230_v18, %v2188_v13  ;;  %v2273_v24 = vpop.f32.mrf.mxu1 }
 0x18d   : > { %2509 = vst [vmem:[#allocation2 + $0x8] sm:$0xff] %v2497_v19  ;;  %v2498_v17 = vadd.f32 %v2231_v20, %v335_v16 }
 0x18f   : > { %2510 = vst [vmem:[#allocation2 + $0x38] sm:$0xff] %v2498_v17 }
 0x1c4   : > { %v2310_v25 = vpop.f32.mrf.mxu0 }
 0x1c5   : > { %v2353_v26 = vpop.f32.mrf.mxu1  ;;  %v2311_v11 = vadd.f32 %v2310_v25, %v2267_v21 }
 0x1c6   : > { %v2312_v27 = vpop.f32.mrf.mxu0 }
 0x1c7   : > { %v2355_v29 = vpop.f32.mrf.mxu1  ;;  %v2313_v12 = vadd.f32 %v2312_v27, %v2269_v22  ;;  %v2354_v30 = vadd.f32 %v2353_v26, %v2311_v11 }
 0x1c8   : > { %v2314_v57 = vpop.f32.mrf.mxu0 }
 0x1c9   : > { %v2357_v41 = vpop.f32.mrf.mxu1  ;;  %v2493_v32 = vadd.f32 %v2354_v30, %v330_v28  ;;  %v2315_v33 = vadd.f32 %v2314_v57, %v2271_v23  ;;  %v2356_v34 = vadd.f32 %v2355_v29, %v2313_v12 }
 0x1ca   : > { %v2316_v35 = vpop.f32.mrf.mxu0 }
 0x1cb   : > { %v2359_v37 = vpop.f32.mrf.mxu1  ;;  %2505 = vst [vmem:[#allocation2 + $0x58] sm:$0xff] %v2493_v32  ;;  %v2494_v38 = vadd.f32 %v2356_v34, %v331_v31  ;;  %v2317_v39 = vadd.f32 %v2316_v35, %v2273_v24  ;;  %v2358_v40 = vadd.f32 %v2357_v41, %v2315_v33 }
 0x1cd   : > { %2506 = vst [vmem:[#allocation2 + $0x18] sm:$0xff] %v2494_v38  ;;  %v2499_v43 = vadd.f32 %v2358_v40, %v336_v36  ;;  %v2360_v44 = vadd.f32 %v2359_v37, %v2317_v39 }
 0x1cf   : > { %2511 = vst [vmem:[#allocation2 + $0x28] sm:$0xff] %v2499_v43  ;;  %v2500_v45 = vadd.f32 %v2360_v44, %v337_v42 }
 0x1d1   : > { %2512 = vst [vmem:[#allocation2 + $0x48] sm:$0xff] %v2500_v45 }
 0x204   : > { %v2396_v46 = vpop.f32.mrf.mxu0 }
 0x205   : > { %v2439_v47 = vpop.f32.mrf.mxu1 }
 0x206   : > { %v2398_v48 = vpop.f32.mrf.mxu0  ;;  %v2440_v53 = vadd.f32 %v2439_v47, %v2396_v46 }
 0x207   : > { %v2441_v49 = vpop.f32.mrf.mxu1 }
 0x208   : > { %v2400_v50 = vpop.f32.mrf.mxu0  ;;  %v2442_v56 = vadd.f32 %v2441_v49, %v2398_v48 }
 0x209   : > { %v2443_v51 = vpop.f32.mrf.mxu1 }
 0x20a   : > { %v2402_v52 = vpop.f32.mrf.mxu0  ;;  %v2444_v62 = vadd.f32 %v2443_v51, %v2400_v50 }
 0x20b   : > { %v2445_v59 = vpop.f32.mrf.mxu1 }
 0x20c   : > { %v2446_v3 = vadd.f32 %v2445_v59, %v2402_v52 }
 0x244   : > { %v2482_v55 = vpop.f32.mrf.mxu0 }
 0x245   : > { %v2483_v58 = vadd.f32 %v2482_v55, %v2440_v53 }
 0x246   : > { %v2484_v61 = vpop.f32.mrf.mxu0 }
 0x247   : > { %v2495_v63 = vadd.f32 %v2483_v58, %v332_v54  ;;  %v2485_v0 = vadd.f32 %v2484_v61, %v2442_v56 }
 0x248   : > { %v2486_v2 = vpop.f32.mrf.mxu0 }
 0x249   : > { %2507 = vst [vmem:[#allocation2 + $0x50] sm:$0xff] %v2495_v63  ;;  %v2496_v4 = vadd.f32 %v2485_v0, %v333_v60  ;;  %v2487_v5 = vadd.f32 %v2486_v2, %v2444_v62 }
 0x24a   : > { %v2488_v7 = vpop.f32.mrf.mxu0 }
 0x24b   : > { %2508 = vst [vmem:[#allocation2 + $0x20] sm:$0xff] %v2496_v4  ;;  %v2501_v8 = vadd.f32 %v2487_v5, %v338_v1  ;;  %v2489_v9 = vadd.f32 %v2488_v7, %v2446_v3  ;;  %2518 = sbr.rel (%p3178_p6) target bundleno = 630 (0x276), region = 63 }
 0x24d   : > { %2513 = vst [vmem:[#allocation2 + $0x10] sm:$0xff] %v2501_v8  ;;  %v2502_v10 = vadd.f32 %v2489_v9, %v339_v6 }
 0x24f   : > { %2514 = vst [vmem:[#allocation2 + $0x40] sm:$0xff] %v2502_v10 }
 0x250   : > { %v2519_v13 = vld [vmem:[#allocation2 + $0x30] sm:$0xff]  ;;  %v2520_v14 = vld [vmem:[#allocation2] sm:$0xff]  ;;  %v2521_v15 = vld [vmem:[#allocation2 + $0x58] sm:$0xff]  ;;  %v2687_v16 = vlaneseq  ;;  %vm2669_vm0 = vcmask 1040384  }
 0x251   : > { %v3193_v18 = vpack.c.bf16 %v2520_v14, %v2519_v13  ;;  %v2615_v19 = vmul.f32 %v2519_v13, %v2519_v13  ;;  %v2616_v20 = vmul.f32 %v2520_v14, %v2520_v14  ;;  %v2522_v17 = vld [vmem:[#allocation2 + $0x18] sm:$0xff]  ;;  %v2617_v21 = vmul.f32 %v2521_v15, %v2521_v15  ;;  %v4207_v22 = vld [vmem:[#allocation2 + $0x50] sm:$0xff]  ;;  %v2525_v27 = vld [vmem:[#allocation2 + $0x8] sm:$0xff] }
 0x252   : > { %v4209_v23 = vld [vmem:[#allocation2 + $0x20] sm:$0xff]  ;;  %v3194_v24 = vpack.c.bf16 %v2522_v17, %v2521_v15  ;;  %v2618_v25 = vmul.f32 %v2522_v17, %v2522_v17  ;;  %v4215_v11 = vmul.f32 %v4207_v22, %v4207_v22  ;;  %v2526_v28 = vld [vmem:[#allocation2 + $0x38] sm:$0xff]  ;;  %v2527_v29 = vld [vmem:[#allocation2 + $0x28] sm:$0xff]  ;;  %v2573_v57 = vadd.f32 %v2525_v27, %v2519_v13 }
 0x253   : > { %v3195_v26 = vpack.c.bf16 %v4209_v23, %v4207_v22  ;;  %2567 = vst [vmem:[%s4276_s2] sm:$0xff] %v3193_v18  ;;  %v4222_v12 = vmul.f32 %v4209_v23, %v4209_v23  ;;  %v3196_v30 = vpack.c.bf16 %v2526_v28, %v2525_v27  ;;  %v2580_v31 = vadd.f32 %v2526_v28, %v2520_v14  ;;  %v2528_v41 = vld [vmem:[#allocation2 + $0x48] sm:$0xff] }
 0x254   : > { %2568 = vst [vmem:[%s4276_s2 + $0x8] sm:$0xff] %v3194_v24  ;;  %v2621_v32 = vmul.f32 %v2525_v27, %v2525_v27  ;;  %v2622_v33 = vmul.f32 %v2526_v28, %v2526_v28  ;;  %v3197_v34 = vpack.c.bf16 %v2528_v41, %v2527_v29  ;;  %v2587_v35 = vadd.f32 %v2527_v29, %v2521_v15  ;;  %v2529_v10 = vld [vmem:[#allocation2 + $0x10] sm:$0xff] }
 0x255   : > { %2569 = vst [vmem:[%s4276_s2 + $0x10] sm:$0xff] %v3195_v26  ;;  %2570 = vst [vmem:[%s4276_s2 + $0x18] sm:$0xff] %v3196_v30  ;;  %v2574_v36 = vrot.slane %v2573_v57, 4  ;;  %v2581_v37 = vrot.slane %v2580_v31, 4  ;;  %v2594_v38 = vadd.f32 %v2528_v41, %v2522_v17  ;;  %v2623_v39 = vmul.f32 %v2527_v29, %v2527_v29 }
 0x256   : > { %v2627_v40 = vadd.f32 %v2621_v32, %v2615_v19  ;;  %v2634_v42 = vadd.f32 %v2622_v33, %v2616_v20  ;;  %2571 = vst [vmem:[%s4276_s2 + $0x20] sm:$0xff] %v3197_v34  ;;  %v2588_v43 = vrot.slane %v2587_v35, 4  ;;  %v2624_v44 = vmul.f32 %v2528_v41, %v2528_v41  ;;  %v2530_v13 = vld [vmem:[#allocation2 + $0x40] sm:$0xff] }
 0x257   : > { %v2575_v45 = vadd.f32 %v2574_v36, %v2573_v57  ;;  %v2582_v46 = vadd.f32 %v2581_v37, %v2580_v31  ;;  %v2595_v47 = vrot.slane %v2594_v38, 4  ;;  %v2641_v48 = vadd.f32 %v2623_v39, %v2617_v21 }
 0x258   : > { %v2628_v49 = vrot.slane %v2627_v40, 4  ;;  %v2635_v50 = vrot.slane %v2634_v42, 4  ;;  %v2589_v51 = vadd.f32 %v2588_v43, %v2587_v35  ;;  %v2648_v52 = vadd.f32 %v2624_v44, %v2618_v25 }
 0x259   : > { %v2576_v53 = vrot.slane %v2575_v45, 2  ;;  %v2583_v54 = vrot.slane %v2582_v46, 2  ;;  %v2596_v55 = vadd.f32 %v2595_v47, %v2594_v38  ;;  %v2642_v56 = vrot.slane %v2641_v48, 4 }
 0x25a   : > { %v2629_v58 = vadd.f32 %v2628_v49, %v2627_v40  ;;  %v2636_v59 = vadd.f32 %v2635_v50, %v2634_v42  ;;  %v2590_v60 = vrot.slane %v2589_v51, 2  ;;  %v2649_v61 = vrot.slane %v2648_v52, 4 }
 0x25b   : > { %v2577_v62 = vadd.f32 %v2576_v53, %v2575_v45  ;;  %v2584_v63 = vadd.f32 %v2583_v54, %v2582_v46  ;;  %v2597_v0 = vrot.slane %v2596_v55, 2  ;;  %v2643_v1 = vadd.f32 %v2642_v56, %v2641_v48 }
 0x25c   : > { %v2630_v2 = vrot.slane %v2629_v58, 2  ;;  %v2637_v3 = vrot.slane %v2636_v59, 2  ;;  %v2591_v4 = vadd.f32 %v2590_v60, %v2589_v51  ;;  %v2650_v5 = vadd.f32 %v2649_v61, %v2648_v52 }
 0x25d   : > { %v2578_v6 = vrot.slane %v2577_v62, 1  ;;  %v2585_v7 = vrot.slane %v2584_v63, 1  ;;  %v2598_v8 = vadd.f32 %v2597_v0, %v2596_v55  ;;  %v2644_v9 = vrot.slane %v2643_v1, 2 }
 0x25e   : > { %v2631_v14 = vadd.f32 %v2630_v2, %v2629_v58  ;;  %v2638_v15 = vadd.f32 %v2637_v3, %v2636_v59  ;;  %v2592_v18 = vrot.slane %v2591_v4, 1  ;;  %v2651_v19 = vrot.slane %v2650_v5, 2 }
 0x25f   : > { %v2599_v20 = vrot.slane %v2598_v8, 1  ;;  %v2645_v17 = vadd.f32 %v2644_v9, %v2643_v1  ;;  %v3198_v21 = vpack.c.bf16 %v2530_v13, %v2529_v10  ;;  %v2601_v24 = vadd.f32 %v2529_v10, %v4207_v22 }
 0x260   : > { %v2652_v25 = vadd.f32 %v2651_v19, %v2650_v5  ;;  %v2608_v26 = vadd.f32 %v2530_v13, %v4209_v23  ;;  %v2625_v27 = vmul.f32 %v2529_v10, %v2529_v10  ;;  %v2626_v28 = vmul.f32 %v2530_v13, %v2530_v13 }
 0x261   : > { %2572 = vst [vmem:[%s4276_s2 + $0x28] sm:$0xff] %v3198_v21  ;;  %v2602_v29 = vrot.slane %v2601_v24, 4  ;;  %v2579_v30 = vadd.f32 %v2578_v6, %v2577_v62  ;;  %v2586_v57 = vadd.f32 %v2585_v7, %v2584_v63  ;;  %v2593_v31 = vadd.f32 %v2592_v18, %v2591_v4 }
 0x262   : > { %v2609_v41 = vrot.slane %v2608_v26, 4  ;;  %v2655_v32 = vadd.f32 %v2625_v27, %v4215_v11  ;;  %v2662_v33 = vadd.f32 %v2626_v28, %v4222_v12  ;;  %v2600_v34 = vadd.f32 %v2599_v20, %v2598_v8 }
 0x263   : > { %v2603_v22 = vadd.f32 %v2602_v29, %v2601_v24  ;;  %v2632_v35 = vrot.slane %v2631_v14, 1  ;;  %v2639_v36 = vrot.slane %v2638_v15, 1  ;;  %v2646_v23 = vrot.slane %v2645_v17, 1 }
 0x264   : > { %v2610_v37 = vadd.f32 %v2609_v41, %v2608_v26  ;;  %v2656_v38 = vrot.slane %v2655_v32, 4  ;;  %v2663_v39 = vrot.slane %v2662_v33, 4  ;;  %v2653_v40 = vrot.slane %v2652_v25, 1 }
 0x265   : > { %v2604_v42 = vrot.slane %v2603_v22, 2  ;;  %v2633_v43 = vadd.f32 %v2632_v35, %v2631_v14  ;;  %v2640_v44 = vadd.f32 %v2639_v36, %v2638_v15  ;;  %v2647_v45 = vadd.f32 %v2646_v23, %v2645_v17 }
 0x266   : > { %v2611_v46 = vrot.slane %v2610_v37, 2  ;;  %v2657_v47 = vadd.f32 %v2656_v38, %v2655_v32  ;;  %v2664_v48 = vadd.f32 %v2663_v39, %v2662_v33  ;;  %v2654_v49 = vadd.f32 %v2653_v40, %v2652_v25 }
 0x267   : > { %v2670_v11 = vsel %vm2669_vm0, %v2579_v30, %v2633_v43  ;;  %v2671_v12 = vsel %vm2669_vm0, %v2586_v57, %v2640_v44  ;;  %v2672_v50 = vsel %vm2669_vm0, %v2593_v31, %v2647_v45  ;;  %v3786_v51 = vmov 1983009808  }
 0x268   : > { %v2685_v52 = vunpack.c.l.s4 %v3786_v51  ;;  %v2673_v53 = vsel %vm2669_vm0, %v2600_v34, %v2654_v49  ;;  %v2682_v54 = vcombine.low %v2670_v11, %v2671_v12  ;;  %v2688_v55 = vshrl.u32 %v2687_v16, 7 }
 0x269   : > { %v2605_v56 = vadd.f32 %v2604_v42, %v2603_v22  ;;  %v2683_v58 = vcombine.low %v2672_v50, %v2673_v53  ;;  %v2612_v60 = vadd.f32 %v2611_v46, %v2610_v37  ;;  %v2658_v61 = vrot.slane %v2657_v47, 2 }
 0x26a   : > { %v2686_v59 = vunpack.c.0.s8 %v2685_v52  ;;  %v2665_v63 = vrot.slane %v2664_v48, 2 }
 0x26b   : > { %v2606_v62 = vrot.slane %v2605_v56, 1  ;;  %v2613_v1 = vrot.slane %v2612_v60, 1  ;;  %v2659_v2 = vadd.f32 %v2658_v61, %v2657_v47 }
 0x26c   : > { %v2689_v0 = vsub.s32 %v2686_v59, %v2688_v55  ;;  %v2666_v3 = vadd.f32 %v2665_v63, %v2664_v48 }
 0x26d   : > { %v2607_v6 = vadd.f32 %v2606_v62, %v2605_v56  ;;  %v2660_v7 = vrot.slane %v2659_v2, 1  ;;  %v2614_v8 = vadd.f32 %v2613_v1, %v2612_v60 }
 0x26e   : > { %v2690_v4 = vrot.slane %v2682_v54, %v2689_v0  ;;  %v2697_v5 = vrot.slane %v2683_v58, %v2689_v0  ;;  %v2667_v9 = vrot.slane %v2666_v3, 1 }
 0x26f   : > { %v2661_v13 = vadd.f32 %v2660_v7, %v2659_v2 }
 0x270   : > { %v2698_v10 = vcombine.low %v2690_v4, %v2697_v5  ;;  %v2668_v16 = vadd.f32 %v2667_v9, %v2666_v3 }
 0x271   : > { %v2674_v14 = vsel %vm2669_vm0, %v2607_v6, %v2661_v13 }
 0x272   : > { %2709 = vst [vmem:[%s4277_s3] sm:$0xff] %v2698_v10  ;;  %v2675_v15 = vsel %vm2669_vm0, %v2614_v8, %v2668_v16 }
 0x273   : > { %v2699_v18 = vcombine.low %v2674_v14, %v2675_v15 }
 0x275   : > { %3185 = vst.sshfl [vmem:[%s4277_s3 + $0x8] sm:$0x33 pattern:$0x76325410] %v2699_v18 }
 0x276 PF: > { %s17_s17 = sadd.s32 1, %s3780_s17   ;;  %s4280_s12 = smov %s3764_s13 }
 0x277   : > { %p14_p7 = scmp.ge.s32.totalorder %s17_s17, 12   ;;  %s4281_s13 = smov %s3768_s14 }
 0x278   : > { %s4282_s14 = smov %s3855_s24  ;;  %s4283_s15 = smov %s3776_s16 }
 0x279   : > { %s4284_s16 = smov %s4286_s19  ;;  %16 = sbr.rel (!%p14_p7) target bundleno = 4 (0x4), region = 119 }
 0x27e   :  { %2769 = vsyncpa [#allocation5], 1 }
 0x27f   :  { %2771 = vsyncpa [#allocation5 + $0x1], 1 }

// kernel: plan_ankh_prostt5_forward.8
= control target key start
LH: loop header
LB: loop body
LE: loop exit
PB: predicated region body
PF: predicated region fallthrough
CT: control target
= control target key end

     0   :  { %s2769_s12 = smov 0   ;;  %s2771_s13 = smov 0   ;;  %s3105_s0 = inlined_call_operand.vmem [shape: bf16[16,5120], index: 0, kind: input, shape index: {}]   ;;  %s3106_s1 = inlined_call_operand.vmem [shape: bf16[5120,768], index: 1, kind: input, shape index: {}]   ;;  %s3107_s2 = inlined_call_operand.vmem [shape: bf16[16,768], index: 2, kind: output, shape index: {0}]   ;;  %s3108_s3 = inlined_call_operand.vmem [shape: f32[1,2,768], index: 3, kind: output, shape index: {1}]  }
   0x1   :  { %s2773_s14 = smov 0   ;;  %s2775_s15 = smov 0  }
   0x2   :  { %s2777_s16 = smov 0  }
   0x3 LB: > { %s26_s17 = sadd.s32 1, %s2741_s15  ;;  %p49_p1 = scmp.ne.s32.totalorder %s2733_s13, %s2729_s12  ;;  %s2745_s16 = sphi %s2777_s16, %s14_s16   ;;  %s2741_s15 = sphi %s2775_s15, %s3112_s15   ;;  %s2737_s14 = sphi %s2773_s14, %s3111_s14   ;;  %s2733_s13 = sphi %s2771_s13, %s3110_s13   ;;  %s2729_s12 = sphi %s2769_s12, %s3109_s12  }
   0x4   : > { %p27_p0 = scmp.ge.s32.totalorder %s26_s17, 10  ;;  %p50_p2 = scmp.eq.s32.totalorder %s2745_s16, 0 }
   0x5   : > { %s42_s19 = sadd.s32 1, %s2733_s13  ;;  %p2144_p5 = scmp.ge.s32.totalorder %s2745_s16, 10 }
   0x6   : > { %s3114_s17 = smov (%p27_p0, %s26_s17), 0  ;;  %p51_p3 = por %p50_p2, %p49_p1 }
   0x7   : > { %s38_s18 = ssub.s32 %s2741_s15, %s3114_s17  ;;  %159 = sbr.rel (%p2144_p5) target bundleno = 18 (0x12), region = 16 }
   0x8   : > { %p40_p4 = scmp.eq.s32.totalorder %s38_s18, 0 }
   0xa   : > { %s2804_s20 = scalar_select %p40_p4, %s2733_s13, %s42_s19  }
   0xc   : > { %162 = sbr.rel (!%p51_p3) target bundleno = 18 (0x12), region = 20  ;;  %s164_s21 = sand.u32 (%p51_p3), 1, %s2733_s13  }
   0xd   : > { %s2363_s22 = sshll.u32 (%p51_p3), %s2741_s15, 4  ;;  %s2145_s23 = sshll.u32 (%p51_p3), %s164_s21, 5 }
   0xe   : > { %s172_s26 = scalar_lea.vmem (%p51_p3), %s3105_s0, %s2363_s22  ;;  %s166_s27 = scalar_lea.vmem (%p51_p3), [#allocation3], %s2145_s23 }
   0xf   : > { %v185_v0 = vld [vmem:[%s172_s26] sm:$0xff] (%p51_p3)  ;;  %v187_v1 = vld [vmem:[%s172_s26 + $0x8] sm:$0xff] (%p51_p3) }
  0x10   : > { %v189_v2 = vld [vmem:[%s172_s26 + $0xa0] sm:$0xff] (%p51_p3)  ;;  %186 = vst [vmem:[%s166_s27] sm:$0xff] (%p51_p3), %v185_v0  ;;  %188 = vst [vmem:[%s166_s27 + $0x8] sm:$0xff] (%p51_p3), %v187_v1  ;;  %v191_v3 = vld [vmem:[%s172_s26 + $0xa8] sm:$0xff] (%p51_p3) }
  0x11   : > { %190 = vst [vmem:[%s166_s27 + $0x10] sm:$0xff] %v189_v2  ;;  %192 = vst [vmem:[%s166_s27 + $0x18] sm:$0xff] %v191_v3 }
  0x12 PF: > { %p2148_p6 = scmp.ge.s32.totalorder %s2745_s16, 1  ;;  %p212_p7 = scmp.lt.s32.totalorder %s2745_s16, 11 }
  0x14   : > { %p213_p8 = pnand %p2148_p6, %p212_p7 }
  0x15   : > { %s219_s28 = sand.u32 (!%p213_p8), 1, %s2729_s12   ;;  %s2150_s29 = sshll.u32 (!%p213_p8), %s2737_s14, 6 }
  0x16   : > { %216 = sbr.rel (%p213_p8) target bundleno = 475 (0x1db), region = 47  ;;  %s2149_s30 = sshll.u32 (!%p213_p8), %s219_s28, 5 }
  0x17   : > { %p270_p9 = scmp.lt.s32.totalorder (!%p213_p8), %s2150_s29, 639  ;;  %s2821_s8 = scalar_lea.vmem (!%p213_p8), [#allocation3], %s2149_s30 }
  0x18   : > { %p2152_p10 = scmp.ne.s32.totalorder (!%p213_p8), %s2737_s14, 0 }
  0x1b   : > { %s3116_s29 = smov (!%p270_p9, %s2150_s29), 639  ;;  %305 = sbr.rel (%p2152_p10) target bundleno = 39 (0x27), region = 55 }
  0x1c   : > { %s2370_s4 = smul.u32 24, %s3116_s29 }
  0x1e   : > { %s2819_s7 = scalar_lea.vmem %s3106_s1, %s2370_s4 }
  0x20   : > { %v2747_v4 = vmov 0.0  }
  0x21   : > { %306 = vst [vmem:[#allocation2 + $0x30] sm:$0xff] %v2747_v4  ;;  %307 = vst [vmem:[#allocation2] sm:$0xff] %v2747_v4 }
  0x22   : > { %308 = vst [vmem:[#allocation2 + $0x58] sm:$0xff] %v2747_v4  ;;  %309 = vst [vmem:[#allocation2 + $0x18] sm:$0xff] %v2747_v4 }
  0x23   : > { %310 = vst [vmem:[#allocation2 + $0x50] sm:$0xff] %v2747_v4  ;;  %311 = vst [vmem:[#allocation2 + $0x20] sm:$0xff] %v2747_v4 }
  0x24   : > { %312 = vst [vmem:[#allocation2 + $0x8] sm:$0xff] %v2747_v4  ;;  %313 = vst [vmem:[#allocation2 + $0x38] sm:$0xff] %v2747_v4 }
  0x25   : > { %314 = vst [vmem:[#allocation2 + $0x28] sm:$0xff] %v2747_v4  ;;  %315 = vst [vmem:[#allocation2 + $0x48] sm:$0xff] %v2747_v4 }
  0x26   : > { %316 = vst [vmem:[#allocation2 + $0x10] sm:$0xff] %v2747_v4  ;;  %317 = vst [vmem:[#allocation2 + $0x40] sm:$0xff] %v2747_v4 }
  0x27 PF: > { %v2413_v5 = vld [vmem:[%s2819_s7 + $0x154] ss:$24 sps:$4 sm:$0xff]   ;;  %v2417_v7 = vld [vmem:[%s2819_s7 + $0x150] ss:$24 sps:$4 sm:$0xff]   ;;  %v2419_v9 = vld [vmem:[%s2819_s7 + $0x124] ss:$24 sps:$4 sm:$0xff]  }
  0x28   : > { %v2415_v6 = vld [vmem:[%s2819_s7 + $0x454] ss:$24 sps:$4 sm:$0xff]   ;;  %1506 = vmatprep.subr.bf16.mxu0 %v2413_v5  ;;  %v2418_v8 = vld [vmem:[%s2819_s7 + $0x450] ss:$24 sps:$4 sm:$0xff]   ;;  %v2421_v10 = vld [vmem:[%s2819_s7 + $0x424] ss:$24 sps:$4 sm:$0xff]  }
  0x29   : > { %1549 = vmatprep.subr.bf16.mxu1 %v2415_v6  ;;  %1507 = vmatpush1.bf16.msra.mxu0 %v2417_v7  ;;  %v2423_v11 = vld [vmem:[%s2819_s7 + $0x120] ss:$24 sps:$4 sm:$0xff]   ;;  %v2425_v13 = vld [vmem:[%s2819_s7 + $0xf4] ss:$24 sps:$4 sm:$0xff]   ;;  %v2429_v15 = vld [vmem:[%s2819_s7 + $0xf0] ss:$24 sps:$4 sm:$0xff]  }
  0x2a   : > { %1550 = vmatpush1.bf16.msra.mxu1 %v2418_v8  ;;  %1508 = vmatprep.subr.bf16.mxu0 %v2419_v9  ;;  %v2424_v12 = vld [vmem:[%s2819_s7 + $0x420] ss:$24 sps:$4 sm:$0xff]   ;;  %v2427_v14 = vld [vmem:[%s2819_s7 + $0x3f4] ss:$24 sps:$4 sm:$0xff]   ;;  %v2430_v16 = vld [vmem:[%s2819_s7 + $0x3f0] ss:$24 sps:$4 sm:$0xff]  }
  0x2b   : > { %1551 = vmatprep.subr.bf16.mxu1 %v2421_v10  ;;  %v2431_v17 = vld [vmem:[%s2819_s7 + $0xc4] ss:$24 sps:$4 sm:$0xff]   ;;  %v2435_v19 = vld [vmem:[%s2819_s7 + $0xc0] ss:$24 sps:$4 sm:$0xff]   ;;  %v2437_v21 = vld [vmem:[%s2819_s7 + $0x94] ss:$24 sps:$4 sm:$0xff]  }
  0x2c   : > { %v2433_v18 = vld [vmem:[%s2819_s7 + $0x3c4] ss:$24 sps:$4 sm:$0xff]   ;;  %v2436_v20 = vld [vmem:[%s2819_s7 + $0x3c0] ss:$24 sps:$4 sm:$0xff]   ;;  %v2439_v22 = vld [vmem:[%s2819_s7 + $0x394] ss:$24 sps:$4 sm:$0xff]  }
  0x2d   : > { %1509 = vmatpush1.bf16.msra.mxu0 %v2423_v11  ;;  %v2441_v23 = vld [vmem:[%s2819_s7 + $0x90] ss:$24 sps:$4 sm:$0xff]   ;;  %v2443_v25 = vld [vmem:[%s2819_s7 + $0x64] ss:$24 sps:$4 sm:$0xff]   ;;  %v2447_v27 = vld [vmem:[%s2819_s7 + $0x60] ss:$24 sps:$4 sm:$0xff]  }
  0x2e   : > { %1552 = vmatpush1.bf16.msra.mxu1 %v2424_v12  ;;  %1510 = vmatprep.subr.bf16.mxu0 %v2425_v13  ;;  %v2442_v24 = vld [vmem:[%s2819_s7 + $0x390] ss:$24 sps:$4 sm:$0xff]   ;;  %v2445_v26 = vld [vmem:[%s2819_s7 + $0x364] ss:$24 sps:$4 sm:$0xff]   ;;  %v2448_v28 = vld [vmem:[%s2819_s7 + $0x360] ss:$24 sps:$4 sm:$0xff]  }
  0x2f   : > { %1553 = vmatprep.subr.bf16.mxu1 %v2427_v14  ;;  %v2449_v29 = vld [vmem:[%s2819_s7 + $0x34] ss:$24 sps:$4 sm:$0xff]   ;;  %v2453_v31 = vld [vmem:[%s2819_s7 + $0x30] ss:$24 sps:$4 sm:$0xff]   ;;  %v2455_v33 = vld [vmem:[%s2819_s7 + $0x4] ss:$24 sps:$4 sm:$0xff]  }
  0x30   : > { %v2451_v30 = vld [vmem:[%s2819_s7 + $0x334] ss:$24 sps:$4 sm:$0xff]   ;;  %v2454_v32 = vld [vmem:[%s2819_s7 + $0x330] ss:$24 sps:$4 sm:$0xff]   ;;  %v2457_v34 = vld [vmem:[%s2819_s7 + $0x304] ss:$24 sps:$4 sm:$0xff]  }
  0x31   : > { %1511 = vmatpush1.bf16.msra.mxu0 %v2429_v15  ;;  %v2459_v35 = vld [vmem:[%s2819_s7] ss:$24 sps:$4 sm:$0xff]   ;;  %v2461_v37 = vld [vmem:[%s2819_s7 + $0x2d4] ss:$24 sps:$4 sm:$0xff]   ;;  %v2465_v39 = vld [vmem:[%s2819_s7 + $0x2d0] ss:$24 sps:$4 sm:$0xff]  }
  0x32   : > { %1554 = vmatpush1.bf16.msra.mxu1 %v2430_v16  ;;  %1512 = vmatprep.subr.bf16.mxu0 %v2431_v17  ;;  %v2460_v36 = vld [vmem:[%s2819_s7 + $0x300] ss:$24 sps:$4 sm:$0xff]   ;;  %v2463_v38 = vld [vmem:[%s2819_s7 + $0x5d4] ss:$24 sps:$4 sm:$0xff]   ;;  %v2466_v40 = vld [vmem:[%s2819_s7 + $0x5d0] ss:$24 sps:$4 sm:$0xff]  }
  0x33   : > { %1555 = vmatprep.subr.bf16.mxu1 %v2433_v18  ;;  %v2467_v41 = vld [vmem:[%s2819_s7 + $0x2a4] ss:$24 sps:$4 sm:$0xff]   ;;  %v2471_v43 = vld [vmem:[%s2819_s7 + $0x2a0] ss:$24 sps:$4 sm:$0xff]   ;;  %v2473_v45 = vld [vmem:[%s2819_s7 + $0x274] ss:$24 sps:$4 sm:$0xff]  }
  0x34   : > { %v2469_v42 = vld [vmem:[%s2819_s7 + $0x5a4] ss:$24 sps:$4 sm:$0xff]   ;;  %v2472_v44 = vld [vmem:[%s2819_s7 + $0x5a0] ss:$24 sps:$4 sm:$0xff]   ;;  %v2475_v46 = vld [vmem:[%s2819_s7 + $0x574] ss:$24 sps:$4 sm:$0xff]  }
  0x35   : > { %1513 = vmatpush1.bf16.msra.mxu0 %v2435_v19  ;;  %v2477_v47 = vld [vmem:[%s2819_s7 + $0x270] ss:$24 sps:$4 sm:$0xff]   ;;  %v2479_v49 = vld [vmem:[%s2819_s7 + $0x244] ss:$24 sps:$4 sm:$0xff]   ;;  %v2483_v51 = vld [vmem:[%s2819_s7 + $0x240] ss:$24 sps:$4 sm:$0xff]  }
  0x36   : > { %1556 = vmatpush1.bf16.msra.mxu1 %v2436_v20  ;;  %1514 = vmatprep.subr.bf16.mxu0 %v2437_v21  ;;  %v2478_v48 = vld [vmem:[%s2819_s7 + $0x570] ss:$24 sps:$4 sm:$0xff]   ;;  %v2481_v50 = vld [vmem:[%s2819_s7 + $0x544] ss:$24 sps:$4 sm:$0xff]   ;;  %v2484_v52 = vld [vmem:[%s2819_s7 + $0x540] ss:$24 sps:$4 sm:$0xff]  }
  0x37   : > { %1557 = vmatprep.subr.bf16.mxu1 %v2439_v22  ;;  %v2873_v53 = vld [vmem:[%s2821_s8 + $0x4] ss:$16 sps:$4 sm:$0xff]   ;;  %v2877_v55 = vld [vmem:[%s2821_s8 + $0xc] ss:$16 sps:$4 sm:$0xff]   ;;  %v2489_v57 = vld [vmem:[%s2819_s7 + $0x210] ss:$24 sps:$4 sm:$0xff]  }
  0x38   : > { %v2485_v54 = vld [vmem:[%s2819_s7 + $0x214] ss:$24 sps:$4 sm:$0xff]   ;;  %1538 = vmatprep.mubr.bf16.mxu0 %v2873_v53  ;;  %1581 = vmatprep.mubr.bf16.mxu1 %v2877_v55  ;;  %v2490_v58 = vld [vmem:[%s2819_s7 + $0x510] ss:$24 sps:$4 sm:$0xff]   ;;  %v2491_v59 = vld [vmem:[%s2819_s7 + $0x1e4] ss:$24 sps:$4 sm:$0xff]  }
  0x39   : > { %1515 = vmatpush1.bf16.msra.mxu0 %v2441_v23  ;;  %v2487_v56 = vld [vmem:[%s2819_s7 + $0x514] ss:$24 sps:$4 sm:$0xff]   ;;  %v2493_v60 = vld [vmem:[%s2819_s7 + $0x4e4] ss:$24 sps:$4 sm:$0xff]   ;;  %v2495_v61 = vld [vmem:[%s2819_s7 + $0x1e0] ss:$24 sps:$4 sm:$0xff]  }
  0x3a   : > { %1558 = vmatpush1.bf16.msra.mxu1 %v2442_v24  ;;  %1516 = vmatprep.subr.bf16.mxu0 %v2443_v25  ;;  %v2496_v62 = vld [vmem:[%s2819_s7 + $0x4e0] ss:$24 sps:$4 sm:$0xff]   ;;  %v2497_v63 = vld [vmem:[%s2819_s7 + $0x1b4] ss:$24 sps:$4 sm:$0xff]   ;;  %v2501_v1 = vld [vmem:[%s2819_s7 + $0x1b0] ss:$24 sps:$4 sm:$0xff]  }
  0x3b   : > { %1559 = vmatprep.subr.bf16.mxu1 %v2445_v26  ;;  %v2499_v0 = vld [vmem:[%s2819_s7 + $0x4b4] ss:$24 sps:$4 sm:$0xff]   ;;  %v2502_v2 = vld [vmem:[%s2819_s7 + $0x4b0] ss:$24 sps:$4 sm:$0xff]   ;;  %v2503_v3 = vld [vmem:[%s2819_s7 + $0x184] ss:$24 sps:$4 sm:$0xff]  }
  0x3c   : > { %v2505_v4 = vld [vmem:[%s2819_s7 + $0x484] ss:$24 sps:$4 sm:$0xff]   ;;  %v2507_v5 = vld [vmem:[%s2819_s7 + $0x180] ss:$24 sps:$4 sm:$0xff]   ;;  %p2349_p11 = scmp.ne.s32.totalorder %s2737_s14, 9 }
  0x3d   : > { %1517 = vmatpush1.bf16.msra.mxu0 %v2447_v27  ;;  %v2508_v6 = vld [vmem:[%s2819_s7 + $0x480] ss:$24 sps:$4 sm:$0xff]   ;;  %v2517_v7 = vld [vmem:[%s2819_s7 + $0x15c] ss:$24 sps:$4 sm:$0xff]   ;;  %v2523_v13 = vld [vmem:[%s2819_s7 + $0x12c] ss:$24 sps:$4 sm:$0xff]  }
  0x3e   : > { %1560 = vmatpush1.bf16.msra.mxu1 %v2448_v28  ;;  %1518 = vmatprep.subr.bf16.mxu0 %v2449_v29  ;;  %v2520_v8 = vld [vmem:[%s2819_s7 + $0x45c] ss:$24 sps:$4 sm:$0xff]   ;;  %v2899_v9 = vld [vmem:[%s2821_s8] ss:$16 sps:$4 sm:$0xff]   ;;  %v2902_v10 = vld [vmem:[%s2821_s8 + $0x8] ss:$16 sps:$4 sm:$0xff]  }
  0x3f   : > { %1561 = vmatprep.subr.bf16.mxu1 %v2451_v30  ;;  %v2515_v11 = vld [vmem:[%s2819_s7 + $0x158] ss:$24 sps:$4 sm:$0xff]   ;;  %v2526_v14 = vld [vmem:[%s2819_s7 + $0x42c] ss:$24 sps:$4 sm:$0xff]   ;;  %v2521_v15 = vld [vmem:[%s2819_s7 + $0x128] ss:$24 sps:$4 sm:$0xff]  }
  0x40   : > { %v2518_v12 = vld [vmem:[%s2819_s7 + $0x458] ss:$24 sps:$4 sm:$0xff]   ;;  %v2524_v16 = vld [vmem:[%s2819_s7 + $0x428] ss:$24 sps:$4 sm:$0xff]   ;;  %v2529_v17 = vld [vmem:[%s2819_s7 + $0xfc] ss:$24 sps:$4 sm:$0xff]  }
  0x41   : > { %1519 = vmatpush1.bf16.msra.mxu0 %v2453_v31  ;;  %v2532_v18 = vld [vmem:[%s2819_s7 + $0x3fc] ss:$24 sps:$4 sm:$0xff]   ;;  %v2527_v19 = vld [vmem:[%s2819_s7 + $0xf8] ss:$24 sps:$4 sm:$0xff]   ;;  %v2535_v21 = vld [vmem:[%s2819_s7 + $0xcc] ss:$24 sps:$4 sm:$0xff]  }
  0x42   : > { %1562 = vmatpush1.bf16.msra.mxu1 %v2454_v32  ;;  %1520 = vmatprep.subr.bf16.mxu0 %v2455_v33  ;;  %v2530_v20 = vld [vmem:[%s2819_s7 + $0x3f8] ss:$24 sps:$4 sm:$0xff]   ;;  %v2538_v22 = vld [vmem:[%s2819_s7 + $0x3cc] ss:$24 sps:$4 sm:$0xff]   ;;  %v2533_v23 = vld [vmem:[%s2819_s7 + $0xc8] ss:$24 sps:$4 sm:$0xff]  }
  0x43   : > { %1563 = vmatprep.subr.bf16.mxu1 %v2457_v34  ;;  %v2536_v24 = vld [vmem:[%s2819_s7 + $0x3c8] ss:$24 sps:$4 sm:$0xff]   ;;  %v2541_v25 = vld [vmem:[%s2819_s7 + $0x9c] ss:$24 sps:$4 sm:$0xff]   ;;  %v2539_v27 = vld [vmem:[%s2819_s7 + $0x98] ss:$24 sps:$4 sm:$0xff]  }
  0x44   : > { %v2544_v26 = vld [vmem:[%s2819_s7 + $0x39c] ss:$24 sps:$4 sm:$0xff]   ;;  %v2542_v28 = vld [vmem:[%s2819_s7 + $0x398] ss:$24 sps:$4 sm:$0xff]   ;;  %v2547_v29 = vld [vmem:[%s2819_s7 + $0x6c] ss:$24 sps:$4 sm:$0xff]  }
  0x45   : > { %1521 = vmatpush1.bf16.msra.mxu0 %v2459_v35  ;;  %v2550_v30 = vld [vmem:[%s2819_s7 + $0x36c] ss:$24 sps:$4 sm:$0xff]   ;;  %v2545_v31 = vld [vmem:[%s2819_s7 + $0x68] ss:$24 sps:$4 sm:$0xff]   ;;  %v2553_v33 = vld [vmem:[%s2819_s7 + $0x3c] ss:$24 sps:$4 sm:$0xff]  }
  0x46   : > { %1564 = vmatpush1.bf16.msra.mxu1 %v2460_v36  ;;  %1522 = vmatprep.subr.bf16.mxu0 %v2461_v37  ;;  %v2548_v32 = vld [vmem:[%s2819_s7 + $0x368] ss:$24 sps:$4 sm:$0xff]   ;;  %v2556_v34 = vld [vmem:[%s2819_s7 + $0x33c] ss:$24 sps:$4 sm:$0xff]   ;;  %v2551_v35 = vld [vmem:[%s2819_s7 + $0x38] ss:$24 sps:$4 sm:$0xff]  }
  0x47   : > { %1565 = vmatprep.subr.bf16.mxu1 %v2463_v38  ;;  %v2554_v36 = vld [vmem:[%s2819_s7 + $0x338] ss:$24 sps:$4 sm:$0xff]   ;;  %v2559_v37 = vld [vmem:[%s2819_s7 + $0xc] ss:$24 sps:$4 sm:$0xff]  }
  0x48   : > { %v2562_v38 = vld [vmem:[%s2819_s7 + $0x30c] ss:$24 sps:$4 sm:$0xff]  }
  0x49   : > { %1523 = vmatpush2.bf16.msra.mxu0 %v2465_v39  ;;  %v2557_v39 = vld [vmem:[%s2819_s7 + $0x8] ss:$24 sps:$4 sm:$0xff]  }
  0x4a   : > { %1566 = vmatpush2.bf16.msra.mxu1 %v2466_v40  ;;  %1524 = vmatprep.subr.bf16.mxu0 %v2467_v41  ;;  %v2560_v40 = vld [vmem:[%s2819_s7 + $0x308] ss:$24 sps:$4 sm:$0xff]   ;;  %v2565_v41 = vld [vmem:[%s2819_s7 + $0x2dc] ss:$24 sps:$4 sm:$0xff]  }
  0x4b   : > { %1567 = vmatprep.subr.bf16.mxu1 %v2469_v42  ;;  %v2568_v42 = vld [vmem:[%s2819_s7 + $0x5dc] ss:$24 sps:$4 sm:$0xff]  }
  0x4d   : > { %1525 = vmatpush2.bf16.msra.mxu0 %v2471_v43  ;;  %v2563_v43 = vld [vmem:[%s2819_s7 + $0x2d8] ss:$24 sps:$4 sm:$0xff]  }
  0x4e   : > { %1568 = vmatpush2.bf16.msra.mxu1 %v2472_v44  ;;  %1526 = vmatprep.subr.bf16.mxu0 %v2473_v45  ;;  %v2566_v44 = vld [vmem:[%s2819_s7 + $0x5d8] ss:$24 sps:$4 sm:$0xff]   ;;  %v2571_v45 = vld [vmem:[%s2819_s7 + $0x2ac] ss:$24 sps:$4 sm:$0xff]  }
  0x4f   : > { %1569 = vmatprep.subr.bf16.mxu1 %v2475_v46  ;;  %v2574_v46 = vld [vmem:[%s2819_s7 + $0x5ac] ss:$24 sps:$4 sm:$0xff]  }
  0x51   : > { %1527 = vmatpush2.bf16.msra.mxu0 %v2477_v47  ;;  %v2569_v47 = vld [vmem:[%s2819_s7 + $0x2a8] ss:$24 sps:$4 sm:$0xff]  }
  0x52   : > { %1570 = vmatpush2.bf16.msra.mxu1 %v2478_v48  ;;  %1528 = vmatprep.subr.bf16.mxu0 %v2479_v49  ;;  %v2572_v48 = vld [vmem:[%s2819_s7 + $0x5a8] ss:$24 sps:$4 sm:$0xff]   ;;  %v2577_v49 = vld [vmem:[%s2819_s7 + $0x27c] ss:$24 sps:$4 sm:$0xff]  }
  0x53   : > { %1571 = vmatprep.subr.bf16.mxu1 %v2481_v50  ;;  %v2580_v50 = vld [vmem:[%s2819_s7 + $0x57c] ss:$24 sps:$4 sm:$0xff]  }
  0x55   : > { %1529 = vmatpush2.bf16.msra.mxu0 %v2483_v51  ;;  %v2575_v51 = vld [vmem:[%s2819_s7 + $0x278] ss:$24 sps:$4 sm:$0xff]  }
  0x56   : > { %1572 = vmatpush2.bf16.msra.mxu1 %v2484_v52  ;;  %1530 = vmatprep.subr.bf16.mxu0 %v2485_v54  ;;  %v2578_v52 = vld [vmem:[%s2819_s7 + $0x578] ss:$24 sps:$4 sm:$0xff]   ;;  %v2583_v54 = vld [vmem:[%s2819_s7 + $0x24c] ss:$24 sps:$4 sm:$0xff]  }
  0x57   : > { %1573 = vmatprep.subr.bf16.mxu1 %v2487_v56  ;;  %v2586_v56 = vld [vmem:[%s2819_s7 + $0x54c] ss:$24 sps:$4 sm:$0xff]  }
  0x59   : > { %1531 = vmatpush2.bf16.msra.mxu0 %v2489_v57  ;;  %v2581_v57 = vld [vmem:[%s2819_s7 + $0x248] ss:$24 sps:$4 sm:$0xff]  }
  0x5a   : > { %1574 = vmatpush2.bf16.msra.mxu1 %v2490_v58  ;;  %1532 = vmatprep.subr.bf16.mxu0 %v2491_v59  ;;  %v2584_v58 = vld [vmem:[%s2819_s7 + $0x548] ss:$24 sps:$4 sm:$0xff]   ;;  %v2589_v59 = vld [vmem:[%s2819_s7 + $0x21c] ss:$24 sps:$4 sm:$0xff]  }
  0x5b   : > { %1575 = vmatprep.subr.bf16.mxu1 %v2493_v60  ;;  %v2592_v60 = vld [vmem:[%s2819_s7 + $0x51c] ss:$24 sps:$4 sm:$0xff]  }
  0x5d   : > { %1533 = vmatpush2.bf16.msra.mxu0 %v2495_v61  ;;  %v2587_v61 = vld [vmem:[%s2819_s7 + $0x218] ss:$24 sps:$4 sm:$0xff]  }
  0x5e   : > { %1576 = vmatpush2.bf16.msra.mxu1 %v2496_v62  ;;  %1534 = vmatprep.subr.bf16.mxu0 %v2497_v63  ;;  %v2590_v62 = vld [vmem:[%s2819_s7 + $0x518] ss:$24 sps:$4 sm:$0xff]   ;;  %v2595_v63 = vld [vmem:[%s2819_s7 + $0x1ec] ss:$24 sps:$4 sm:$0xff]  }
  0x5f   : > { %1577 = vmatprep.subr.bf16.mxu1 %v2499_v0  ;;  %v2598_v0 = vld [vmem:[%s2819_s7 + $0x4ec] ss:$24 sps:$4 sm:$0xff]  }
  0x61   : > { %1535 = vmatpush2.bf16.msra.mxu0 %v2501_v1  ;;  %v2593_v1 = vld [vmem:[%s2819_s7 + $0x1e8] ss:$24 sps:$4 sm:$0xff]  }
  0x62   : > { %1578 = vmatpush2.bf16.msra.mxu1 %v2502_v2  ;;  %1536 = vmatprep.subr.bf16.mxu0 %v2503_v3  ;;  %v2596_v2 = vld [vmem:[%s2819_s7 + $0x4e8] ss:$24 sps:$4 sm:$0xff]   ;;  %v2601_v3 = vld [vmem:[%s2819_s7 + $0x1bc] ss:$24 sps:$4 sm:$0xff]  }
  0x63   : > { %1579 = vmatprep.subr.bf16.mxu1 %v2505_v4  ;;  %v2604_v4 = vld [vmem:[%s2819_s7 + $0x4bc] ss:$24 sps:$4 sm:$0xff]  }
  0x65   : > { %1537 = vmatpush2.bf16.msra.mxu0 %v2507_v5  ;;  %v2599_v5 = vld [vmem:[%s2819_s7 + $0x1b8] ss:$24 sps:$4 sm:$0xff]  }
  0x66   : > { %1580 = vmatpush2.bf16.msra.mxu1 %v2508_v6  ;;  %1592 = vmatprep.subr.bf16.mxu0 %v2517_v7  ;;  %v2602_v6 = vld [vmem:[%s2819_s7 + $0x4b8] ss:$24 sps:$4 sm:$0xff]   ;;  %v2607_v7 = vld [vmem:[%s2819_s7 + $0x18c] ss:$24 sps:$4 sm:$0xff]  }
  0x67   : > { %1635 = vmatprep.subr.bf16.mxu1 %v2520_v8  ;;  %v2610_v8 = vld [vmem:[%s2819_s7 + $0x48c] ss:$24 sps:$4 sm:$0xff]  }
  0x68   : > { %1539 = vmatmul.mubr.bf16.vlgmr.msra.gmra.mxu0 %v2899_v9 }
  0x69   : > { %1582 = vmatmul.mubr.bf16.vlgmr.msra.gmra.mxu1 %v2902_v10  ;;  %1593 = vmatpush1.bf16.msra.mxu0 %v2515_v11  ;;  %v2605_v11 = vld [vmem:[%s2819_s7 + $0x188] ss:$24 sps:$4 sm:$0xff]  }
  0x6a   : > { %1636 = vmatpush1.bf16.msra.mxu1 %v2518_v12  ;;  %1594 = vmatprep.subr.bf16.mxu0 %v2523_v13  ;;  %v2608_v12 = vld [vmem:[%s2819_s7 + $0x488] ss:$24 sps:$4 sm:$0xff]   ;;  %v2613_v13 = vld [vmem:[%s2819_s7 + $0x164] ss:$24 sps:$4 sm:$0xff]  }
  0x6b   : > { %1637 = vmatprep.subr.bf16.mxu1 %v2526_v14  ;;  %1624 = vmatprep.mubr.bf16.mxu0 %v2873_v53  ;;  %v2616_v14 = vld [vmem:[%s2819_s7 + $0x464] ss:$24 sps:$4 sm:$0xff]  }
  0x6c   : > { %1667 = vmatprep.mubr.bf16.mxu1 %v2877_v55 }
  0x6d   : > { %1595 = vmatpush1.bf16.msra.mxu0 %v2521_v15  ;;  %v2611_v15 = vld [vmem:[%s2819_s7 + $0x160] ss:$24 sps:$4 sm:$0xff]  }
  0x6e   : > { %1638 = vmatpush1.bf16.msra.mxu1 %v2524_v16  ;;  %1596 = vmatprep.subr.bf16.mxu0 %v2529_v17  ;;  %v2614_v16 = vld [vmem:[%s2819_s7 + $0x460] ss:$24 sps:$4 sm:$0xff]   ;;  %v2619_v17 = vld [vmem:[%s2819_s7 + $0x134] ss:$24 sps:$4 sm:$0xff]  }
  0x6f   : > { %1639 = vmatprep.subr.bf16.mxu1 %v2532_v18  ;;  %v2622_v18 = vld [vmem:[%s2819_s7 + $0x434] ss:$24 sps:$4 sm:$0xff]  }
  0x71   : > { %1597 = vmatpush1.bf16.msra.mxu0 %v2527_v19  ;;  %v2617_v19 = vld [vmem:[%s2819_s7 + $0x130] ss:$24 sps:$4 sm:$0xff]  }
  0x72   : > { %1640 = vmatpush1.bf16.msra.mxu1 %v2530_v20  ;;  %1598 = vmatprep.subr.bf16.mxu0 %v2535_v21  ;;  %v2620_v20 = vld [vmem:[%s2819_s7 + $0x430] ss:$24 sps:$4 sm:$0xff]   ;;  %v2625_v21 = vld [vmem:[%s2819_s7 + $0x104] ss:$24 sps:$4 sm:$0xff]  }
  0x73   : > { %1641 = vmatprep.subr.bf16.mxu1 %v2538_v22  ;;  %v2628_v22 = vld [vmem:[%s2819_s7 + $0x404] ss:$24 sps:$4 sm:$0xff]  }
  0x75   : > { %1599 = vmatpush1.bf16.msra.mxu0 %v2533_v23  ;;  %v2623_v23 = vld [vmem:[%s2819_s7 + $0x100] ss:$24 sps:$4 sm:$0xff]  }
  0x76   : > { %1642 = vmatpush1.bf16.msra.mxu1 %v2536_v24  ;;  %1600 = vmatprep.subr.bf16.mxu0 %v2541_v25  ;;  %v2626_v24 = vld [vmem:[%s2819_s7 + $0x400] ss:$24 sps:$4 sm:$0xff]   ;;  %v2631_v25 = vld [vmem:[%s2819_s7 + $0xd4] ss:$24 sps:$4 sm:$0xff]  }
  0x77   : > { %1643 = vmatprep.subr.bf16.mxu1 %v2544_v26  ;;  %v2634_v26 = vld [vmem:[%s2819_s7 + $0x3d4] ss:$24 sps:$4 sm:$0xff]  }
  0x79   : > { %1601 = vmatpush1.bf16.msra.mxu0 %v2539_v27  ;;  %v2629_v27 = vld [vmem:[%s2819_s7 + $0xd0] ss:$24 sps:$4 sm:$0xff]  }
  0x7a   : > { %1644 = vmatpush1.bf16.msra.mxu1 %v2542_v28  ;;  %1602 = vmatprep.subr.bf16.mxu0 %v2547_v29  ;;  %v2640_v28 = vld [vmem:[%s2819_s7 + $0x3a4] ss:$24 sps:$4 sm:$0xff]   ;;  %v2635_v29 = vld [vmem:[%s2819_s7 + $0xa0] ss:$24 sps:$4 sm:$0xff]  }
  0x7b   : > { %1645 = vmatprep.subr.bf16.mxu1 %v2550_v30  ;;  %v2638_v30 = vld [vmem:[%s2819_s7 + $0x3a0] ss:$24 sps:$4 sm:$0xff]  }
  0x7d   : > { %1603 = vmatpush1.bf16.msra.mxu0 %v2545_v31  ;;  %v2643_v31 = vld [vmem:[%s2819_s7 + $0x74] ss:$24 sps:$4 sm:$0xff]  }
  0x7e   : > { %1646 = vmatpush1.bf16.msra.mxu1 %v2548_v32  ;;  %1604 = vmatprep.subr.bf16.mxu0 %v2553_v33  ;;  %v2646_v32 = vld [vmem:[%s2819_s7 + $0x374] ss:$24 sps:$4 sm:$0xff]   ;;  %v2641_v33 = vld [vmem:[%s2819_s7 + $0x70] ss:$24 sps:$4 sm:$0xff]  }
  0x7f   : > { %1647 = vmatprep.subr.bf16.mxu1 %v2556_v34  ;;  %v2644_v34 = vld [vmem:[%s2819_s7 + $0x370] ss:$24 sps:$4 sm:$0xff]  }
  0x81   : > { %1605 = vmatpush1.bf16.msra.mxu0 %v2551_v35  ;;  %v2649_v35 = vld [vmem:[%s2819_s7 + $0x44] ss:$24 sps:$4 sm:$0xff]  }
  0x82   : > { %1648 = vmatpush1.bf16.msra.mxu1 %v2554_v36  ;;  %1606 = vmatprep.subr.bf16.mxu0 %v2559_v37  ;;  %v2652_v36 = vld [vmem:[%s2819_s7 + $0x344] ss:$24 sps:$4 sm:$0xff]   ;;  %v2647_v37 = vld [vmem:[%s2819_s7 + $0x40] ss:$24 sps:$4 sm:$0xff]  }
  0x83   : > { %1649 = vmatprep.subr.bf16.mxu1 %v2562_v38  ;;  %v2650_v38 = vld [vmem:[%s2819_s7 + $0x340] ss:$24 sps:$4 sm:$0xff]  }
  0x85   : > { %1607 = vmatpush1.bf16.msra.mxu0 %v2557_v39  ;;  %v2655_v39 = vld [vmem:[%s2819_s7 + $0x14] ss:$24 sps:$4 sm:$0xff]  }
  0x86   : > { %1650 = vmatpush1.bf16.msra.mxu1 %v2560_v40  ;;  %1608 = vmatprep.subr.bf16.mxu0 %v2565_v41  ;;  %v2658_v40 = vld [vmem:[%s2819_s7 + $0x314] ss:$24 sps:$4 sm:$0xff]   ;;  %v2653_v41 = vld [vmem:[%s2819_s7 + $0x10] ss:$24 sps:$4 sm:$0xff]  }
  0x87   : > { %1651 = vmatprep.subr.bf16.mxu1 %v2568_v42  ;;  %v2656_v42 = vld [vmem:[%s2819_s7 + $0x310] ss:$24 sps:$4 sm:$0xff]  }
  0x89   : > { %1609 = vmatpush2.bf16.msra.mxu0 %v2563_v43  ;;  %v2661_v43 = vld [vmem:[%s2819_s7 + $0x2e4] ss:$24 sps:$4 sm:$0xff]  }
  0x8a   : > { %1652 = vmatpush2.bf16.msra.mxu1 %v2566_v44  ;;  %1610 = vmatprep.subr.bf16.mxu0 %v2571_v45  ;;  %v2664_v44 = vld [vmem:[%s2819_s7 + $0x5e4] ss:$24 sps:$4 sm:$0xff]   ;;  %v2659_v45 = vld [vmem:[%s2819_s7 + $0x2e0] ss:$24 sps:$4 sm:$0xff]  }
  0x8b   : > { %1653 = vmatprep.subr.bf16.mxu1 %v2574_v46  ;;  %v2662_v46 = vld [vmem:[%s2819_s7 + $0x5e0] ss:$24 sps:$4 sm:$0xff]  }
  0x8d   : > { %1611 = vmatpush2.bf16.msra.mxu0 %v2569_v47  ;;  %v2667_v47 = vld [vmem:[%s2819_s7 + $0x2b4] ss:$24 sps:$4 sm:$0xff]  }
  0x8e   : > { %1654 = vmatpush2.bf16.msra.mxu1 %v2572_v48  ;;  %1612 = vmatprep.subr.bf16.mxu0 %v2577_v49  ;;  %v2670_v48 = vld [vmem:[%s2819_s7 + $0x5b4] ss:$24 sps:$4 sm:$0xff]   ;;  %v2665_v49 = vld [vmem:[%s2819_s7 + $0x2b0] ss:$24 sps:$4 sm:$0xff]  }
  0x8f   : > { %1655 = vmatprep.subr.bf16.mxu1 %v2580_v50  ;;  %v2668_v50 = vld [vmem:[%s2819_s7 + $0x5b0] ss:$24 sps:$4 sm:$0xff]  }
  0x91   : > { %1613 = vmatpush2.bf16.msra.mxu0 %v2575_v51  ;;  %v2673_v51 = vld [vmem:[%s2819_s7 + $0x284] ss:$24 sps:$4 sm:$0xff]  }
  0x92   : > { %1656 = vmatpush2.bf16.msra.mxu1 %v2578_v52  ;;  %1614 = vmatprep.subr.bf16.mxu0 %v2583_v54  ;;  %v2676_v52 = vld [vmem:[%s2819_s7 + $0x584] ss:$24 sps:$4 sm:$0xff]   ;;  %v2671_v54 = vld [vmem:[%s2819_s7 + $0x280] ss:$24 sps:$4 sm:$0xff]  }
  0x93   : > { %1657 = vmatprep.subr.bf16.mxu1 %v2586_v56  ;;  %v2674_v56 = vld [vmem:[%s2819_s7 + $0x580] ss:$24 sps:$4 sm:$0xff]  }
  0x95   : > { %1615 = vmatpush2.bf16.msra.mxu0 %v2581_v57  ;;  %v2679_v57 = vld [vmem:[%s2819_s7 + $0x254] ss:$24 sps:$4 sm:$0xff]  }
  0x96   : > { %1658 = vmatpush2.bf16.msra.mxu1 %v2584_v58  ;;  %1616 = vmatprep.subr.bf16.mxu0 %v2589_v59  ;;  %v2682_v58 = vld [vmem:[%s2819_s7 + $0x554] ss:$24 sps:$4 sm:$0xff]   ;;  %v2677_v59 = vld [vmem:[%s2819_s7 + $0x250] ss:$24 sps:$4 sm:$0xff]  }
  0x97   : > { %1659 = vmatprep.subr.bf16.mxu1 %v2592_v60  ;;  %v2680_v60 = vld [vmem:[%s2819_s7 + $0x550] ss:$24 sps:$4 sm:$0xff]  }
  0x99   : > { %1617 = vmatpush2.bf16.msra.mxu0 %v2587_v61  ;;  %v2685_v61 = vld [vmem:[%s2819_s7 + $0x224] ss:$24 sps:$4 sm:$0xff]  }
  0x9a   : > { %1660 = vmatpush2.bf16.msra.mxu1 %v2590_v62  ;;  %1618 = vmatprep.subr.bf16.mxu0 %v2595_v63  ;;  %v2688_v62 = vld [vmem:[%s2819_s7 + $0x524] ss:$24 sps:$4 sm:$0xff]   ;;  %v2683_v63 = vld [vmem:[%s2819_s7 + $0x220] ss:$24 sps:$4 sm:$0xff]  }
  0x9b   : > { %1661 = vmatprep.subr.bf16.mxu1 %v2598_v0  ;;  %v2686_v0 = vld [vmem:[%s2819_s7 + $0x520] ss:$24 sps:$4 sm:$0xff]  }
  0x9d   : > { %1619 = vmatpush2.bf16.msra.mxu0 %v2593_v1  ;;  %v2691_v1 = vld [vmem:[%s2819_s7 + $0x1f4] ss:$24 sps:$4 sm:$0xff]  }
  0x9e   : > { %1662 = vmatpush2.bf16.msra.mxu1 %v2596_v2  ;;  %1620 = vmatprep.subr.bf16.mxu0 %v2601_v3  ;;  %v2694_v2 = vld [vmem:[%s2819_s7 + $0x4f4] ss:$24 sps:$4 sm:$0xff]   ;;  %v2689_v3 = vld [vmem:[%s2819_s7 + $0x1f0] ss:$24 sps:$4 sm:$0xff]  }
  0x9f   : > { %1663 = vmatprep.subr.bf16.mxu1 %v2604_v4  ;;  %v2692_v4 = vld [vmem:[%s2819_s7 + $0x4f0] ss:$24 sps:$4 sm:$0xff]  }
  0xa1   : > { %1621 = vmatpush2.bf16.msra.mxu0 %v2599_v5  ;;  %v2697_v5 = vld [vmem:[%s2819_s7 + $0x1c4] ss:$24 sps:$4 sm:$0xff]  }
  0xa2   : > { %1664 = vmatpush2.bf16.msra.mxu1 %v2602_v6  ;;  %1622 = vmatprep.subr.bf16.mxu0 %v2607_v7  ;;  %v2700_v6 = vld [vmem:[%s2819_s7 + $0x4c4] ss:$24 sps:$4 sm:$0xff]   ;;  %v2695_v7 = vld [vmem:[%s2819_s7 + $0x1c0] ss:$24 sps:$4 sm:$0xff]  }
  0xa3   : > { %1665 = vmatprep.subr.bf16.mxu1 %v2610_v8  ;;  %v2698_v8 = vld [vmem:[%s2819_s7 + $0x4c0] ss:$24 sps:$4 sm:$0xff]  }
  0xa5   : > { %1623 = vmatpush2.bf16.msra.mxu0 %v2605_v11  ;;  %v2703_v11 = vld [vmem:[%s2819_s7 + $0x194] ss:$24 sps:$4 sm:$0xff]  }
  0xa6   : > { %1666 = vmatpush2.bf16.msra.mxu1 %v2608_v12  ;;  %1678 = vmatprep.subr.bf16.mxu0 %v2613_v13  ;;  %v2706_v12 = vld [vmem:[%s2819_s7 + $0x494] ss:$24 sps:$4 sm:$0xff]   ;;  %v2701_v13 = vld [vmem:[%s2819_s7 + $0x190] ss:$24 sps:$4 sm:$0xff]  }
  0xa7   : > { %1721 = vmatprep.subr.bf16.mxu1 %v2616_v14  ;;  %v2704_v14 = vld [vmem:[%s2819_s7 + $0x490] ss:$24 sps:$4 sm:$0xff]  }
  0xa8   : > { %1625 = vmatmul.mubr.bf16.vlgmr.msra.gmra.mxu0 %v2899_v9 }
  0xa9   : > { %1668 = vmatmul.mubr.bf16.vlgmr.msra.gmra.mxu1 %v2902_v10  ;;  %1679 = vmatpush1.bf16.msra.mxu0 %v2611_v15 }
  0xaa   : > { %1722 = vmatpush1.bf16.msra.mxu1 %v2614_v16  ;;  %1680 = vmatprep.subr.bf16.mxu0 %v2619_v17  ;;  %v318_v16 = vld [vmem:[#allocation2 + $0x30] sm:$0xff] }
  0xab   : > { %1723 = vmatprep.subr.bf16.mxu1 %v2622_v18  ;;  %1710 = vmatprep.mubr.bf16.mxu0 %v2873_v53  ;;  %v2632_v53 = vld [vmem:[%s2819_s7 + $0x3d0] ss:$24 sps:$4 sm:$0xff]  }
  0xac   : > { %1753 = vmatprep.mubr.bf16.mxu1 %v2877_v55  ;;  %v2637_v55 = vld [vmem:[%s2819_s7 + $0xa4] ss:$24 sps:$4 sm:$0xff]  }
  0xad   : > { %1681 = vmatpush1.bf16.msra.mxu0 %v2617_v19 }
  0xae   : > { %1724 = vmatpush1.bf16.msra.mxu1 %v2620_v20  ;;  %1682 = vmatprep.subr.bf16.mxu0 %v2625_v21  ;;  %v319_v20 = vld [vmem:[#allocation2] sm:$0xff] }
  0xaf   : > { %1725 = vmatprep.subr.bf16.mxu1 %v2628_v22 }
  0xb1   : > { %1683 = vmatpush1.bf16.msra.mxu0 %v2623_v23 }
  0xb2   : > { %1726 = vmatpush1.bf16.msra.mxu1 %v2626_v24  ;;  %1684 = vmatprep.subr.bf16.mxu0 %v2631_v25  ;;  %v324_v25 = vld [vmem:[#allocation2 + $0x8] sm:$0xff] }
  0xb3   : > { %1727 = vmatprep.subr.bf16.mxu1 %v2634_v26 }
  0xb5   : > { %1685 = vmatpush1.bf16.msra.mxu0 %v2629_v27 }
  0xb6   : > { %1728 = vmatpush1.bf16.msra.mxu1 %v2632_v53  ;;  %1686 = vmatprep.subr.bf16.mxu0 %v2637_v55 }
  0xb7   : > { %1729 = vmatprep.subr.bf16.mxu1 %v2640_v28  ;;  %v325_v28 = vld [vmem:[#allocation2 + $0x38] sm:$0xff] }
  0xb9   : > { %1687 = vmatpush1.bf16.msra.mxu0 %v2635_v29 }
  0xba   : > { %1730 = vmatpush1.bf16.msra.mxu1 %v2638_v30  ;;  %1688 = vmatprep.subr.bf16.mxu0 %v2643_v31 }
  0xbb   : > { %1731 = vmatprep.subr.bf16.mxu1 %v2646_v32  ;;  %v320_v32 = vld [vmem:[#allocation2 + $0x58] sm:$0xff] }
  0xbd   : > { %1689 = vmatpush1.bf16.msra.mxu0 %v2641_v33 }
  0xbe   : > { %1732 = vmatpush1.bf16.msra.mxu1 %v2644_v34  ;;  %1690 = vmatprep.subr.bf16.mxu0 %v2649_v35 }
  0xbf   : > { %1733 = vmatprep.subr.bf16.mxu1 %v2652_v36  ;;  %v321_v36 = vld [vmem:[#allocation2 + $0x18] sm:$0xff] }
  0xc1   : > { %1691 = vmatpush1.bf16.msra.mxu0 %v2647_v37 }
  0xc2   : > { %1734 = vmatpush1.bf16.msra.mxu1 %v2650_v38  ;;  %1692 = vmatprep.subr.bf16.mxu0 %v2655_v39 }
  0xc3   : > { %1735 = vmatprep.subr.bf16.mxu1 %v2658_v40 }
  0xc5   : > { %1693 = vmatpush1.bf16.msra.mxu0 %v2653_v41  ;;  %v326_v41 = vld [vmem:[#allocation2 + $0x28] sm:$0xff] }
  0xc6   : > { %1736 = vmatpush1.bf16.msra.mxu1 %v2656_v42  ;;  %1694 = vmatprep.subr.bf16.mxu0 %v2661_v43 }
  0xc7   : > { %1737 = vmatprep.subr.bf16.mxu1 %v2664_v44 }
  0xc9   : > { %1695 = vmatpush2.bf16.msra.mxu0 %v2659_v45 }
  0xca   : > { %1738 = vmatpush2.bf16.msra.mxu1 %v2662_v46  ;;  %1696 = vmatprep.subr.bf16.mxu0 %v2667_v47  ;;  %v327_v46 = vld [vmem:[#allocation2 + $0x48] sm:$0xff] }
  0xcb   : > { %1739 = vmatprep.subr.bf16.mxu1 %v2670_v48 }
  0xcd   : > { %1697 = vmatpush2.bf16.msra.mxu0 %v2665_v49 }
  0xce   : > { %1740 = vmatpush2.bf16.msra.mxu1 %v2668_v50  ;;  %1698 = vmatprep.subr.bf16.mxu0 %v2673_v51 }
  0xcf   : > { %1741 = vmatprep.subr.bf16.mxu1 %v2676_v52  ;;  %v322_v52 = vld [vmem:[#allocation2 + $0x50] sm:$0xff] }
  0xd1   : > { %1699 = vmatpush2.bf16.msra.mxu0 %v2671_v54 }
  0xd2   : > { %1742 = vmatpush2.bf16.msra.mxu1 %v2674_v56  ;;  %1700 = vmatprep.subr.bf16.mxu0 %v2679_v57 }
  0xd3   : > { %1743 = vmatprep.subr.bf16.mxu1 %v2682_v58  ;;  %v323_v58 = vld [vmem:[#allocation2 + $0x20] sm:$0xff] }
  0xd5   : > { %1701 = vmatpush2.bf16.msra.mxu0 %v2677_v59 }
  0xd6   : > { %1744 = vmatpush2.bf16.msra.mxu1 %v2680_v60  ;;  %1702 = vmatprep.subr.bf16.mxu0 %v2685_v61 }
  0xd7   : > { %1745 = vmatprep.subr.bf16.mxu1 %v2688_v62 }
  0xd9   : > { %1703 = vmatpush2.bf16.msra.mxu0 %v2683_v63  ;;  %v328_v63 = vld [vmem:[#allocation2 + $0x10] sm:$0xff] }
  0xda   : > { %1746 = vmatpush2.bf16.msra.mxu1 %v2686_v0  ;;  %1704 = vmatprep.subr.bf16.mxu0 %v2691_v1 }
  0xdb   : > { %1747 = vmatprep.subr.bf16.mxu1 %v2694_v2 }
  0xdd   : > { %1705 = vmatpush2.bf16.msra.mxu0 %v2689_v3 }
  0xde   : > { %1748 = vmatpush2.bf16.msra.mxu1 %v2692_v4  ;;  %1706 = vmatprep.subr.bf16.mxu0 %v2697_v5  ;;  %v329_v4 = vld [vmem:[#allocation2 + $0x40] sm:$0xff] }
  0xdf   : > { %1749 = vmatprep.subr.bf16.mxu1 %v2700_v6 }
  0xe1   : > { %1707 = vmatpush2.bf16.msra.mxu0 %v2695_v7 }
  0xe2   : > { %1750 = vmatpush2.bf16.msra.mxu1 %v2698_v8  ;;  %1708 = vmatprep.subr.bf16.mxu0 %v2703_v11 }
  0xe3   : > { %1751 = vmatprep.subr.bf16.mxu1 %v2706_v12 }
  0xe5   : > { %1709 = vmatpush2.bf16.msra.mxu0 %v2701_v13 }
  0xe6   : > { %1752 = vmatpush2.bf16.msra.mxu1 %v2704_v14 }
  0xe8   : > { %1711 = vmatmul.mubr.bf16.vlgmr.msra.gmra.mxu0 %v2899_v9 }
  0xe9   : > { %1754 = vmatmul.mubr.bf16.vlgmr.msra.gmra.mxu1 %v2902_v10 }
 0x128   : > { %v1540_v15 = vpop.f32.mrf.mxu0 }
 0x129   : > { %v1583_v17 = vpop.f32.mrf.mxu1 }
 0x12a   : > { %v1584_v18 = vadd.f32 %v1583_v17, %v1540_v15  ;;  %v1542_v19 = vpop.f32.mrf.mxu0 }
 0x12b   : > { %v1585_v21 = vpop.f32.mrf.mxu1 }
 0x12c   : > { %v1764_v22 = vadd.f32 %v1584_v18, %v318_v16  ;;  %v1586_v23 = vadd.f32 %v1585_v21, %v1542_v19  ;;  %v1544_v24 = vpop.f32.mrf.mxu0 }
 0x12d   : > { %v1587_v26 = vpop.f32.mrf.mxu1 }
 0x12e   : > { %1776 = vst [vmem:[#allocation2 + $0x30] sm:$0xff] %v1764_v22  ;;  %v1765_v27 = vadd.f32 %v1586_v23, %v319_v20  ;;  %v1588_v53 = vadd.f32 %v1587_v26, %v1544_v24  ;;  %v1546_v55 = vpop.f32.mrf.mxu0 }
 0x12f   : > { %v1589_v9 = vpop.f32.mrf.mxu1 }
 0x130   : > { %1777 = vst [vmem:[#allocation2] sm:$0xff] %v1765_v27  ;;  %v1770_v10 = vadd.f32 %v1588_v53, %v324_v25  ;;  %v1590_v29 = vadd.f32 %v1589_v9, %v1546_v55 }
 0x132   : > { %1782 = vst [vmem:[#allocation2 + $0x8] sm:$0xff] %v1770_v10  ;;  %v1771_v30 = vadd.f32 %v1590_v29, %v325_v28 }
 0x134   : > { %1783 = vst [vmem:[#allocation2 + $0x38] sm:$0xff] %v1771_v30 }
 0x168   : > { %v1626_v31 = vpop.f32.mrf.mxu0 }
 0x169   : > { %v1669_v33 = vpop.f32.mrf.mxu1 }
 0x16a   : > { %v1670_v34 = vadd.f32 %v1669_v33, %v1626_v31  ;;  %v1628_v35 = vpop.f32.mrf.mxu0 }
 0x16b   : > { %v1671_v37 = vpop.f32.mrf.mxu1 }
 0x16c   : > { %v1766_v38 = vadd.f32 %v1670_v34, %v320_v32  ;;  %v1672_v39 = vadd.f32 %v1671_v37, %v1628_v35  ;;  %v1630_v40 = vpop.f32.mrf.mxu0 }
 0x16d   : > { %v1673_v42 = vpop.f32.mrf.mxu1 }
 0x16e   : > { %1778 = vst [vmem:[#allocation2 + $0x58] sm:$0xff] %v1766_v38  ;;  %v1767_v43 = vadd.f32 %v1672_v39, %v321_v36  ;;  %v1674_v44 = vadd.f32 %v1673_v42, %v1630_v40  ;;  %v1632_v45 = vpop.f32.mrf.mxu0 }
 0x16f   : > { %v1675_v47 = vpop.f32.mrf.mxu1 }
 0x170   : > { %1779 = vst [vmem:[#allocation2 + $0x18] sm:$0xff] %v1767_v43  ;;  %v1772_v48 = vadd.f32 %v1674_v44, %v326_v41  ;;  %v1676_v49 = vadd.f32 %v1675_v47, %v1632_v45 }
 0x172   : > { %1784 = vst [vmem:[#allocation2 + $0x28] sm:$0xff] %v1772_v48  ;;  %v1773_v50 = vadd.f32 %v1676_v49, %v327_v46 }
 0x174   : > { %1785 = vst [vmem:[#allocation2 + $0x48] sm:$0xff] %v1773_v50 }
 0x1a8   : > { %v1712_v51 = vpop.f32.mrf.mxu0 }
 0x1a9   : > { %v1755_v54 = vpop.f32.mrf.mxu1 }
 0x1aa   : > { %v1756_v56 = vadd.f32 %v1755_v54, %v1712_v51  ;;  %v1714_v57 = vpop.f32.mrf.mxu0 }
 0x1ab   : > { %v1757_v59 = vpop.f32.mrf.mxu1 }
 0x1ac   : > { %v1768_v60 = vadd.f32 %v1756_v56, %v322_v52  ;;  %v1758_v61 = vadd.f32 %v1757_v59, %v1714_v57  ;;  %v1716_v62 = vpop.f32.mrf.mxu0 }
 0x1ad   : > { %v1759_v0 = vpop.f32.mrf.mxu1 }
 0x1ae   : > { %1780 = vst [vmem:[#allocation2 + $0x50] sm:$0xff] %v1768_v60  ;;  %v1769_v1 = vadd.f32 %v1758_v61, %v323_v58  ;;  %v1760_v2 = vadd.f32 %v1759_v0, %v1716_v62  ;;  %v1718_v3 = vpop.f32.mrf.mxu0 }
 0x1af   : > { %v1761_v5 = vpop.f32.mrf.mxu1 }
 0x1b0   : > { %1781 = vst [vmem:[#allocation2 + $0x20] sm:$0xff] %v1769_v1  ;;  %v1774_v6 = vadd.f32 %v1760_v2, %v328_v63  ;;  %v1762_v7 = vadd.f32 %v1761_v5, %v1718_v3  ;;  %1791 = sbr.rel (%p2349_p11) target bundleno = 475 (0x1db), region = 59 }
 0x1b2   : > { %1786 = vst [vmem:[#allocation2 + $0x10] sm:$0xff] %v1774_v6  ;;  %v1775_v8 = vadd.f32 %v1762_v7, %v329_v4 }
 0x1b4   : > { %1787 = vst [vmem:[#allocation2 + $0x40] sm:$0xff] %v1775_v8 }
 0x1b5   : > { %v1792_v11 = vld [vmem:[#allocation2 + $0x30] sm:$0xff]  ;;  %v1793_v12 = vld [vmem:[#allocation2] sm:$0xff]  ;;  %v1794_v13 = vld [vmem:[#allocation2 + $0x58] sm:$0xff]  ;;  %v1960_v14 = vlaneseq  ;;  %vm1942_vm0 = vcmask 1040384  }
 0x1b6   : > { %v2364_v15 = vpack.c.bf16 %v1793_v12, %v1792_v11  ;;  %v1888_v16 = vmul.f32 %v1792_v11, %v1792_v11  ;;  %v1889_v17 = vmul.f32 %v1793_v12, %v1793_v12  ;;  %v1795_v18 = vld [vmem:[#allocation2 + $0x18] sm:$0xff]  ;;  %v1890_v19 = vmul.f32 %v1794_v13, %v1794_v13  ;;  %v3041_v20 = vld [vmem:[#allocation2 + $0x50] sm:$0xff]  ;;  %v1798_v26 = vld [vmem:[#allocation2 + $0x8] sm:$0xff] }
 0x1b7   : > { %v3043_v21 = vld [vmem:[#allocation2 + $0x20] sm:$0xff]  ;;  %v2365_v22 = vpack.c.bf16 %v1795_v18, %v1794_v13  ;;  %v1891_v23 = vmul.f32 %v1795_v18, %v1795_v18  ;;  %v3049_v25 = vmul.f32 %v3041_v20, %v3041_v20  ;;  %v1799_v27 = vld [vmem:[#allocation2 + $0x38] sm:$0xff]  ;;  %v1800_v53 = vld [vmem:[#allocation2 + $0x28] sm:$0xff]  ;;  %v1846_v9 = vadd.f32 %v1798_v26, %v1792_v11 }
 0x1b8   : > { %v2366_v24 = vpack.c.bf16 %v3043_v21, %v3041_v20  ;;  %1840 = vst [vmem:[%s3107_s2] sm:$0xff] %v2364_v15  ;;  %v3056_v55 = vmul.f32 %v3043_v21, %v3043_v21  ;;  %v2367_v28 = vpack.c.bf16 %v1799_v27, %v1798_v26  ;;  %v1853_v10 = vadd.f32 %v1799_v27, %v1793_v12  ;;  %v1801_v29 = vld [vmem:[#allocation2 + $0x48] sm:$0xff] }
 0x1b9   : > { %1841 = vst [vmem:[%s3107_s2 + $0x8] sm:$0xff] %v2365_v22  ;;  %v1894_v30 = vmul.f32 %v1798_v26, %v1798_v26  ;;  %v1895_v31 = vmul.f32 %v1799_v27, %v1799_v27  ;;  %v2368_v32 = vpack.c.bf16 %v1801_v29, %v1800_v53  ;;  %v1860_v33 = vadd.f32 %v1800_v53, %v1794_v13  ;;  %v1802_v8 = vld [vmem:[#allocation2 + $0x10] sm:$0xff] }
 0x1ba   : > { %1842 = vst [vmem:[%s3107_s2 + $0x10] sm:$0xff] %v2366_v24  ;;  %1843 = vst [vmem:[%s3107_s2 + $0x18] sm:$0xff] %v2367_v28  ;;  %v1847_v34 = vrot.slane %v1846_v9, 4  ;;  %v1854_v35 = vrot.slane %v1853_v10, 4  ;;  %v1867_v36 = vadd.f32 %v1801_v29, %v1795_v18  ;;  %v1896_v37 = vmul.f32 %v1800_v53, %v1800_v53 }
 0x1bb   : > { %v1900_v38 = vadd.f32 %v1894_v30, %v1888_v16  ;;  %v1907_v39 = vadd.f32 %v1895_v31, %v1889_v17  ;;  %1844 = vst [vmem:[%s3107_s2 + $0x20] sm:$0xff] %v2368_v32  ;;  %v1861_v40 = vrot.slane %v1860_v33, 4  ;;  %v1897_v41 = vmul.f32 %v1801_v29, %v1801_v29  ;;  %v1803_v11 = vld [vmem:[#allocation2 + $0x40] sm:$0xff] }
 0x1bc   : > { %v1848_v42 = vadd.f32 %v1847_v34, %v1846_v9  ;;  %v1855_v43 = vadd.f32 %v1854_v35, %v1853_v10  ;;  %v1868_v44 = vrot.slane %v1867_v36, 4  ;;  %v1914_v45 = vadd.f32 %v1896_v37, %v1890_v19 }
 0x1bd   : > { %v1901_v46 = vrot.slane %v1900_v38, 4  ;;  %v1908_v47 = vrot.slane %v1907_v39, 4  ;;  %v1862_v48 = vadd.f32 %v1861_v40, %v1860_v33  ;;  %v1921_v49 = vadd.f32 %v1897_v41, %v1891_v23 }
 0x1be   : > { %v1849_v50 = vrot.slane %v1848_v42, 2  ;;  %v1856_v51 = vrot.slane %v1855_v43, 2  ;;  %v1869_v52 = vadd.f32 %v1868_v44, %v1867_v36  ;;  %v1915_v54 = vrot.slane %v1914_v45, 4 }
 0x1bf   : > { %v1902_v56 = vadd.f32 %v1901_v46, %v1900_v38  ;;  %v1909_v57 = vadd.f32 %v1908_v47, %v1907_v39  ;;  %v1863_v58 = vrot.slane %v1862_v48, 2  ;;  %v1922_v59 = vrot.slane %v1921_v49, 4 }
 0x1c0   : > { %v1850_v60 = vadd.f32 %v1849_v50, %v1848_v42  ;;  %v1857_v61 = vadd.f32 %v1856_v51, %v1855_v43  ;;  %v1870_v62 = vrot.slane %v1869_v52, 2  ;;  %v1916_v63 = vadd.f32 %v1915_v54, %v1914_v45 }
 0x1c1   : > { %v1903_v0 = vrot.slane %v1902_v56, 2  ;;  %v1910_v1 = vrot.slane %v1909_v57, 2  ;;  %v1864_v2 = vadd.f32 %v1863_v58, %v1862_v48  ;;  %v1923_v3 = vadd.f32 %v1922_v59, %v1921_v49 }
 0x1c2   : > { %v1851_v4 = vrot.slane %v1850_v60, 1  ;;  %v1858_v5 = vrot.slane %v1857_v61, 1  ;;  %v1871_v6 = vadd.f32 %v1870_v62, %v1869_v52  ;;  %v1917_v7 = vrot.slane %v1916_v63, 2 }
 0x1c3   : > { %v1904_v12 = vadd.f32 %v1903_v0, %v1902_v56  ;;  %v1911_v13 = vadd.f32 %v1910_v1, %v1909_v57  ;;  %v1865_v15 = vrot.slane %v1864_v2, 1  ;;  %v1924_v16 = vrot.slane %v1923_v3, 2 }
 0x1c4   : > { %v1872_v17 = vrot.slane %v1871_v6, 1  ;;  %v1918_v18 = vadd.f32 %v1917_v7, %v1916_v63  ;;  %v2369_v19 = vpack.c.bf16 %v1803_v11, %v1802_v8  ;;  %v1874_v22 = vadd.f32 %v1802_v8, %v3041_v20 }
 0x1c5   : > { %v1925_v23 = vadd.f32 %v1924_v16, %v1923_v3  ;;  %v1881_v24 = vadd.f32 %v1803_v11, %v3043_v21  ;;  %v1898_v26 = vmul.f32 %v1802_v8, %v1802_v8  ;;  %v1899_v27 = vmul.f32 %v1803_v11, %v1803_v11 }
 0x1c6   : > { %1845 = vst [vmem:[%s3107_s2 + $0x28] sm:$0xff] %v2369_v19  ;;  %v1875_v53 = vrot.slane %v1874_v22, 4  ;;  %v1852_v28 = vadd.f32 %v1851_v4, %v1850_v60  ;;  %v1859_v9 = vadd.f32 %v1858_v5, %v1857_v61  ;;  %v1866_v10 = vadd.f32 %v1865_v15, %v1864_v2 }
 0x1c7   : > { %v1882_v29 = vrot.slane %v1881_v24, 4  ;;  %v1928_v30 = vadd.f32 %v1898_v26, %v3049_v25  ;;  %v1935_v31 = vadd.f32 %v1899_v27, %v3056_v55  ;;  %v1873_v32 = vadd.f32 %v1872_v17, %v1871_v6 }
 0x1c8   : > { %v1876_v20 = vadd.f32 %v1875_v53, %v1874_v22  ;;  %v1905_v33 = vrot.slane %v1904_v12, 1  ;;  %v1912_v34 = vrot.slane %v1911_v13, 1  ;;  %v1919_v21 = vrot.slane %v1918_v18, 1 }
 0x1c9   : > { %v1883_v35 = vadd.f32 %v1882_v29, %v1881_v24  ;;  %v1929_v36 = vrot.slane %v1928_v30, 4  ;;  %v1936_v37 = vrot.slane %v1935_v31, 4  ;;  %v1926_v38 = vrot.slane %v1925_v23, 1 }
 0x1ca   : > { %v1877_v39 = vrot.slane %v1876_v20, 2  ;;  %v1906_v40 = vadd.f32 %v1905_v33, %v1904_v12  ;;  %v1913_v41 = vadd.f32 %v1912_v34, %v1911_v13  ;;  %v1920_v42 = vadd.f32 %v1919_v21, %v1918_v18 }
 0x1cb   : > { %v1884_v43 = vrot.slane %v1883_v35, 2  ;;  %v1930_v44 = vadd.f32 %v1929_v36, %v1928_v30  ;;  %v1937_v45 = vadd.f32 %v1936_v37, %v1935_v31  ;;  %v1927_v46 = vadd.f32 %v1926_v38, %v1925_v23 }
 0x1cc   : > { %v1943_v25 = vsel %vm1942_vm0, %v1852_v28, %v1906_v40  ;;  %v1944_v55 = vsel %vm1942_vm0, %v1859_v9, %v1913_v41  ;;  %v1945_v47 = vsel %vm1942_vm0, %v1866_v10, %v1920_v42  ;;  %v2748_v48 = vmov 1983009808  }
 0x1cd   : > { %v1958_v49 = vunpack.c.l.s4 %v2748_v48  ;;  %v1946_v50 = vsel %vm1942_vm0, %v1873_v32, %v1927_v46  ;;  %v1955_v51 = vcombine.low %v1943_v25, %v1944_v55  ;;  %v1961_v52 = vshrl.u32 %v1960_v14, 7 }
 0x1ce   : > { %v1878_v54 = vadd.f32 %v1877_v39, %v1876_v20  ;;  %v1956_v56 = vcombine.low %v1945_v47, %v1946_v50  ;;  %v1885_v58 = vadd.f32 %v1884_v43, %v1883_v35  ;;  %v1931_v59 = vrot.slane %v1930_v44, 2 }
 0x1cf   : > { %v1959_v57 = vunpack.c.0.s8 %v1958_v49  ;;  %v1938_v61 = vrot.slane %v1937_v45, 2 }
 0x1d0   : > { %v1879_v60 = vrot.slane %v1878_v54, 1  ;;  %v1886_v63 = vrot.slane %v1885_v58, 1  ;;  %v1932_v0 = vadd.f32 %v1931_v59, %v1930_v44 }
 0x1d1   : > { %v1962_v62 = vsub.s32 %v1959_v57, %v1961_v52  ;;  %v1939_v1 = vadd.f32 %v1938_v61, %v1937_v45 }
 0x1d2   : > { %v1880_v4 = vadd.f32 %v1879_v60, %v1878_v54  ;;  %v1933_v5 = vrot.slane %v1932_v0, 1  ;;  %v1887_v6 = vadd.f32 %v1886_v63, %v1885_v58 }
 0x1d3   : > { %v1963_v2 = vrot.slane %v1955_v51, %v1962_v62  ;;  %v1970_v3 = vrot.slane %v1956_v56, %v1962_v62  ;;  %v1940_v7 = vrot.slane %v1939_v1, 1 }
 0x1d4   : > { %v1934_v11 = vadd.f32 %v1933_v5, %v1932_v0 }
 0x1d5   : > { %v1971_v8 = vcombine.low %v1963_v2, %v1970_v3  ;;  %v1941_v14 = vadd.f32 %v1940_v7, %v1939_v1 }
 0x1d6   : > { %v1947_v12 = vsel %vm1942_vm0, %v1880_v4, %v1934_v11 }
 0x1d7   : > { %1982 = vst [vmem:[%s3108_s3] sm:$0xff] %v1971_v8  ;;  %v1948_v13 = vsel %vm1942_vm0, %v1887_v6, %v1941_v14 }
 0x1d8   : > { %v1972_v15 = vcombine.low %v1947_v12, %v1948_v13 }
 0x1da   : > { %2356 = vst.sshfl [vmem:[%s3108_s3 + $0x8] sm:$0x33 pattern:$0x76325410] %v1972_v15 }
 0x1db PF: > { %s14_s16 = sadd.s32 1, %s2745_s16   ;;  %s3109_s12 = smov %s2733_s13 }
 0x1dc   : > { %p11_p12 = scmp.ge.s32.totalorder %s14_s16, 12   ;;  %s3110_s13 = smov %s2804_s20 }
 0x1dd   : > { %s3111_s14 = smov %s2741_s15  ;;  %s3112_s15 = smov %s3114_s17 }
 0x1de   :  { %13 = sbr.rel (!%p11_p12) target bundleno = 3 (0x3), region = 109 }

// kernel: custom-call.4
= control target key start
LH: loop header
LB: loop body
LE: loop exit
PB: predicated region body
PF: predicated region fallthrough
CT: control target
= control target key end

     0   :  { %s6_s0 = inlined_call_operand.vmem [shape: f32[2,2,16,128], index: 0, kind: output, shape index: {}]  }

// kernel: custom-call.1
= control target key start
LH: loop header
LB: loop body
LE: loop exit
PB: predicated region body
PF: predicated region fallthrough
CT: control target
= control target key end

     0   :  { %s6_s0 = inlined_call_operand.vmem [shape: f32[2,16,128], index: 0, kind: output, shape index: {}]  }

// kernel: custom-call
= control target key start
LH: loop header
LB: loop body
LE: loop exit
PB: predicated region body
PF: predicated region fallthrough
CT: control target
= control target key end

     0   :  { %s6_s0 = inlined_call_operand.vmem [shape: bf16[2,16,128], index: 0, kind: output, shape index: {}]  }

// kernel: plan_ankh_prostt5_forward.10
= control target key start
LH: loop header
LB: loop body
LE: loop exit
PB: predicated region body
PF: predicated region fallthrough
CT: control target
= control target key end

     0   :  { %s5250_s1 = inlined_call_operand.vmem [shape: bf16[768,1024], index: 1, kind: input, shape index: {}]   ;;  %s5251_s0 = inlined_call_operand.vmem [shape: bf16[32,768], index: 0, kind: input, shape index: {}]   ;;  %s5252_s2 = inlined_call_operand.vmem [shape: f32[1,1024], index: 2, kind: input, shape index: {}]   ;;  %s5253_s3 = inlined_call_operand.vmem [shape: f32[32,1024], index: 3, kind: output, shape index: {}]  }
   0x1   :  { %v150_v0 = vld [vmem:[%s5250_s1 + $0x1c0] sm:$0xff] }
   0x2   :  { %v154_v1 = vld [vmem:[%s5250_s1 + $0x1e0] sm:$0xff] }
   0x3   :  { %v278_v2 = vld [vmem:[%s5250_s1 + $0x5c0] sm:$0xff]  ;;  %v3372_v3 = vcombine.high %v150_v0, %v154_v1  ;;  %v3371_v5 = vcombine.low %v150_v0, %v154_v1 }
   0x4   :  { %v282_v4 = vld [vmem:[%s5250_s1 + $0x5e0] sm:$0xff] }
   0x5   :  { %v142_v6 = vld [vmem:[%s5250_s1 + $0x180] sm:$0xff]  ;;  %v3500_v8 = vcombine.high %v278_v2, %v282_v4  ;;  %v3499_v9 = vcombine.low %v278_v2, %v282_v4  ;;  %2458 = vmatprep.subr.bf16.mxu0 %v3372_v3 }
   0x6   :  { %v146_v7 = vld [vmem:[%s5250_s1 + $0x1a0] sm:$0xff]  ;;  %2459 = vmatpush1.bf16.msra.mxu0 %v3371_v5 }
   0x7   :  { %v3364_v10 = vcombine.high %v142_v6, %v146_v7  ;;  %v270_v11 = vld [vmem:[%s5250_s1 + $0x580] sm:$0xff]  ;;  %2511 = vmatprep.subr.bf16.mxu1 %v3500_v8  ;;  %v3363_v18 = vcombine.low %v142_v6, %v146_v7 }
   0x8   :  { %v274_v12 = vld [vmem:[%s5250_s1 + $0x5a0] sm:$0xff]  ;;  %2512 = vmatpush1.bf16.msra.mxu1 %v3499_v9 }
   0x9   :  { %v134_v13 = vld [vmem:[%s5250_s1 + $0x140] sm:$0xff]  ;;  %v3492_v14 = vcombine.high %v270_v11, %v274_v12  ;;  %2460 = vmatprep.subr.bf16.mxu0 %v3364_v10  ;;  %v3491_v19 = vcombine.low %v270_v11, %v274_v12 }
   0xa   :  { %v138_v15 = vld [vmem:[%s5250_s1 + $0x160] sm:$0xff]  ;;  %2461 = vmatpush1.bf16.msra.mxu0 %v3363_v18 }
   0xb   :  { %v262_v16 = vld [vmem:[%s5250_s1 + $0x540] sm:$0xff]  ;;  %v3356_v20 = vcombine.high %v134_v13, %v138_v15  ;;  %2513 = vmatprep.subr.bf16.mxu1 %v3492_v14  ;;  %v3355_v26 = vcombine.low %v134_v13, %v138_v15 }
   0xc   :  { %v266_v17 = vld [vmem:[%s5250_s1 + $0x560] sm:$0xff]  ;;  %2514 = vmatpush1.bf16.msra.mxu1 %v3491_v19 }
   0xd   :  { %v3484_v21 = vcombine.high %v262_v16, %v266_v17  ;;  %v126_v22 = vld [vmem:[%s5250_s1 + $0x100] sm:$0xff]  ;;  %2462 = vmatprep.subr.bf16.mxu0 %v3356_v20  ;;  %v3483_v27 = vcombine.low %v262_v16, %v266_v17 }
   0xe   :  { %v130_v23 = vld [vmem:[%s5250_s1 + $0x120] sm:$0xff]  ;;  %2463 = vmatpush1.bf16.msra.mxu0 %v3355_v26 }
   0xf   :  { %v254_v24 = vld [vmem:[%s5250_s1 + $0x500] sm:$0xff]  ;;  %v3348_v28 = vcombine.high %v126_v22, %v130_v23  ;;  %2515 = vmatprep.subr.bf16.mxu1 %v3484_v21  ;;  %v3347_v34 = vcombine.low %v126_v22, %v130_v23 }
  0x10   :  { %v258_v25 = vld [vmem:[%s5250_s1 + $0x520] sm:$0xff]  ;;  %2516 = vmatpush1.bf16.msra.mxu1 %v3483_v27 }
  0x11   :  { %v3476_v29 = vcombine.high %v254_v24, %v258_v25  ;;  %v118_v30 = vld [vmem:[%s5250_s1 + $0xc0] sm:$0xff]  ;;  %2464 = vmatprep.subr.bf16.mxu0 %v3348_v28  ;;  %v3475_v35 = vcombine.low %v254_v24, %v258_v25 }
  0x12   :  { %v122_v31 = vld [vmem:[%s5250_s1 + $0xe0] sm:$0xff]  ;;  %2465 = vmatpush1.bf16.msra.mxu0 %v3347_v34 }
  0x13   :  { %v246_v32 = vld [vmem:[%s5250_s1 + $0x4c0] sm:$0xff]  ;;  %v3340_v36 = vcombine.high %v118_v30, %v122_v31  ;;  %2517 = vmatprep.subr.bf16.mxu1 %v3476_v29  ;;  %v3339_v42 = vcombine.low %v118_v30, %v122_v31 }
  0x14   :  { %v250_v33 = vld [vmem:[%s5250_s1 + $0x4e0] sm:$0xff]  ;;  %2518 = vmatpush1.bf16.msra.mxu1 %v3475_v35 }
  0x15   :  { %v3468_v37 = vcombine.high %v246_v32, %v250_v33  ;;  %v110_v38 = vld [vmem:[%s5250_s1 + $0x80] sm:$0xff]  ;;  %2466 = vmatprep.subr.bf16.mxu0 %v3340_v36  ;;  %v3467_v43 = vcombine.low %v246_v32, %v250_v33 }
  0x16   :  { %v114_v39 = vld [vmem:[%s5250_s1 + $0xa0] sm:$0xff]  ;;  %2467 = vmatpush1.bf16.msra.mxu0 %v3339_v42 }
  0x17   :  { %v238_v40 = vld [vmem:[%s5250_s1 + $0x480] sm:$0xff]  ;;  %v3332_v44 = vcombine.high %v110_v38, %v114_v39  ;;  %2519 = vmatprep.subr.bf16.mxu1 %v3468_v37  ;;  %v3331_v50 = vcombine.low %v110_v38, %v114_v39 }
  0x18   :  { %v242_v41 = vld [vmem:[%s5250_s1 + $0x4a0] sm:$0xff]  ;;  %2520 = vmatpush1.bf16.msra.mxu1 %v3467_v43 }
  0x19   :  { %v3460_v45 = vcombine.high %v238_v40, %v242_v41  ;;  %v102_v46 = vld [vmem:[%s5250_s1 + $0x40] sm:$0xff]  ;;  %2468 = vmatprep.subr.bf16.mxu0 %v3332_v44  ;;  %v3459_v52 = vcombine.low %v238_v40, %v242_v41 }
  0x1a   :  { %v106_v47 = vld [vmem:[%s5250_s1 + $0x60] sm:$0xff]  ;;  %2469 = vmatpush1.bf16.msra.mxu0 %v3331_v50 }
  0x1b   :  { %v230_v48 = vld [vmem:[%s5250_s1 + $0x440] sm:$0xff]  ;;  %v3324_v53 = vcombine.high %v102_v46, %v106_v47  ;;  %2521 = vmatprep.subr.bf16.mxu1 %v3460_v45  ;;  %v3323_v60 = vcombine.low %v102_v46, %v106_v47 }
  0x1c   :  { %v234_v49 = vld [vmem:[%s5250_s1 + $0x460] sm:$0xff]  ;;  %2522 = vmatpush1.bf16.msra.mxu1 %v3459_v52 }
  0x1d   :  { %v94_v51 = vld [vmem:[%s5250_s1] sm:$0xff]  ;;  %v3452_v55 = vcombine.high %v230_v48, %v234_v49  ;;  %2470 = vmatprep.subr.bf16.mxu0 %v3324_v53  ;;  %v3451_v61 = vcombine.low %v230_v48, %v234_v49 }
  0x1e   :  { %v98_v54 = vld [vmem:[%s5250_s1 + $0x20] sm:$0xff]  ;;  %2471 = vmatpush1.bf16.msra.mxu0 %v3323_v60 }
  0x1f   :  { %v3843_v56 = vld [vmem:[%s5251_s0 + $0x4] ss:$24 sps:$4 sm:$0xff]   ;;  %v3316_v62 = vcombine.high %v94_v51, %v98_v54  ;;  %2523 = vmatprep.subr.bf16.mxu1 %v3452_v55  ;;  %v3315_v4 = vcombine.low %v94_v51, %v98_v54 }
  0x20   :  { %v222_v57 = vld [vmem:[%s5250_s1 + $0x400] sm:$0xff]  ;;  %2490 = vmatprep.mubr.bf16.mxu0 %v3843_v56  ;;  %2524 = vmatpush1.bf16.msra.mxu1 %v3451_v61 }
  0x21   :  { %v226_v58 = vld [vmem:[%s5250_s1 + $0x420] sm:$0xff]  ;;  %2472 = vmatprep.subr.bf16.mxu0 %v3316_v62 }
  0x22   :  { %v3854_v59 = vld [vmem:[%s5251_s0 + $0xc] ss:$24 sps:$4 sm:$0xff]   ;;  %v3444_v63 = vcombine.high %v222_v57, %v226_v58  ;;  %v3443_v5 = vcombine.low %v222_v57, %v226_v58  ;;  %2473 = vmatpush1.bf16.msra.mxu0 %v3315_v4 }
  0x23   :  { %v214_v0 = vld [vmem:[%s5250_s1 + $0x3c0] sm:$0xff]  ;;  %2543 = vmatprep.mubr.bf16.mxu1 %v3854_v59  ;;  %v151_v4 = vld [vmem:[%s5250_s1 + $0x1c8] sm:$0xff] }
  0x24   :  { %v218_v1 = vld [vmem:[%s5250_s1 + $0x3e0] sm:$0xff]  ;;  %2525 = vmatprep.subr.bf16.mxu1 %v3444_v63 }
  0x25   :  { %v342_v2 = vld [vmem:[%s5250_s1 + $0x7c0] sm:$0xff]  ;;  %v3436_v6 = vcombine.high %v214_v0, %v218_v1  ;;  %v3435_v12 = vcombine.low %v214_v0, %v218_v1  ;;  %2526 = vmatpush1.bf16.msra.mxu1 %v3443_v5  ;;  %v155_v5 = vld [vmem:[%s5250_s1 + $0x1e8] sm:$0xff] }
  0x26   :  { %v346_v3 = vld [vmem:[%s5250_s1 + $0x7e0] sm:$0xff] }
  0x27   :  { %v3564_v7 = vcombine.high %v342_v2, %v346_v3  ;;  %v206_v8 = vld [vmem:[%s5250_s1 + $0x380] sm:$0xff]  ;;  %2474 = vmatprep.subr.bf16.mxu0 %v3436_v6  ;;  %v3563_v13 = vcombine.low %v342_v2, %v346_v3 }
  0x28   :  { %v210_v9 = vld [vmem:[%s5250_s1 + $0x3a0] sm:$0xff]  ;;  %2475 = vmatpush2.bf16.msra.mxu0 %v3435_v12 }
  0x29   :  { %v334_v10 = vld [vmem:[%s5250_s1 + $0x780] sm:$0xff]  ;;  %v3428_v14 = vcombine.high %v206_v8, %v210_v9  ;;  %2527 = vmatprep.subr.bf16.mxu1 %v3564_v7  ;;  %v3427_v20 = vcombine.low %v206_v8, %v210_v9  ;;  %v3374_v9 = vcombine.high %v151_v4, %v155_v5 }
  0x2a   :  { %v338_v11 = vld [vmem:[%s5250_s1 + $0x7a0] sm:$0xff]  ;;  %2528 = vmatpush2.bf16.msra.mxu1 %v3563_v13  ;;  %v143_v13 = vld [vmem:[%s5250_s1 + $0x188] sm:$0xff] }
  0x2b   :  { %v3556_v15 = vcombine.high %v334_v10, %v338_v11  ;;  %v198_v16 = vld [vmem:[%s5250_s1 + $0x340] sm:$0xff]  ;;  %2476 = vmatprep.subr.bf16.mxu0 %v3428_v14  ;;  %v3555_v21 = vcombine.low %v334_v10, %v338_v11  ;;  %v147_v14 = vld [vmem:[%s5250_s1 + $0x1a8] sm:$0xff] }
  0x2c   :  { %v202_v17 = vld [vmem:[%s5250_s1 + $0x360] sm:$0xff]  ;;  %2477 = vmatpush2.bf16.msra.mxu0 %v3427_v20 }
  0x2d   :  { %v326_v18 = vld [vmem:[%s5250_s1 + $0x740] sm:$0xff]  ;;  %v3420_v22 = vcombine.high %v198_v16, %v202_v17  ;;  %2529 = vmatprep.subr.bf16.mxu1 %v3556_v15  ;;  %v3419_v28 = vcombine.low %v198_v16, %v202_v17  ;;  %v3373_v17 = vcombine.low %v151_v4, %v155_v5  ;;  %v95_v4 = vld [vmem:[%s5250_s1 + $0x8] sm:$0xff] }
  0x2e   :  { %v330_v19 = vld [vmem:[%s5250_s1 + $0x760] sm:$0xff]  ;;  %2530 = vmatpush2.bf16.msra.mxu1 %v3555_v21  ;;  %v99_v5 = vld [vmem:[%s5250_s1 + $0x28] sm:$0xff] }
  0x2f   :  { %v3548_v23 = vcombine.high %v326_v18, %v330_v19  ;;  %v190_v24 = vld [vmem:[%s5250_s1 + $0x300] sm:$0xff]  ;;  %2478 = vmatprep.subr.bf16.mxu0 %v3420_v22  ;;  %v3547_v29 = vcombine.low %v326_v18, %v330_v19  ;;  %v3366_v19 = vcombine.high %v143_v13, %v147_v14  ;;  %v3997_v22 = vld [vmem:[%s5251_s0 + $0x34] ss:$24 sps:$4 sm:$0xff]  }
  0x30   :  { %v194_v25 = vld [vmem:[%s5250_s1 + $0x320] sm:$0xff]  ;;  %2479 = vmatpush2.bf16.msra.mxu0 %v3419_v28 }
  0x31   :  { %v318_v26 = vld [vmem:[%s5250_s1 + $0x700] sm:$0xff]  ;;  %v3412_v30 = vcombine.high %v190_v24, %v194_v25  ;;  %2531 = vmatprep.subr.bf16.mxu1 %v3548_v23  ;;  %v3411_v36 = vcombine.low %v190_v24, %v194_v25  ;;  %v135_v23 = vld [vmem:[%s5250_s1 + $0x148] sm:$0xff]  ;;  %v4009_v25 = vld [vmem:[%s5251_s0 + $0x3c] ss:$24 sps:$4 sm:$0xff]  }
  0x32   :  { %v322_v27 = vld [vmem:[%s5250_s1 + $0x720] sm:$0xff]  ;;  %2532 = vmatpush2.bf16.msra.mxu1 %v3547_v29  ;;  %v139_v24 = vld [vmem:[%s5250_s1 + $0x168] sm:$0xff] }
  0x33   :  { %v182_v31 = vld [vmem:[%s5250_s1 + $0x2c0] sm:$0xff]  ;;  %v3540_v32 = vcombine.high %v318_v26, %v322_v27  ;;  %2480 = vmatprep.subr.bf16.mxu0 %v3412_v30  ;;  %v3539_v37 = vcombine.low %v318_v26, %v322_v27  ;;  %v3365_v27 = vcombine.low %v143_v13, %v147_v14  ;;  %v3358_v29 = vcombine.high %v135_v23, %v139_v24  ;;  %v215_v13 = vld [vmem:[%s5250_s1 + $0x3c8] sm:$0xff] }
  0x34   :  { %v186_v33 = vld [vmem:[%s5250_s1 + $0x2e0] sm:$0xff]  ;;  %2481 = vmatpush2.bf16.msra.mxu0 %v3411_v36  ;;  %v4034_v36 = vld [vmem:[%s5251_s0 + $0x38] ss:$24 sps:$4 sm:$0xff]   ;;  %v219_v14 = vld [vmem:[%s5250_s1 + $0x3e8] sm:$0xff] }
  0x35   :  { %v310_v34 = vld [vmem:[%s5250_s1 + $0x6c0] sm:$0xff]  ;;  %v3404_v38 = vcombine.high %v182_v31, %v186_v33  ;;  %2533 = vmatprep.subr.bf16.mxu1 %v3540_v32  ;;  %v3403_v44 = vcombine.low %v182_v31, %v186_v33  ;;  %v127_v32 = vld [vmem:[%s5250_s1 + $0x108] sm:$0xff] }
  0x36   :  { %v314_v35 = vld [vmem:[%s5250_s1 + $0x6e0] sm:$0xff]  ;;  %2534 = vmatpush2.bf16.msra.mxu1 %v3539_v37  ;;  %v131_v33 = vld [vmem:[%s5250_s1 + $0x128] sm:$0xff]  ;;  %v3357_v37 = vcombine.low %v135_v23, %v139_v24 }
  0x37   :  { %v3532_v39 = vcombine.high %v310_v34, %v314_v35  ;;  %v174_v40 = vld [vmem:[%s5250_s1 + $0x280] sm:$0xff]  ;;  %2482 = vmatprep.subr.bf16.mxu0 %v3404_v38  ;;  %v3531_v45 = vcombine.low %v310_v34, %v314_v35  ;;  %v4029_v34 = vld [vmem:[%s5251_s0 + $0x30] ss:$24 sps:$4 sm:$0xff]  }
  0x38   :  { %v178_v41 = vld [vmem:[%s5250_s1 + $0x2a0] sm:$0xff]  ;;  %2483 = vmatpush2.bf16.msra.mxu0 %v3403_v44  ;;  %v123_v44 = vld [vmem:[%s5250_s1 + $0xe8] sm:$0xff] }
  0x39   :  { %v302_v42 = vld [vmem:[%s5250_s1 + $0x680] sm:$0xff]  ;;  %v3396_v46 = vcombine.high %v174_v40, %v178_v41  ;;  %2535 = vmatprep.subr.bf16.mxu1 %v3532_v39  ;;  %v3395_v52 = vcombine.low %v174_v40, %v178_v41  ;;  %v3350_v39 = vcombine.high %v127_v32, %v131_v33  ;;  %v207_v23 = vld [vmem:[%s5250_s1 + $0x388] sm:$0xff] }
  0x3a   :  { %v306_v43 = vld [vmem:[%s5250_s1 + $0x6a0] sm:$0xff]  ;;  %2536 = vmatpush2.bf16.msra.mxu1 %v3531_v45  ;;  %v211_v24 = vld [vmem:[%s5250_s1 + $0x3a8] sm:$0xff] }
  0x3b   :  { %v3524_v47 = vcombine.high %v302_v42, %v306_v43  ;;  %v166_v48 = vld [vmem:[%s5250_s1 + $0x240] sm:$0xff]  ;;  %2484 = vmatprep.subr.bf16.mxu0 %v3396_v46  ;;  %v3523_v53 = vcombine.low %v302_v42, %v306_v43  ;;  %v4045_v42 = vld [vmem:[%s5251_s0 + $0x14] ss:$24 sps:$4 sm:$0xff]   ;;  %v3349_v46 = vcombine.low %v127_v32, %v131_v33 }
  0x3c   :  { %v170_v49 = vld [vmem:[%s5250_s1 + $0x260] sm:$0xff]  ;;  %2485 = vmatpush2.bf16.msra.mxu0 %v3395_v52  ;;  %v119_v43 = vld [vmem:[%s5250_s1 + $0xc8] sm:$0xff] }
  0x3d   :  { %v294_v50 = vld [vmem:[%s5250_s1 + $0x640] sm:$0xff]  ;;  %v3388_v54 = vcombine.high %v166_v48, %v170_v49  ;;  %2537 = vmatprep.subr.bf16.mxu1 %v3524_v47  ;;  %v3387_v62 = vcombine.low %v166_v48, %v170_v49  ;;  %v3342_v48 = vcombine.high %v119_v43, %v123_v44  ;;  %v115_v52 = vld [vmem:[%s5250_s1 + $0xa8] sm:$0xff] }
  0x3e   :  { %v298_v51 = vld [vmem:[%s5250_s1 + $0x660] sm:$0xff]  ;;  %2538 = vmatpush2.bf16.msra.mxu1 %v3523_v53  ;;  %v199_v32 = vld [vmem:[%s5250_s1 + $0x348] sm:$0xff] }
  0x3f   :  { %v3516_v55 = vcombine.high %v294_v50, %v298_v51  ;;  %v158_v57 = vld [vmem:[%s5250_s1 + $0x200] sm:$0xff]  ;;  %2486 = vmatprep.subr.bf16.mxu0 %v3388_v54  ;;  %v3515_v63 = vcombine.low %v294_v50, %v298_v51  ;;  %v111_v51 = vld [vmem:[%s5250_s1 + $0x88] sm:$0xff]  ;;  %v3341_v54 = vcombine.low %v119_v43, %v123_v44 }
  0x40   :  { %v162_v58 = vld [vmem:[%s5250_s1 + $0x220] sm:$0xff]  ;;  %2487 = vmatpush2.bf16.msra.mxu0 %v3387_v62  ;;  %v203_v33 = vld [vmem:[%s5250_s1 + $0x368] sm:$0xff] }
  0x41   :  { %v286_v60 = vld [vmem:[%s5250_s1 + $0x600] sm:$0xff]  ;;  %v3380_v0 = vcombine.high %v158_v57, %v162_v58  ;;  %2539 = vmatprep.subr.bf16.mxu1 %v3516_v55  ;;  %v3379_v6 = vcombine.low %v158_v57, %v162_v58  ;;  %v3334_v57 = vcombine.high %v111_v51, %v115_v52  ;;  %v191_v43 = vld [vmem:[%s5250_s1 + $0x308] sm:$0xff] }
  0x42   :  { %v290_v61 = vld [vmem:[%s5250_s1 + $0x620] sm:$0xff]  ;;  %2540 = vmatpush2.bf16.msra.mxu1 %v3515_v63  ;;  %v3333_v63 = vcombine.low %v111_v51, %v115_v52  ;;  %v195_v44 = vld [vmem:[%s5250_s1 + $0x328] sm:$0xff] }
  0x43   :  { %v3508_v1 = vcombine.high %v286_v60, %v290_v61  ;;  %v406_v2 = vld [vmem:[%s5250_s1 + $0x9c0] sm:$0xff]  ;;  %2488 = vmatprep.subr.bf16.mxu0 %v3380_v0  ;;  %v3507_v7 = vcombine.low %v286_v60, %v290_v61  ;;  %v107_v61 = vld [vmem:[%s5250_s1 + $0x68] sm:$0xff] }
  0x44   :  { %v410_v3 = vld [vmem:[%s5250_s1 + $0x9e0] sm:$0xff]  ;;  %2489 = vmatpush2.bf16.msra.mxu0 %v3379_v6  ;;  %v183_v51 = vld [vmem:[%s5250_s1 + $0x2c8] sm:$0xff] }
  0x45   :  { %v3628_v8 = vcombine.high %v406_v2, %v410_v3  ;;  %2541 = vmatprep.subr.bf16.mxu1 %v3508_v1  ;;  %v398_v10 = vld [vmem:[%s5250_s1 + $0x980] sm:$0xff]  ;;  %v3627_v16 = vcombine.low %v406_v2, %v410_v3  ;;  %v187_v52 = vld [vmem:[%s5250_s1 + $0x2e8] sm:$0xff] }
  0x46   :  { %v402_v11 = vld [vmem:[%s5250_s1 + $0x9a0] sm:$0xff]  ;;  %2542 = vmatpush2.bf16.msra.mxu1 %v3507_v7 }
  0x47   :  { %v3975_v12 = vld [vmem:[%s5251_s0] ss:$24 sps:$4 sm:$0xff]   ;;  %2564 = vmatprep.subr.bf16.mxu0 %v3628_v8  ;;  %v3620_v18 = vcombine.high %v398_v10, %v402_v11  ;;  %2617 = vmatprep.subr.bf16.mxu1 %v3374_v9  ;;  %v3619_v26 = vcombine.low %v398_v10, %v402_v11  ;;  %v3318_v9 = vcombine.high %v95_v4, %v99_v5 }
  0x48   :  { %v3986_v15 = vld [vmem:[%s5251_s0 + $0x8] ss:$24 sps:$4 sm:$0xff]   ;;  %2491 = vmatmul.mubr.bf16.vlgmr.msra.gmra.mxu0 %v3975_v12 }
  0x49   :  { %v390_v20 = vld [vmem:[%s5250_s1 + $0x940] sm:$0xff]  ;;  %2544 = vmatmul.mubr.bf16.vlgmr.msra.gmra.mxu1 %v3986_v15  ;;  %2565 = vmatpush1.bf16.msra.mxu0 %v3627_v16 }
  0x4a   :  { %v394_v21 = vld [vmem:[%s5250_s1 + $0x960] sm:$0xff]  ;;  %2618 = vmatpush1.bf16.msra.mxu1 %v3373_v17  ;;  %2566 = vmatprep.subr.bf16.mxu0 %v3620_v18  ;;  %v3317_v17 = vcombine.low %v95_v4, %v99_v5  ;;  %v167_v4 = vld [vmem:[%s5250_s1 + $0x248] sm:$0xff] }
  0x4b   :  { %v3612_v28 = vcombine.high %v390_v20, %v394_v21  ;;  %2619 = vmatprep.subr.bf16.mxu1 %v3366_v19  ;;  %v382_v30 = vld [vmem:[%s5250_s1 + $0x900] sm:$0xff]  ;;  %2500 = vmatprep.mubr.bf16.mxu0 %v3997_v22  ;;  %v3611_v35 = vcombine.low %v390_v20, %v394_v21  ;;  %v3438_v19 = vcombine.high %v215_v13, %v219_v14  ;;  %v171_v5 = vld [vmem:[%s5250_s1 + $0x268] sm:$0xff] }
  0x4c   :  { %v386_v31 = vld [vmem:[%s5250_s1 + $0x920] sm:$0xff]  ;;  %2553 = vmatprep.mubr.bf16.mxu1 %v4009_v25 }
  0x4d   :  { %2567 = vmatpush1.bf16.msra.mxu0 %v3619_v26  ;;  %v3604_v38 = vcombine.high %v382_v30, %v386_v31  ;;  %v374_v40 = vld [vmem:[%s5250_s1 + $0x8c0] sm:$0xff]  ;;  %v3603_v45 = vcombine.low %v382_v30, %v386_v31 }
  0x4e   :  { %2620 = vmatpush1.bf16.msra.mxu1 %v3365_v27  ;;  %2568 = vmatprep.subr.bf16.mxu0 %v3612_v28  ;;  %v378_v41 = vld [vmem:[%s5250_s1 + $0x8e0] sm:$0xff]  ;;  %v3437_v27 = vcombine.low %v215_v13, %v219_v14  ;;  %v159_v13 = vld [vmem:[%s5250_s1 + $0x208] sm:$0xff] }
  0x4f   :  { %2621 = vmatprep.subr.bf16.mxu1 %v3358_v29  ;;  %v3596_v47 = vcombine.high %v374_v40, %v378_v41  ;;  %v366_v49 = vld [vmem:[%s5250_s1 + $0x880] sm:$0xff]  ;;  %v3595_v53 = vcombine.low %v374_v40, %v378_v41  ;;  %v3430_v29 = vcombine.high %v207_v23, %v211_v24  ;;  %v163_v14 = vld [vmem:[%s5250_s1 + $0x228] sm:$0xff] }
  0x50   :  { %2501 = vmatmul.mubr.bf16.gmra.mxu0 %v4029_v34  ;;  %v370_v50 = vld [vmem:[%s5250_s1 + $0x8a0] sm:$0xff] }
  0x51   :  { %2569 = vmatpush1.bf16.msra.mxu0 %v3611_v35  ;;  %2554 = vmatmul.mubr.bf16.gmra.mxu1 %v4034_v36  ;;  %v3588_v55 = vcombine.high %v366_v49, %v370_v50  ;;  %v358_v58 = vld [vmem:[%s5250_s1 + $0x840] sm:$0xff]  ;;  %v3587_v62 = vcombine.low %v366_v49, %v370_v50 }
  0x52   :  { %2622 = vmatpush1.bf16.msra.mxu1 %v3357_v37  ;;  %2570 = vmatprep.subr.bf16.mxu0 %v3604_v38  ;;  %v362_v60 = vld [vmem:[%s5250_s1 + $0x860] sm:$0xff]  ;;  %v3429_v37 = vcombine.low %v207_v23, %v211_v24  ;;  %v407_v23 = vld [vmem:[%s5250_s1 + $0x9c8] sm:$0xff] }
  0x53   :  { %2623 = vmatprep.subr.bf16.mxu1 %v3350_v39  ;;  %2596 = vmatprep.mubr.bf16.mxu0 %v4045_v42  ;;  %v3580_v0 = vcombine.high %v358_v58, %v362_v60  ;;  %v350_v2 = vld [vmem:[%s5250_s1 + $0x800] sm:$0xff]  ;;  %v3579_v6 = vcombine.low %v358_v58, %v362_v60  ;;  %v3422_v39 = vcombine.high %v199_v32, %v203_v33  ;;  %v411_v24 = vld [vmem:[%s5250_s1 + $0x9e8] sm:$0xff] }
  0x54   :  { %2649 = vmatprep.mubr.bf16.mxu1 %v3843_v56  ;;  %v103_v56 = vld [vmem:[%s5250_s1 + $0x48] sm:$0xff]  ;;  %v354_v3 = vld [vmem:[%s5250_s1 + $0x820] sm:$0xff] }
  0x55   :  { %2571 = vmatpush1.bf16.msra.mxu0 %v3603_v45  ;;  %v3326_v1 = vcombine.high %v103_v56, %v107_v61  ;;  %v3325_v7 = vcombine.low %v103_v56, %v107_v61  ;;  %v3572_v8 = vcombine.high %v350_v2, %v354_v3  ;;  %v470_v10 = vld [vmem:[%s5250_s1 + $0xbc0] sm:$0xff]  ;;  %v3571_v16 = vcombine.low %v350_v2, %v354_v3  ;;  %v175_v56 = vld [vmem:[%s5250_s1 + $0x288] sm:$0xff] }
  0x56   :  { %2624 = vmatpush1.bf16.msra.mxu1 %v3349_v46  ;;  %2572 = vmatprep.subr.bf16.mxu0 %v3596_v47  ;;  %v474_v11 = vld [vmem:[%s5250_s1 + $0xbe0] sm:$0xff]  ;;  %v3421_v46 = vcombine.low %v199_v32, %v203_v33  ;;  %v179_v61 = vld [vmem:[%s5250_s1 + $0x2a8] sm:$0xff] }
  0x57   :  { %2625 = vmatprep.subr.bf16.mxu1 %v3342_v48  ;;  %v3692_v18 = vcombine.high %v470_v10, %v474_v11  ;;  %v462_v20 = vld [vmem:[%s5250_s1 + $0xb80] sm:$0xff]  ;;  %v3691_v26 = vcombine.low %v470_v10, %v474_v11  ;;  %v3414_v48 = vcombine.high %v191_v43, %v195_v44  ;;  %v4210_v32 = vld [vmem:[%s5251_s0 + $0x10] ss:$24 sps:$4 sm:$0xff]  }
  0x58   :  { %v466_v21 = vld [vmem:[%s5250_s1 + $0xba0] sm:$0xff]  ;;  %v399_v33 = vld [vmem:[%s5250_s1 + $0x988] sm:$0xff] }
  0x59   :  { %2573 = vmatpush1.bf16.msra.mxu0 %v3595_v53  ;;  %v3684_v28 = vcombine.high %v462_v20, %v466_v21  ;;  %v454_v30 = vld [vmem:[%s5250_s1 + $0xb40] sm:$0xff]  ;;  %v3683_v35 = vcombine.low %v462_v20, %v466_v21  ;;  %v279_v20 = vld [vmem:[%s5250_s1 + $0x5c8] sm:$0xff] }
  0x5a   :  { %2626 = vmatpush1.bf16.msra.mxu1 %v3341_v54  ;;  %2574 = vmatprep.subr.bf16.mxu0 %v3588_v55  ;;  %v458_v31 = vld [vmem:[%s5250_s1 + $0xb60] sm:$0xff]  ;;  %v3413_v54 = vcombine.low %v191_v43, %v195_v44  ;;  %v283_v21 = vld [vmem:[%s5250_s1 + $0x5e8] sm:$0xff] }
  0x5b   :  { %2627 = vmatprep.subr.bf16.mxu1 %v3334_v57  ;;  %v3676_v38 = vcombine.high %v454_v30, %v458_v31  ;;  %v446_v40 = vld [vmem:[%s5250_s1 + $0xb00] sm:$0xff]  ;;  %v3675_v45 = vcombine.low %v454_v30, %v458_v31  ;;  %v3406_v57 = vcombine.high %v183_v51, %v187_v52  ;;  %v271_v30 = vld [vmem:[%s5250_s1 + $0x588] sm:$0xff] }
  0x5c   :  { %v450_v41 = vld [vmem:[%s5250_s1 + $0xb20] sm:$0xff]  ;;  %v275_v31 = vld [vmem:[%s5250_s1 + $0x5a8] sm:$0xff] }
  0x5d   :  { %2575 = vmatpush1.bf16.msra.mxu0 %v3587_v62  ;;  %v3668_v47 = vcombine.high %v446_v40, %v450_v41  ;;  %v438_v49 = vld [vmem:[%s5250_s1 + $0xac0] sm:$0xff]  ;;  %v3667_v53 = vcombine.low %v446_v40, %v450_v41  ;;  %v263_v43 = vld [vmem:[%s5250_s1 + $0x548] sm:$0xff] }
  0x5e   :  { %2628 = vmatpush1.bf16.msra.mxu1 %v3333_v63  ;;  %2576 = vmatprep.subr.bf16.mxu0 %v3580_v0  ;;  %v442_v50 = vld [vmem:[%s5250_s1 + $0xae0] sm:$0xff]  ;;  %v3405_v63 = vcombine.low %v183_v51, %v187_v52  ;;  %v267_v44 = vld [vmem:[%s5250_s1 + $0x568] sm:$0xff] }
  0x5f   :  { %2629 = vmatprep.subr.bf16.mxu1 %v3326_v1  ;;  %v3660_v55 = vcombine.high %v438_v49, %v442_v50  ;;  %v430_v58 = vld [vmem:[%s5250_s1 + $0xa80] sm:$0xff]  ;;  %v3659_v62 = vcombine.low %v438_v49, %v442_v50  ;;  %v3398_v1 = vcombine.high %v175_v56, %v179_v61  ;;  %v3486_v49 = vcombine.high %v263_v43, %v267_v44  ;;  %v255_v51 = vld [vmem:[%s5250_s1 + $0x508] sm:$0xff] }
  0x60   :  { %v434_v60 = vld [vmem:[%s5250_s1 + $0xaa0] sm:$0xff]  ;;  %v259_v52 = vld [vmem:[%s5250_s1 + $0x528] sm:$0xff] }
  0x61   :  { %2577 = vmatpush1.bf16.msra.mxu0 %v3579_v6  ;;  %v3652_v0 = vcombine.high %v430_v58, %v434_v60  ;;  %v422_v2 = vld [vmem:[%s5250_s1 + $0xa40] sm:$0xff]  ;;  %v3651_v6 = vcombine.low %v430_v58, %v434_v60  ;;  %v3478_v58 = vcombine.high %v255_v51, %v259_v52 }
  0x62   :  { %2630 = vmatpush1.bf16.msra.mxu1 %v3325_v7  ;;  %2578 = vmatprep.subr.bf16.mxu0 %v3572_v8  ;;  %v426_v3 = vld [vmem:[%s5250_s1 + $0xa60] sm:$0xff]  ;;  %v3397_v7 = vcombine.low %v175_v56, %v179_v61  ;;  %v247_v56 = vld [vmem:[%s5250_s1 + $0x4c8] sm:$0xff] }
  0x63   :  { %2631 = vmatprep.subr.bf16.mxu1 %v3318_v9  ;;  %v3644_v8 = vcombine.high %v422_v2, %v426_v3  ;;  %v3390_v9 = vcombine.high %v167_v4, %v171_v5  ;;  %v414_v10 = vld [vmem:[%s5250_s1 + $0xa00] sm:$0xff]  ;;  %v251_v61 = vld [vmem:[%s5250_s1 + $0x4e8] sm:$0xff] }
  0x64   :  { %v418_v11 = vld [vmem:[%s5250_s1 + $0xa20] sm:$0xff] }
  0x65   :  { %2579 = vmatpush1.bf16.msra.mxu0 %v3571_v16  ;;  %v3643_v16 = vcombine.low %v422_v2, %v426_v3  ;;  %v4221_v41 = vld [vmem:[%s5251_s0 + $0x44] ss:$24 sps:$4 sm:$0xff]   ;;  %v239_v3 = vld [vmem:[%s5250_s1 + $0x488] sm:$0xff] }
  0x66   :  { %2632 = vmatpush1.bf16.msra.mxu1 %v3317_v17  ;;  %2580 = vmatprep.subr.bf16.mxu0 %v3692_v18  ;;  %v3389_v17 = vcombine.low %v167_v4, %v171_v5  ;;  %v3636_v18 = vcombine.high %v414_v10, %v418_v11  ;;  %v243_v4 = vld [vmem:[%s5250_s1 + $0x4a8] sm:$0xff] }
  0x67   :  { %2633 = vmatprep.subr.bf16.mxu1 %v3438_v19  ;;  %v3382_v19 = vcombine.high %v159_v13, %v163_v14  ;;  %v371_v5 = vld [vmem:[%s5250_s1 + $0x8a8] sm:$0xff] }
  0x69   :  { %2581 = vmatpush2.bf16.msra.mxu0 %v3691_v26  ;;  %v3635_v26 = vcombine.low %v414_v10, %v418_v11  ;;  %v235_v10 = vld [vmem:[%s5250_s1 + $0x468] sm:$0xff] }
  0x6a   :  { %2634 = vmatpush2.bf16.msra.mxu1 %v3437_v27  ;;  %2582 = vmatprep.subr.bf16.mxu0 %v3684_v28  ;;  %v3381_v27 = vcombine.low %v159_v13, %v163_v14  ;;  %v3502_v28 = vcombine.high %v279_v20, %v283_v21  ;;  %v363_v11 = vld [vmem:[%s5250_s1 + $0x868] sm:$0xff]  ;;  %v3461_v13 = vcombine.low %v239_v3, %v243_v4 }
  0x6b   :  { %2635 = vmatprep.subr.bf16.mxu1 %v3430_v29  ;;  %v3630_v29 = vcombine.high %v407_v23, %v411_v24 }
  0x6d   :  { %2583 = vmatpush2.bf16.msra.mxu0 %v3683_v35  ;;  %v403_v35 = vld [vmem:[%s5250_s1 + $0x9a8] sm:$0xff] }
  0x6e   :  { %2636 = vmatpush2.bf16.msra.mxu1 %v3429_v37  ;;  %2584 = vmatprep.subr.bf16.mxu0 %v3676_v38  ;;  %v3501_v37 = vcombine.low %v279_v20, %v283_v21  ;;  %v3629_v38 = vcombine.low %v407_v23, %v411_v24  ;;  %v3622_v40 = vcombine.high %v399_v33, %v403_v35  ;;  %v351_v20 = vld [vmem:[%s5250_s1 + $0x808] sm:$0xff] }
  0x6f   :  { %2637 = vmatprep.subr.bf16.mxu1 %v3422_v39  ;;  %v3494_v39 = vcombine.high %v271_v30, %v275_v31  ;;  %v355_v21 = vld [vmem:[%s5250_s1 + $0x828] sm:$0xff] }
  0x71   :  { %2585 = vmatpush2.bf16.msra.mxu0 %v3675_v45  ;;  %v391_v45 = vld [vmem:[%s5250_s1 + $0x948] sm:$0xff] }
  0x72   :  { %2638 = vmatpush2.bf16.msra.mxu1 %v3421_v46  ;;  %2586 = vmatprep.subr.bf16.mxu0 %v3668_v47  ;;  %v395_v46 = vld [vmem:[%s5250_s1 + $0x968] sm:$0xff]  ;;  %v3493_v47 = vcombine.low %v271_v30, %v275_v31 }
  0x73   :  { %2639 = vmatprep.subr.bf16.mxu1 %v3414_v48  ;;  %v3621_v48 = vcombine.low %v399_v33, %v403_v35  ;;  %v3614_v50 = vcombine.high %v391_v45, %v395_v46  ;;  %v471_v30 = vld [vmem:[%s5250_s1 + $0xbc8] sm:$0xff]  ;;  %v3573_v35 = vcombine.low %v351_v20, %v355_v21 }
  0x74   :  { %v475_v31 = vld [vmem:[%s5250_s1 + $0xbe8] sm:$0xff] }
  0x75   :  { %2587 = vmatpush2.bf16.msra.mxu0 %v3667_v53  ;;  %v383_v53 = vld [vmem:[%s5250_s1 + $0x908] sm:$0xff] }
  0x76   :  { %2640 = vmatpush2.bf16.msra.mxu1 %v3413_v54  ;;  %2588 = vmatprep.subr.bf16.mxu0 %v3660_v55  ;;  %v387_v54 = vld [vmem:[%s5250_s1 + $0x928] sm:$0xff]  ;;  %v3485_v55 = vcombine.low %v263_v43, %v267_v44 }
  0x77   :  { %2641 = vmatprep.subr.bf16.mxu1 %v3406_v57  ;;  %v3613_v57 = vcombine.low %v391_v45, %v395_v46  ;;  %v3606_v60 = vcombine.high %v383_v53, %v387_v54  ;;  %v463_v43 = vld [vmem:[%s5250_s1 + $0xb88] sm:$0xff]  ;;  %v3693_v46 = vcombine.low %v471_v30, %v475_v31 }
  0x78   :  { %v467_v44 = vld [vmem:[%s5250_s1 + $0xba8] sm:$0xff] }
  0x79   :  { %2589 = vmatpush2.bf16.msra.mxu0 %v3659_v62  ;;  %v379_v62 = vld [vmem:[%s5250_s1 + $0x8e8] sm:$0xff] }
  0x7a   :  { %2642 = vmatpush2.bf16.msra.mxu1 %v3405_v63  ;;  %2590 = vmatprep.subr.bf16.mxu0 %v3652_v0  ;;  %v3477_v63 = vcombine.low %v255_v51, %v259_v52  ;;  %v3605_v0 = vcombine.low %v383_v53, %v387_v54  ;;  %v455_v51 = vld [vmem:[%s5250_s1 + $0xb48] sm:$0xff]  ;;  %v3685_v54 = vcombine.low %v463_v43, %v467_v44 }
  0x7b   :  { %2643 = vmatprep.subr.bf16.mxu1 %v3398_v1  ;;  %v3470_v1 = vcombine.high %v247_v56, %v251_v61  ;;  %v459_v52 = vld [vmem:[%s5250_s1 + $0xb68] sm:$0xff] }
  0x7d   :  { %2591 = vmatpush2.bf16.msra.mxu0 %v3651_v6  ;;  %v3469_v6 = vcombine.low %v247_v56, %v251_v61  ;;  %v447_v56 = vld [vmem:[%s5250_s1 + $0xb08] sm:$0xff] }
  0x7e   :  { %2644 = vmatpush2.bf16.msra.mxu1 %v3397_v7  ;;  %2592 = vmatprep.subr.bf16.mxu0 %v3644_v8  ;;  %v3462_v8 = vcombine.high %v239_v3, %v243_v4  ;;  %v451_v61 = vld [vmem:[%s5250_s1 + $0xb28] sm:$0xff] }
  0x7f   :  { %2645 = vmatprep.subr.bf16.mxu1 %v3390_v9  ;;  %v439_v3 = vld [vmem:[%s5250_s1 + $0xac8] sm:$0xff] }
  0x80   :  { %v443_v4 = vld [vmem:[%s5250_s1 + $0xae8] sm:$0xff] }
  0x81   :  { %2593 = vmatpush2.bf16.msra.mxu0 %v3643_v16 }
  0x82   :  { %2646 = vmatpush2.bf16.msra.mxu1 %v3389_v17  ;;  %2594 = vmatprep.subr.bf16.mxu0 %v3636_v18  ;;  %v223_v18 = vld [vmem:[%s5250_s1 + $0x408] sm:$0xff] }
  0x83   :  { %2647 = vmatprep.subr.bf16.mxu1 %v3382_v19  ;;  %v227_v19 = vld [vmem:[%s5250_s1 + $0x428] sm:$0xff] }
  0x84   :  { %v3445_v33 = vcombine.low %v223_v18, %v227_v19 }
  0x85   :  { %2595 = vmatpush2.bf16.msra.mxu0 %v3635_v26  ;;  %v3446_v26 = vcombine.high %v223_v18, %v227_v19  ;;  %v423_v18 = vld [vmem:[%s5250_s1 + $0xa48] sm:$0xff] }
  0x86   :  { %2648 = vmatpush2.bf16.msra.mxu1 %v3381_v27  ;;  %2670 = vmatprep.subr.bf16.mxu0 %v3502_v28  ;;  %v3574_v27 = vcombine.high %v351_v20, %v355_v21  ;;  %v343_v28 = vld [vmem:[%s5250_s1 + $0x7c8] sm:$0xff] }
  0x87   :  { %2723 = vmatprep.subr.bf16.mxu1 %v3630_v29  ;;  %v347_v29 = vld [vmem:[%s5250_s1 + $0x7e8] sm:$0xff] }
  0x88   :  { %2597 = vmatmul.mubr.bf16.vlgmr.msra.gmra.mxu0 %v4210_v32  ;;  %v3565_v45 = vcombine.low %v343_v28, %v347_v29  ;;  %v427_v19 = vld [vmem:[%s5250_s1 + $0xa68] sm:$0xff] }
  0x89   :  { %2650 = vmatmul.mubr.bf16.vlgmr.msra.gmra.mxu1 %v3975_v12  ;;  %2671 = vmatpush1.bf16.msra.mxu0 %v3501_v37  ;;  %v4247_v12 = vld [vmem:[%s5251_s0 + $0x40] ss:$24 sps:$4 sm:$0xff]   ;;  %v3566_v37 = vcombine.high %v343_v28, %v347_v29  ;;  %v415_v28 = vld [vmem:[%s5250_s1 + $0xa08] sm:$0xff] }
  0x8a   :  { %2724 = vmatpush1.bf16.msra.mxu1 %v3629_v38  ;;  %2672 = vmatprep.subr.bf16.mxu0 %v3494_v39  ;;  %v3694_v38 = vcombine.high %v471_v30, %v475_v31  ;;  %v335_v39 = vld [vmem:[%s5250_s1 + $0x788] sm:$0xff]  ;;  %v3645_v31 = vcombine.low %v423_v18, %v427_v19 }
  0x8b   :  { %2725 = vmatprep.subr.bf16.mxu1 %v3622_v40  ;;  %2606 = vmatprep.mubr.bf16.mxu0 %v4221_v41  ;;  %v339_v40 = vld [vmem:[%s5250_s1 + $0x7a8] sm:$0xff] }
  0x8c   :  { %2659 = vmatprep.mubr.bf16.mxu1 %v3997_v22  ;;  %v375_v22 = vld [vmem:[%s5250_s1 + $0x8c8] sm:$0xff]  ;;  %v3557_v53 = vcombine.low %v335_v39, %v339_v40 }
  0x8d   :  { %2673 = vmatpush1.bf16.msra.mxu0 %v3493_v47  ;;  %v3598_v2 = vcombine.high %v375_v22, %v379_v62  ;;  %v3597_v7 = vcombine.low %v375_v22, %v379_v62  ;;  %v3558_v47 = vcombine.high %v335_v39, %v339_v40  ;;  %v3677_v62 = vcombine.low %v455_v51, %v459_v52  ;;  %v419_v29 = vld [vmem:[%s5250_s1 + $0xa28] sm:$0xff]  ;;  %v280_v39 = vld [vmem:[%s5250_s1 + $0x5d0] sm:$0xff] }
  0x8e   :  { %2726 = vmatpush1.bf16.msra.mxu1 %v3621_v48  ;;  %2674 = vmatprep.subr.bf16.mxu0 %v3486_v49  ;;  %v3686_v48 = vcombine.high %v463_v43, %v467_v44  ;;  %v327_v49 = vld [vmem:[%s5250_s1 + $0x748] sm:$0xff]  ;;  %v284_v40 = vld [vmem:[%s5250_s1 + $0x5f0] sm:$0xff]  ;;  %v3637_v44 = vcombine.low %v415_v28, %v419_v29 }
  0x8f   :  { %2727 = vmatprep.subr.bf16.mxu1 %v3614_v50  ;;  %v331_v50 = vld [vmem:[%s5250_s1 + $0x768] sm:$0xff] }
  0x90   :  { %2607 = vmatmul.mubr.bf16.gmra.mxu0 %v4247_v12  ;;  %v3549_v22 = vcombine.low %v327_v49, %v331_v50 }
  0x91   :  { %2675 = vmatpush1.bf16.msra.mxu0 %v3485_v55  ;;  %2660 = vmatmul.mubr.bf16.gmra.mxu1 %v4029_v34  ;;  %v367_v34 = vld [vmem:[%s5250_s1 + $0x888] sm:$0xff]  ;;  %v3550_v55 = vcombine.high %v327_v49, %v331_v50  ;;  %v272_v49 = vld [vmem:[%s5250_s1 + $0x590] sm:$0xff] }
  0x92   :  { %2728 = vmatpush1.bf16.msra.mxu1 %v3613_v57  ;;  %2676 = vmatprep.subr.bf16.mxu0 %v3478_v58  ;;  %v3590_v9 = vcombine.high %v367_v34, %v371_v5  ;;  %v3589_v14 = vcombine.low %v367_v34, %v371_v5  ;;  %v3678_v57 = vcombine.high %v455_v51, %v459_v52  ;;  %v319_v58 = vld [vmem:[%s5250_s1 + $0x708] sm:$0xff]  ;;  %v276_v50 = vld [vmem:[%s5250_s1 + $0x5b0] sm:$0xff] }
  0x93   :  { %2729 = vmatprep.subr.bf16.mxu1 %v3606_v60  ;;  %2702 = vmatprep.mubr.bf16.mxu0 %v3854_v59  ;;  %v231_v59 = vld [vmem:[%s5250_s1 + $0x448] sm:$0xff]  ;;  %v3669_v5 = vcombine.low %v447_v56, %v451_v61  ;;  %v3503_v52 = vcombine.low %v280_v39, %v284_v40 }
  0x94   :  { %2755 = vmatprep.mubr.bf16.mxu1 %v4045_v42  ;;  %v359_v42 = vld [vmem:[%s5250_s1 + $0x848] sm:$0xff]  ;;  %v3454_v16 = vcombine.high %v231_v59, %v235_v10  ;;  %v3453_v23 = vcombine.low %v231_v59, %v235_v10 }
  0x95   :  { %2677 = vmatpush1.bf16.msra.mxu0 %v3477_v63  ;;  %v3582_v17 = vcombine.high %v359_v42, %v363_v11  ;;  %v3581_v24 = vcombine.low %v359_v42, %v363_v11  ;;  %v323_v60 = vld [vmem:[%s5250_s1 + $0x728] sm:$0xff]  ;;  %v3661_v11 = vcombine.low %v439_v3, %v443_v4 }
  0x96   :  { %2730 = vmatpush1.bf16.msra.mxu1 %v3605_v0  ;;  %2678 = vmatprep.subr.bf16.mxu0 %v3470_v1  ;;  %v3542_v63 = vcombine.high %v319_v58, %v323_v60  ;;  %v3670_v0 = vcombine.high %v447_v56, %v451_v61  ;;  %v311_v1 = vld [vmem:[%s5250_s1 + $0x6c8] sm:$0xff]  ;;  %v3541_v34 = vcombine.low %v319_v58, %v323_v60  ;;  %v264_v58 = vld [vmem:[%s5250_s1 + $0x550] sm:$0xff] }
  0x97   :  { %2731 = vmatprep.subr.bf16.mxu1 %v3598_v2  ;;  %v315_v2 = vld [vmem:[%s5250_s1 + $0x6e8] sm:$0xff]  ;;  %v268_v60 = vld [vmem:[%s5250_s1 + $0x570] sm:$0xff]  ;;  %v3495_v61 = vcombine.low %v272_v49, %v276_v50 }
  0x98   :  { %v431_v59 = vld [vmem:[%s5250_s1 + $0xa88] sm:$0xff]  ;;  %v3533_v42 = vcombine.low %v311_v1, %v315_v2 }
  0x99   :  { %2679 = vmatpush1.bf16.msra.mxu0 %v3469_v6  ;;  %v3534_v6 = vcombine.high %v311_v1, %v315_v2  ;;  %v435_v10 = vld [vmem:[%s5250_s1 + $0xaa8] sm:$0xff]  ;;  %v3487_v1 = vcombine.low %v264_v58, %v268_v60 }
  0x9a   :  { %2732 = vmatpush1.bf16.msra.mxu1 %v3597_v7  ;;  %2680 = vmatprep.subr.bf16.mxu0 %v3462_v8  ;;  %v3662_v7 = vcombine.high %v439_v3, %v443_v4  ;;  %v303_v8 = vld [vmem:[%s5250_s1 + $0x688] sm:$0xff]  ;;  %v3653_v21 = vcombine.low %v431_v59, %v435_v10  ;;  %v124_v4 = vld [vmem:[%s5250_s1 + $0xf0] sm:$0xff] }
  0x9b   :  { %2733 = vmatprep.subr.bf16.mxu1 %v3590_v9  ;;  %v307_v9 = vld [vmem:[%s5250_s1 + $0x6a8] sm:$0xff] }
  0x9c   :  { %v3525_v20 = vcombine.low %v303_v8, %v307_v9 }
  0x9d   :  { %2681 = vmatpush1.bf16.msra.mxu0 %v3461_v13  ;;  %v3526_v13 = vcombine.high %v303_v8, %v307_v9 }
  0x9e   :  { %2734 = vmatpush1.bf16.msra.mxu1 %v3589_v14  ;;  %2682 = vmatprep.subr.bf16.mxu0 %v3454_v16  ;;  %v3654_v14 = vcombine.high %v431_v59, %v435_v10  ;;  %v295_v16 = vld [vmem:[%s5250_s1 + $0x648] sm:$0xff]  ;;  %v116_v59 = vld [vmem:[%s5250_s1 + $0xb0] sm:$0xff]  ;;  %v4479_v10 = vld [vmem:[%s5251_s0 + $0x4] ss:$24 sps:$4 sm:$0xff]  }
  0x9f   :  { %2735 = vmatprep.subr.bf16.mxu1 %v3582_v17  ;;  %v299_v17 = vld [vmem:[%s5250_s1 + $0x668] sm:$0xff] }
  0xa0   :  { %v3517_v30 = vcombine.low %v295_v16, %v299_v17 }
  0xa1   :  { %2683 = vmatpush1.bf16.msra.mxu0 %v3453_v23  ;;  %v3518_v23 = vcombine.high %v295_v16, %v299_v17 }
  0xa2   :  { %2736 = vmatpush1.bf16.msra.mxu1 %v3581_v24  ;;  %2684 = vmatprep.subr.bf16.mxu0 %v3446_v26  ;;  %v3646_v24 = vcombine.high %v423_v18, %v427_v19  ;;  %v287_v26 = vld [vmem:[%s5250_s1 + $0x608] sm:$0xff]  ;;  %v104_v18 = vld [vmem:[%s5250_s1 + $0x50] sm:$0xff] }
  0xa3   :  { %2737 = vmatprep.subr.bf16.mxu1 %v3574_v27  ;;  %v291_v27 = vld [vmem:[%s5250_s1 + $0x628] sm:$0xff]  ;;  %v108_v19 = vld [vmem:[%s5250_s1 + $0x70] sm:$0xff] }
  0xa4   :  { %v3509_v43 = vcombine.low %v287_v26, %v291_v27 }
  0xa5   :  { %2685 = vmatpush1.bf16.msra.mxu0 %v3445_v33  ;;  %v3510_v33 = vcombine.high %v287_v26, %v291_v27  ;;  %v3328_v26 = vcombine.high %v104_v18, %v108_v19 }
  0xa6   :  { %2738 = vmatpush1.bf16.msra.mxu1 %v3573_v35  ;;  %2686 = vmatprep.subr.bf16.mxu0 %v3566_v37  ;;  %v3638_v35 = vcombine.high %v415_v28, %v419_v29  ;;  %v152_v37 = vld [vmem:[%s5250_s1 + $0x1d0] sm:$0xff] }
  0xa7   :  { %2739 = vmatprep.subr.bf16.mxu1 %v3694_v38  ;;  %v156_v38 = vld [vmem:[%s5250_s1 + $0x1f0] sm:$0xff] }
  0xa8   :  { %v3375_v51 = vcombine.low %v152_v37, %v156_v38  ;;  %v96_v28 = vld [vmem:[%s5250_s1 + $0x10] sm:$0xff] }
  0xa9   :  { %2687 = vmatpush2.bf16.msra.mxu0 %v3565_v45  ;;  %v3376_v45 = vcombine.high %v152_v37, %v156_v38  ;;  %v100_v29 = vld [vmem:[%s5250_s1 + $0x30] sm:$0xff] }
  0xaa   :  { %2740 = vmatpush2.bf16.msra.mxu1 %v3693_v46  ;;  %2688 = vmatprep.subr.bf16.mxu0 %v3558_v47  ;;  %v3504_v46 = vcombine.high %v280_v39, %v284_v40  ;;  %v144_v47 = vld [vmem:[%s5250_s1 + $0x190] sm:$0xff]  ;;  %v3320_v37 = vcombine.high %v96_v28, %v100_v29 }
  0xab   :  { %2741 = vmatprep.subr.bf16.mxu1 %v3686_v48  ;;  %v148_v48 = vld [vmem:[%s5250_s1 + $0x1b0] sm:$0xff] }
  0xac   :  { %v3367_v56 = vcombine.low %v144_v47, %v148_v48  ;;  %v216_v39 = vld [vmem:[%s5250_s1 + $0x3d0] sm:$0xff] }
  0xad   :  { %2689 = vmatpush2.bf16.msra.mxu0 %v3557_v53  ;;  %v3368_v53 = vcombine.high %v144_v47, %v148_v48  ;;  %v220_v40 = vld [vmem:[%s5250_s1 + $0x3f0] sm:$0xff] }
  0xae   :  { %2742 = vmatpush2.bf16.msra.mxu1 %v3685_v54  ;;  %2690 = vmatprep.subr.bf16.mxu0 %v3550_v55  ;;  %v3496_v54 = vcombine.high %v272_v49, %v276_v50  ;;  %v136_v55 = vld [vmem:[%s5250_s1 + $0x150] sm:$0xff]  ;;  %v3440_v47 = vcombine.high %v216_v39, %v220_v40 }
  0xaf   :  { %2743 = vmatprep.subr.bf16.mxu1 %v3678_v57  ;;  %v140_v57 = vld [vmem:[%s5250_s1 + $0x170] sm:$0xff] }
  0xb0   :  { %v208_v49 = vld [vmem:[%s5250_s1 + $0x390] sm:$0xff] }
  0xb1   :  { %2691 = vmatpush2.bf16.msra.mxu0 %v3549_v22  ;;  %v3360_v22 = vcombine.high %v136_v55, %v140_v57  ;;  %v212_v50 = vld [vmem:[%s5250_s1 + $0x3b0] sm:$0xff] }
  0xb2   :  { %2744 = vmatpush2.bf16.msra.mxu1 %v3677_v62  ;;  %2692 = vmatprep.subr.bf16.mxu0 %v3542_v63  ;;  %v128_v62 = vld [vmem:[%s5250_s1 + $0x110] sm:$0xff] }
  0xb3   :  { %2745 = vmatprep.subr.bf16.mxu1 %v3670_v0  ;;  %v132_v63 = vld [vmem:[%s5250_s1 + $0x130] sm:$0xff] }
  0xb4   :  { %v260_v0 = vld [vmem:[%s5250_s1 + $0x530] sm:$0xff]  ;;  %v3352_v2 = vcombine.high %v128_v62, %v132_v63 }
  0xb5   :  { %2693 = vmatpush2.bf16.msra.mxu0 %v3541_v34  ;;  %v248_v34 = vld [vmem:[%s5250_s1 + $0x4d0] sm:$0xff] }
  0xb6   :  { %2746 = vmatpush2.bf16.msra.mxu1 %v3669_v5  ;;  %2694 = vmatprep.subr.bf16.mxu0 %v3534_v6  ;;  %v252_v5 = vld [vmem:[%s5250_s1 + $0x4f0] sm:$0xff]  ;;  %v3351_v6 = vcombine.low %v128_v62, %v132_v63 }
  0xb7   :  { %2747 = vmatprep.subr.bf16.mxu1 %v3662_v7  ;;  %v3472_v9 = vcombine.high %v248_v34, %v252_v5 }
  0xb9   :  { %2695 = vmatpush2.bf16.msra.mxu0 %v3533_v42  ;;  %v244_v42 = vld [vmem:[%s5250_s1 + $0x4b0] sm:$0xff] }
  0xba   :  { %2748 = vmatpush2.bf16.msra.mxu1 %v3661_v11  ;;  %2696 = vmatprep.subr.bf16.mxu0 %v3526_v13  ;;  %v4491_v11 = vld [vmem:[%s5251_s0 + $0xc] ss:$24 sps:$4 sm:$0xff]  }
  0xbb   :  { %2749 = vmatprep.subr.bf16.mxu1 %v3654_v14  ;;  %v3471_v14 = vcombine.low %v248_v34, %v252_v5  ;;  %v184_v34 = vld [vmem:[%s5250_s1 + $0x2d0] sm:$0xff] }
  0xbc   :  { %v188_v5 = vld [vmem:[%s5250_s1 + $0x2f0] sm:$0xff] }
  0xbd   :  { %2697 = vmatpush2.bf16.msra.mxu0 %v3525_v20  ;;  %v232_v20 = vld [vmem:[%s5250_s1 + $0x450] sm:$0xff] }
  0xbe   :  { %2750 = vmatpush2.bf16.msra.mxu1 %v3653_v21  ;;  %2698 = vmatprep.subr.bf16.mxu0 %v3518_v23  ;;  %v236_v21 = vld [vmem:[%s5250_s1 + $0x470] sm:$0xff] }
  0xbf   :  { %2751 = vmatprep.subr.bf16.mxu1 %v3646_v24  ;;  %v3456_v27 = vcombine.high %v232_v20, %v236_v21 }
  0xc1   :  { %2699 = vmatpush2.bf16.msra.mxu0 %v3517_v30  ;;  %v224_v30 = vld [vmem:[%s5250_s1 + $0x410] sm:$0xff] }
  0xc2   :  { %2752 = vmatpush2.bf16.msra.mxu1 %v3645_v31  ;;  %2700 = vmatprep.subr.bf16.mxu0 %v3510_v33  ;;  %v228_v31 = vld [vmem:[%s5250_s1 + $0x430] sm:$0xff]  ;;  %v3327_v33 = vcombine.low %v104_v18, %v108_v19 }
  0xc3   :  { %2753 = vmatprep.subr.bf16.mxu1 %v3638_v35  ;;  %v3455_v35 = vcombine.low %v232_v20, %v236_v21  ;;  %v3448_v38 = vcombine.high %v224_v30, %v228_v31  ;;  %v168_v20 = vld [vmem:[%s5250_s1 + $0x250] sm:$0xff] }
  0xc4   :  { %v172_v21 = vld [vmem:[%s5250_s1 + $0x270] sm:$0xff] }
  0xc5   :  { %2701 = vmatpush2.bf16.msra.mxu0 %v3509_v43  ;;  %v344_v43 = vld [vmem:[%s5250_s1 + $0x7d0] sm:$0xff] }
  0xc6   :  { %2754 = vmatpush2.bf16.msra.mxu1 %v3637_v44  ;;  %2776 = vmatprep.subr.bf16.mxu0 %v3376_v45  ;;  %v348_v44 = vld [vmem:[%s5250_s1 + $0x7f0] sm:$0xff]  ;;  %v3319_v45 = vcombine.low %v96_v28, %v100_v29  ;;  %v3392_v28 = vcombine.high %v168_v20, %v172_v21 }
  0xc7   :  { %2829 = vmatprep.subr.bf16.mxu1 %v3504_v46  ;;  %v3447_v46 = vcombine.low %v224_v30, %v228_v31  ;;  %v3568_v48 = vcombine.high %v344_v43, %v348_v44  ;;  %v160_v30 = vld [vmem:[%s5250_s1 + $0x210] sm:$0xff] }
  0xc8   :  { %2703 = vmatmul.mubr.bf16.vlgmr.msra.gmra.mxu0 %v3986_v15  ;;  %v3488_v15 = vcombine.high %v264_v58, %v268_v60  ;;  %v200_v58 = vld [vmem:[%s5250_s1 + $0x350] sm:$0xff] }
  0xc9   :  { %2756 = vmatmul.mubr.bf16.vlgmr.msra.gmra.mxu1 %v4210_v32  ;;  %2777 = vmatpush1.bf16.msra.mxu0 %v3375_v51  ;;  %v256_v32 = vld [vmem:[%s5250_s1 + $0x510] sm:$0xff] }
  0xca   :  { %2830 = vmatpush1.bf16.msra.mxu1 %v3503_v52  ;;  %2778 = vmatprep.subr.bf16.mxu0 %v3368_v53  ;;  %v3480_v3 = vcombine.high %v256_v32, %v260_v0  ;;  %v3479_v7 = vcombine.low %v256_v32, %v260_v0  ;;  %v336_v51 = vld [vmem:[%s5250_s1 + $0x790] sm:$0xff]  ;;  %v3439_v53 = vcombine.low %v216_v39, %v220_v40 }
  0xcb   :  { %2831 = vmatprep.subr.bf16.mxu1 %v3496_v54  ;;  %2712 = vmatprep.mubr.bf16.mxu0 %v4009_v25  ;;  %v3359_v25 = vcombine.low %v136_v55, %v140_v57  ;;  %v340_v52 = vld [vmem:[%s5250_s1 + $0x7b0] sm:$0xff]  ;;  %v3567_v54 = vcombine.low %v344_v43, %v348_v44  ;;  %v3432_v55 = vcombine.high %v208_v49, %v212_v50 }
  0xcc   :  { %2765 = vmatprep.mubr.bf16.mxu1 %v4221_v41  ;;  %v120_v41 = vld [vmem:[%s5250_s1 + $0xd0] sm:$0xff]  ;;  %v3560_v57 = vcombine.high %v336_v51, %v340_v52 }
  0xcd   :  { %2779 = vmatpush1.bf16.msra.mxu0 %v3367_v56  ;;  %v3344_v8 = vcombine.high %v120_v41, %v124_v4  ;;  %v3343_v13 = vcombine.low %v120_v41, %v124_v4  ;;  %v204_v60 = vld [vmem:[%s5250_s1 + $0x370] sm:$0xff] }
  0xce   :  { %2832 = vmatpush1.bf16.msra.mxu1 %v3495_v61  ;;  %2780 = vmatprep.subr.bf16.mxu0 %v3360_v22  ;;  %v328_v56 = vld [vmem:[%s5250_s1 + $0x750] sm:$0xff]  ;;  %v3431_v22 = vcombine.low %v208_v49, %v212_v50  ;;  %v3424_v62 = vcombine.high %v200_v58, %v204_v60 }
  0xcf   :  { %2833 = vmatprep.subr.bf16.mxu1 %v3488_v15  ;;  %v332_v61 = vld [vmem:[%s5250_s1 + $0x770] sm:$0xff]  ;;  %v3559_v15 = vcombine.low %v336_v51, %v340_v52 }
  0xd0   :  { %2713 = vmatmul.mubr.bf16.gmra.mxu0 %v4034_v36  ;;  %v112_v36 = vld [vmem:[%s5250_s1 + $0x90] sm:$0xff]  ;;  %v3552_v63 = vcombine.high %v328_v56, %v332_v61 }
  0xd1   :  { %2781 = vmatpush1.bf16.msra.mxu0 %v3359_v25  ;;  %2766 = vmatmul.mubr.bf16.gmra.mxu1 %v4247_v12  ;;  %v240_v12 = vld [vmem:[%s5250_s1 + $0x490] sm:$0xff]  ;;  %v3336_v16 = vcombine.high %v112_v36, %v116_v59  ;;  %v3335_v23 = vcombine.low %v112_v36, %v116_v59  ;;  %v3408_v36 = vcombine.high %v184_v34, %v188_v5 }
  0xd2   :  { %2834 = vmatpush1.bf16.msra.mxu1 %v3487_v1  ;;  %2782 = vmatprep.subr.bf16.mxu0 %v3352_v2  ;;  %v3464_v17 = vcombine.high %v240_v12, %v244_v42  ;;  %v3463_v24 = vcombine.low %v240_v12, %v244_v42  ;;  %v192_v32 = vld [vmem:[%s5250_s1 + $0x310] sm:$0xff]  ;;  %v3423_v2 = vcombine.low %v200_v58, %v204_v60 }
  0xd3   :  { %2835 = vmatprep.subr.bf16.mxu1 %v3480_v3  ;;  %2808 = vmatprep.mubr.bf16.mxu0 %v4479_v10  ;;  %v196_v0 = vld [vmem:[%s5250_s1 + $0x330] sm:$0xff]  ;;  %v3551_v3 = vcombine.low %v328_v56, %v332_v61 }
  0xd4   :  { %2861 = vmatprep.mubr.bf16.mxu1 %v4491_v11  ;;  %v320_v25 = vld [vmem:[%s5250_s1 + $0x710] sm:$0xff]  ;;  %v3416_v41 = vcombine.high %v192_v32, %v196_v0 }
  0xd5   :  { %2783 = vmatpush1.bf16.msra.mxu0 %v3351_v6  ;;  %v324_v1 = vld [vmem:[%s5250_s1 + $0x730] sm:$0xff] }
  0xd6   :  { %2836 = vmatpush1.bf16.msra.mxu1 %v3479_v7  ;;  %2784 = vmatprep.subr.bf16.mxu0 %v3344_v8  ;;  %v3544_v4 = vcombine.high %v320_v25, %v324_v1  ;;  %v312_v6 = vld [vmem:[%s5250_s1 + $0x6d0] sm:$0xff]  ;;  %v3415_v8 = vcombine.low %v192_v32, %v196_v0 }
  0xd7   :  { %2837 = vmatprep.subr.bf16.mxu1 %v3472_v9  ;;  %v316_v7 = vld [vmem:[%s5250_s1 + $0x6f0] sm:$0xff]  ;;  %v3543_v9 = vcombine.low %v320_v25, %v324_v1 }
  0xd8   :  { %v3536_v59 = vcombine.high %v312_v6, %v316_v7  ;;  %v176_v12 = vld [vmem:[%s5250_s1 + $0x290] sm:$0xff] }
  0xd9   :  { %2785 = vmatpush1.bf16.msra.mxu0 %v3343_v13  ;;  %v180_v42 = vld [vmem:[%s5250_s1 + $0x2b0] sm:$0xff] }
  0xda   :  { %2838 = vmatpush1.bf16.msra.mxu1 %v3471_v14  ;;  %2786 = vmatprep.subr.bf16.mxu0 %v3336_v16  ;;  %v304_v13 = vld [vmem:[%s5250_s1 + $0x690] sm:$0xff]  ;;  %v3407_v16 = vcombine.low %v184_v34, %v188_v5  ;;  %v3400_v18 = vcombine.high %v176_v12, %v180_v42  ;;  %v133_v34 = vld [vmem:[%s5250_s1 + $0x138] sm:$0xff] }
  0xdb   :  { %2839 = vmatprep.subr.bf16.mxu1 %v3464_v17  ;;  %v308_v14 = vld [vmem:[%s5250_s1 + $0x6b0] sm:$0xff]  ;;  %v3535_v17 = vcombine.low %v312_v6, %v316_v7 }
  0xdc   :  { %v3528_v19 = vcombine.high %v304_v13, %v308_v14  ;;  %v164_v31 = vld [vmem:[%s5250_s1 + $0x230] sm:$0xff] }
  0xdd   :  { %2787 = vmatpush1.bf16.msra.mxu0 %v3335_v23  ;;  %v296_v23 = vld [vmem:[%s5250_s1 + $0x650] sm:$0xff]  ;;  %v3384_v39 = vcombine.high %v160_v30, %v164_v31 }
  0xde   :  { %2840 = vmatpush1.bf16.msra.mxu1 %v3463_v24  ;;  %2788 = vmatprep.subr.bf16.mxu0 %v3328_v26  ;;  %v300_v24 = vld [vmem:[%s5250_s1 + $0x670] sm:$0xff]  ;;  %v3399_v26 = vcombine.low %v176_v12, %v180_v42  ;;  %v121_v12 = vld [vmem:[%s5250_s1 + $0xd8] sm:$0xff] }
  0xdf   :  { %2841 = vmatprep.subr.bf16.mxu1 %v3456_v27  ;;  %v3527_v27 = vcombine.low %v304_v13, %v308_v14  ;;  %v3520_v29 = vcombine.high %v296_v23, %v300_v24  ;;  %v408_v43 = vld [vmem:[%s5250_s1 + $0x9d0] sm:$0xff]  ;;  %v125_v42 = vld [vmem:[%s5250_s1 + $0xf8] sm:$0xff] }
  0xe0   :  { %v412_v44 = vld [vmem:[%s5250_s1 + $0x9f0] sm:$0xff] }
  0xe1   :  { %2789 = vmatpush1.bf16.msra.mxu0 %v3327_v33  ;;  %v288_v33 = vld [vmem:[%s5250_s1 + $0x610] sm:$0xff]  ;;  %v3632_v49 = vcombine.high %v408_v43, %v412_v44 }
  0xe2   :  { %2842 = vmatpush1.bf16.msra.mxu1 %v3455_v35  ;;  %2790 = vmatprep.subr.bf16.mxu0 %v3320_v37  ;;  %v292_v35 = vld [vmem:[%s5250_s1 + $0x630] sm:$0xff]  ;;  %v3391_v37 = vcombine.low %v168_v20, %v172_v21 }
  0xe3   :  { %2843 = vmatprep.subr.bf16.mxu1 %v3448_v38  ;;  %v3519_v38 = vcombine.low %v296_v23, %v300_v24  ;;  %v3512_v40 = vcombine.high %v288_v33, %v292_v35  ;;  %v400_v51 = vld [vmem:[%s5250_s1 + $0x990] sm:$0xff]  ;;  %v113_v24 = vld [vmem:[%s5250_s1 + $0x98] sm:$0xff] }
  0xe4   :  { %v404_v52 = vld [vmem:[%s5250_s1 + $0x9b0] sm:$0xff] }
  0xe5   :  { %2791 = vmatpush1.bf16.msra.mxu0 %v3319_v45  ;;  %v153_v45 = vld [vmem:[%s5250_s1 + $0x1d8] sm:$0xff]  ;;  %v3624_v58 = vcombine.high %v400_v51, %v404_v52  ;;  %v392_v56 = vld [vmem:[%s5250_s1 + $0x950] sm:$0xff]  ;;  %v3623_v32 = vcombine.low %v400_v51, %v404_v52 }
  0xe6   :  { %2844 = vmatpush1.bf16.msra.mxu1 %v3447_v46  ;;  %2792 = vmatprep.subr.bf16.mxu0 %v3440_v47  ;;  %v157_v46 = vld [vmem:[%s5250_s1 + $0x1f8] sm:$0xff]  ;;  %v3383_v47 = vcombine.low %v160_v30, %v164_v31  ;;  %v396_v61 = vld [vmem:[%s5250_s1 + $0x970] sm:$0xff] }
  0xe7   :  { %2845 = vmatprep.subr.bf16.mxu1 %v3568_v48  ;;  %v3511_v48 = vcombine.low %v288_v33, %v292_v35  ;;  %v3378_v50 = vcombine.high %v153_v45, %v157_v46  ;;  %v3616_v25 = vcombine.high %v392_v56, %v396_v61  ;;  %v4683_v5 = vld [vmem:[%s5251_s0 + $0x3c] ss:$24 sps:$4 sm:$0xff]   ;;  %v3615_v6 = vcombine.low %v392_v56, %v396_v61  ;;  %v4701_v13 = vld [vmem:[%s5251_s0 + $0x30] ss:$24 sps:$4 sm:$0xff]  }
  0xe8   :  { %v368_v20 = vld [vmem:[%s5250_s1 + $0x890] sm:$0xff]  ;;  %v109_v35 = vld [vmem:[%s5250_s1 + $0x78] sm:$0xff] }
  0xe9   :  { %2793 = vmatpush2.bf16.msra.mxu0 %v3439_v53  ;;  %v145_v53 = vld [vmem:[%s5250_s1 + $0x198] sm:$0xff]  ;;  %v372_v21 = vld [vmem:[%s5250_s1 + $0x8b0] sm:$0xff] }
  0xea   :  { %2846 = vmatpush2.bf16.msra.mxu1 %v3567_v54  ;;  %2794 = vmatprep.subr.bf16.mxu0 %v3432_v55  ;;  %v149_v54 = vld [vmem:[%s5250_s1 + $0x1b8] sm:$0xff]  ;;  %v3631_v55 = vcombine.low %v408_v43, %v412_v44  ;;  %v4719_v23 = vld [vmem:[%s5251_s0 + $0x14] ss:$24 sps:$4 sm:$0xff]  }
  0xeb   :  { %2847 = vmatprep.subr.bf16.mxu1 %v3560_v57  ;;  %v3377_v57 = vcombine.low %v153_v45, %v157_v46  ;;  %v3370_v60 = vcombine.high %v145_v53, %v149_v54  ;;  %v3369_v0 = vcombine.low %v145_v53, %v149_v54  ;;  %v360_v31 = vld [vmem:[%s5250_s1 + $0x850] sm:$0xff]  ;;  %v97_v45 = vld [vmem:[%s5250_s1 + $0x18] sm:$0xff] }
  0xec   :  { %v364_v33 = vld [vmem:[%s5250_s1 + $0x870] sm:$0xff]  ;;  %v101_v46 = vld [vmem:[%s5250_s1 + $0x38] sm:$0xff] }
  0xed   :  { %2795 = vmatpush2.bf16.msra.mxu0 %v3431_v22  ;;  %v4647_v22 = vld [vmem:[%s5251_s0] ss:$24 sps:$4 sm:$0xff]   ;;  %v352_v43 = vld [vmem:[%s5250_s1 + $0x810] sm:$0xff] }
  0xee   :  { %2848 = vmatpush2.bf16.msra.mxu1 %v3559_v15  ;;  %2796 = vmatprep.subr.bf16.mxu0 %v3424_v62  ;;  %v137_v15 = vld [vmem:[%s5250_s1 + $0x158] sm:$0xff]  ;;  %v356_v44 = vld [vmem:[%s5250_s1 + $0x830] sm:$0xff] }
  0xef   :  { %2849 = vmatprep.subr.bf16.mxu1 %v3552_v63  ;;  %v141_v62 = vld [vmem:[%s5250_s1 + $0x178] sm:$0xff]  ;;  %v4659_v63 = vld [vmem:[%s5251_s0 + $0x8] ss:$24 sps:$4 sm:$0xff]   ;;  %v472_v51 = vld [vmem:[%s5250_s1 + $0xbd0] sm:$0xff] }
  0xf0   :  { %v3362_v1 = vcombine.high %v137_v15, %v141_v62  ;;  %v3361_v7 = vcombine.low %v137_v15, %v141_v62  ;;  %v476_v52 = vld [vmem:[%s5250_s1 + $0xbf0] sm:$0xff]  ;;  %v217_v53 = vld [vmem:[%s5250_s1 + $0x3d8] sm:$0xff] }
  0xf1   :  { %2797 = vmatpush2.bf16.msra.mxu0 %v3423_v2  ;;  %v384_v2 = vld [vmem:[%s5250_s1 + $0x910] sm:$0xff]  ;;  %v221_v54 = vld [vmem:[%s5250_s1 + $0x3f8] sm:$0xff] }
  0xf2   :  { %2850 = vmatpush2.bf16.msra.mxu1 %v3551_v3  ;;  %2798 = vmatprep.subr.bf16.mxu0 %v3416_v41  ;;  %v388_v3 = vld [vmem:[%s5250_s1 + $0x930] sm:$0xff]  ;;  %v209_v15 = vld [vmem:[%s5250_s1 + $0x398] sm:$0xff] }
  0xf3   :  { %2851 = vmatprep.subr.bf16.mxu1 %v3544_v4  ;;  %v4671_v41 = vld [vmem:[%s5251_s0 + $0x34] ss:$24 sps:$4 sm:$0xff]   ;;  %v129_v4 = vld [vmem:[%s5250_s1 + $0x118] sm:$0xff]  ;;  %v3607_v14 = vcombine.low %v384_v2, %v388_v3 }
  0xf4   :  { %v464_v56 = vld [vmem:[%s5250_s1 + $0xb90] sm:$0xff]  ;;  %v213_v62 = vld [vmem:[%s5250_s1 + $0x3b8] sm:$0xff] }
  0xf5   :  { %2799 = vmatpush2.bf16.msra.mxu0 %v3415_v8  ;;  %v3608_v8 = vcombine.high %v384_v2, %v388_v3  ;;  %v468_v61 = vld [vmem:[%s5250_s1 + $0xbb0] sm:$0xff] }
  0xf6   :  { %2852 = vmatpush2.bf16.msra.mxu1 %v3543_v9  ;;  %2800 = vmatprep.subr.bf16.mxu0 %v3408_v36  ;;  %v3354_v9 = vcombine.high %v129_v4, %v133_v34  ;;  %v376_v36 = vld [vmem:[%s5250_s1 + $0x8d0] sm:$0xff] }
  0xf7   :  { %2853 = vmatprep.subr.bf16.mxu1 %v3536_v59  ;;  %v380_v59 = vld [vmem:[%s5250_s1 + $0x8f0] sm:$0xff] }
  0xf8   :  { %v456_v2 = vld [vmem:[%s5250_s1 + $0xb50] sm:$0xff] }
  0xf9   :  { %2801 = vmatpush2.bf16.msra.mxu0 %v3407_v16  ;;  %v4707_v16 = vld [vmem:[%s5251_s0 + $0x38] ss:$24 sps:$4 sm:$0xff]  }
  0xfa   :  { %2854 = vmatpush2.bf16.msra.mxu1 %v3535_v17  ;;  %2802 = vmatprep.subr.bf16.mxu0 %v3400_v18  ;;  %v3353_v17 = vcombine.low %v129_v4, %v133_v34  ;;  %v3600_v18 = vcombine.high %v376_v36, %v380_v59  ;;  %v460_v3 = vld [vmem:[%s5250_s1 + $0xb70] sm:$0xff]  ;;  %v201_v4 = vld [vmem:[%s5250_s1 + $0x358] sm:$0xff] }
  0xfb   :  { %2855 = vmatprep.subr.bf16.mxu1 %v3528_v19  ;;  %v3346_v19 = vcombine.high %v121_v12, %v125_v42  ;;  %v205_v34 = vld [vmem:[%s5250_s1 + $0x378] sm:$0xff] }
  0xfd   :  { %2803 = vmatpush2.bf16.msra.mxu0 %v3399_v26  ;;  %v117_v26 = vld [vmem:[%s5250_s1 + $0xb8] sm:$0xff] }
  0xfe   :  { %2856 = vmatpush2.bf16.msra.mxu1 %v3527_v27  ;;  %2804 = vmatprep.subr.bf16.mxu0 %v3392_v28  ;;  %v3599_v27 = vcombine.low %v376_v36, %v380_v59  ;;  %v3345_v28 = vcombine.low %v121_v12, %v125_v42  ;;  %v3338_v30 = vcombine.high %v113_v24, %v117_v26  ;;  %v448_v36 = vld [vmem:[%s5250_s1 + $0xb10] sm:$0xff]  ;;  %v193_v42 = vld [vmem:[%s5250_s1 + $0x318] sm:$0xff] }
  0xff   :  { %2857 = vmatprep.subr.bf16.mxu1 %v3520_v29  ;;  %v3592_v29 = vcombine.high %v368_v20, %v372_v21  ;;  %v452_v59 = vld [vmem:[%s5250_s1 + $0xb30] sm:$0xff] }
 0x101   :  { %2805 = vmatpush2.bf16.msra.mxu0 %v3391_v37  ;;  %v3591_v37 = vcombine.low %v368_v20, %v372_v21  ;;  %v440_v21 = vld [vmem:[%s5250_s1 + $0xad0] sm:$0xff] }
 0x102   :  { %2858 = vmatpush2.bf16.msra.mxu1 %v3519_v38  ;;  %2806 = vmatprep.subr.bf16.mxu0 %v3384_v39  ;;  %v3337_v38 = vcombine.low %v113_v24, %v117_v26  ;;  %v3584_v39 = vcombine.high %v360_v31, %v364_v33  ;;  %v444_v24 = vld [vmem:[%s5250_s1 + $0xaf0] sm:$0xff] }
 0x103   :  { %2859 = vmatprep.subr.bf16.mxu1 %v3512_v40 }
 0x105   :  { %2807 = vmatpush2.bf16.msra.mxu0 %v3383_v47  ;;  %v3583_v47 = vcombine.low %v360_v31, %v364_v33  ;;  %v3664_v31 = vcombine.high %v440_v21, %v444_v24 }
 0x106   :  { %2860 = vmatpush2.bf16.msra.mxu1 %v3511_v48  ;;  %2882 = vmatprep.subr.bf16.mxu0 %v3632_v49  ;;  %v3576_v49 = vcombine.high %v352_v43, %v356_v44 }
 0x107   :  { %2935 = vmatprep.subr.bf16.mxu1 %v3378_v50  ;;  %v3322_v50 = vcombine.high %v97_v45, %v101_v46 }
 0x108   :  { %2809 = vmatmul.mubr.bf16.vlgmr.msra.gmra.mxu0 %v4647_v22  ;;  %v4795_v12 = vpop.f32.mrf.mxu0 }
 0x109   :  { %2862 = vmatmul.mubr.bf16.vlgmr.msra.gmra.mxu1 %v4659_v63  ;;  %2883 = vmatpush1.bf16.msra.mxu0 %v3631_v55  ;;  %v3575_v55 = vcombine.low %v352_v43, %v356_v44 }
 0x10a   :  { %2936 = vmatpush1.bf16.msra.mxu1 %v3377_v57  ;;  %2884 = vmatprep.subr.bf16.mxu0 %v3624_v58  ;;  %v3321_v57 = vcombine.low %v97_v45, %v101_v46  ;;  %v3696_v58 = vcombine.high %v472_v51, %v476_v52  ;;  %v4809_v26 = vpop.f32.mrf.mxu0  ;;  %v424_v46 = vld [vmem:[%s5250_s1 + $0xa50] sm:$0xff] }
 0x10b   :  { %2937 = vmatprep.subr.bf16.mxu1 %v3370_v60  ;;  %2818 = vmatprep.mubr.bf16.mxu0 %v4671_v41  ;;  %v3442_v60 = vcombine.high %v217_v53, %v221_v54 }
 0x10c   :  { %2871 = vmatprep.mubr.bf16.mxu1 %v4683_v5 }
 0x10d   :  { %2885 = vmatpush1.bf16.msra.mxu0 %v3623_v32  ;;  %v3695_v32 = vcombine.low %v472_v51, %v476_v52  ;;  %v173_v51 = vld [vmem:[%s5250_s1 + $0x278] sm:$0xff] }
 0x10e   :  { %2938 = vmatpush1.bf16.msra.mxu1 %v3369_v0  ;;  %2886 = vmatprep.subr.bf16.mxu0 %v3616_v25  ;;  %v3441_v0 = vcombine.low %v217_v53, %v221_v54  ;;  %v3688_v25 = vcombine.high %v464_v56, %v468_v61 }
 0x10f   :  { %2939 = vmatprep.subr.bf16.mxu1 %v3362_v1  ;;  %v3434_v1 = vcombine.high %v209_v15, %v213_v62 }
 0x110   :  { %2819 = vmatmul.mubr.bf16.gmra.mxu0 %v4701_v13 }
 0x111   :  { %2887 = vmatpush1.bf16.msra.mxu0 %v3615_v6  ;;  %2872 = vmatmul.mubr.bf16.gmra.mxu1 %v4707_v16  ;;  %v3687_v6 = vcombine.low %v464_v56, %v468_v61  ;;  %v161_v61 = vld [vmem:[%s5250_s1 + $0x218] sm:$0xff] }
 0x112   :  { %2940 = vmatpush1.bf16.msra.mxu1 %v3361_v7  ;;  %2888 = vmatprep.subr.bf16.mxu0 %v3608_v8  ;;  %v3433_v7 = vcombine.low %v209_v15, %v213_v62  ;;  %v3680_v8 = vcombine.high %v456_v2, %v460_v3  ;;  %v165_v15 = vld [vmem:[%s5250_s1 + $0x238] sm:$0xff]  ;;  %v3195_v62 = vlaneseq }
 0x113   :  { %2941 = vmatprep.subr.bf16.mxu1 %v3354_v9  ;;  %2914 = vmatprep.mubr.bf16.mxu0 %v4719_v23  ;;  %v3426_v9 = vcombine.high %v201_v4, %v205_v34 }
 0x114   :  { %2967 = vmatprep.mubr.bf16.mxu1 %v4479_v10  ;;  %v105_v10 = vld [vmem:[%s5250_s1 + $0x58] sm:$0xff] }
 0x115   :  { %2889 = vmatpush1.bf16.msra.mxu0 %v3607_v14  ;;  %v3330_v40 = vcombine.high %v105_v10, %v109_v35  ;;  %v3329_v48 = vcombine.low %v105_v10, %v109_v35  ;;  %v197_v14 = vld [vmem:[%s5250_s1 + $0x338] sm:$0xff]  ;;  %v432_v10 = vld [vmem:[%s5250_s1 + $0xa90] sm:$0xff] }
 0x116   :  { %2942 = vmatpush1.bf16.msra.mxu1 %v3353_v17  ;;  %2890 = vmatprep.subr.bf16.mxu0 %v3600_v18  ;;  %v3679_v17 = vcombine.low %v456_v2, %v460_v3  ;;  %v3425_v18 = vcombine.low %v201_v4, %v205_v34  ;;  %v3418_v20 = vcombine.high %v193_v42, %v197_v14  ;;  %v436_v35 = vld [vmem:[%s5250_s1 + $0xab0] sm:$0xff]  ;;  %v281_v3 = vld [vmem:[%s5250_s1 + $0x5d8] sm:$0xff] }
 0x117   :  { %2943 = vmatprep.subr.bf16.mxu1 %v3346_v19  ;;  %v3672_v19 = vcombine.high %v448_v36, %v452_v59  ;;  %v3656_v44 = vcombine.high %v432_v10, %v436_v35  ;;  %v3655_v52 = vcombine.low %v432_v10, %v436_v35  ;;  %v3386_v2 = vcombine.high %v161_v61, %v165_v15  ;;  %v285_v4 = vld [vmem:[%s5250_s1 + $0x5f8] sm:$0xff] }
 0x118   :  { %v4901_v35 = vld [vmem:[%s5250_s1 + $0x558] sm:$0xff] }
 0x119   :  { %2891 = vmatpush1.bf16.msra.mxu0 %v3599_v27  ;;  %v185_v27 = vld [vmem:[%s5250_s1 + $0x2d8] sm:$0xff] }
 0x11a   :  { %2944 = vmatpush1.bf16.msra.mxu1 %v3345_v28  ;;  %2892 = vmatprep.subr.bf16.mxu0 %v3592_v29  ;;  %v189_v28 = vld [vmem:[%s5250_s1 + $0x2f8] sm:$0xff]  ;;  %v3671_v29 = vcombine.low %v448_v36, %v452_v59  ;;  %v3385_v59 = vcombine.low %v161_v61, %v165_v15 }
 0x11b   :  { %2945 = vmatprep.subr.bf16.mxu1 %v3338_v30  ;;  %v3417_v30 = vcombine.low %v193_v42, %v197_v14  ;;  %v3410_v33 = vcombine.high %v185_v27, %v189_v28  ;;  %v3409_v43 = vcombine.low %v185_v27, %v189_v28  ;;  %v3506_v42 = vcombine.high %v281_v3, %v285_v4  ;;  %v4893_v27 = vld [vmem:[%s5252_s2] sm:$0xff]  ;;  %v261_v61 = vld [vmem:[%s5250_s1 + $0x538] sm:$0xff] }
 0x11c   :  { %v3505_v28 = vcombine.low %v281_v3, %v285_v4  ;;  %v385_v15 = vld [vmem:[%s5250_s1 + $0x918] sm:$0xff] }
 0x11d   :  { %2893 = vmatpush1.bf16.msra.mxu0 %v3591_v37  ;;  %v4823_v37 = vpop.f32.mrf.mxu0 }
 0x11e   :  { %2946 = vmatpush1.bf16.msra.mxu1 %v3337_v38  ;;  %2894 = vmatprep.subr.bf16.mxu0 %v3584_v39  ;;  %v177_v38 = vld [vmem:[%s5250_s1 + $0x298] sm:$0xff] }
 0x11f   :  { %2947 = vmatprep.subr.bf16.mxu1 %v3330_v40  ;;  %v181_v39 = vld [vmem:[%s5250_s1 + $0x2b8] sm:$0xff]  ;;  %v3663_v40 = vcombine.low %v440_v21, %v444_v24 }
 0x120   :  { %v3402_v45 = vcombine.high %v177_v38, %v181_v39  ;;  %v3401_v54 = vcombine.low %v177_v38, %v181_v39  ;;  %v401_v21 = vld [vmem:[%s5250_s1 + $0x998] sm:$0xff] }
 0x121   :  { %2895 = vmatpush1.bf16.msra.mxu0 %v3583_v47  ;;  %v428_v47 = vld [vmem:[%s5250_s1 + $0xa70] sm:$0xff]  ;;  %v405_v24 = vld [vmem:[%s5250_s1 + $0x9b8] sm:$0xff] }
 0x122   :  { %2948 = vmatpush1.bf16.msra.mxu1 %v3329_v48  ;;  %2896 = vmatprep.subr.bf16.mxu0 %v3576_v49  ;;  %v2545_v48 = vpop.f32.mrf.mxu1  ;;  %v4837_v49 = vpop.f32.mrf.mxu0  ;;  %v3626_v39 = vcombine.high %v401_v21, %v405_v24 }
 0x123   :  { %2949 = vmatprep.subr.bf16.mxu1 %v3322_v50  ;;  %v169_v50 = vld [vmem:[%s5250_s1 + $0x258] sm:$0xff]  ;;  %v2546_v38 = vadd.f32 %v2545_v48, %v4795_v12  ;;  %v4923_v12 = vld [vmem:[%s5251_s0 + $0x10] ss:$24 sps:$4 sm:$0xff]  }
 0x124   :  { %v4845_v53 = vpop.f32.mrf.mxu0  ;;  %v2547_v56 = vpop.f32.mrf.mxu1 }
 0x125   :  { %2897 = vmatpush1.bf16.msra.mxu0 %v3575_v55  ;;  %v3648_v55 = vcombine.high %v424_v46, %v428_v47  ;;  %v2548_v48 = vadd.f32 %v2547_v56, %v4809_v26  ;;  %v4937_v26 = vld [vmem:[%s5250_s1 + $0x518] sm:$0xff] }
 0x126   :  { %2950 = vmatpush1.bf16.msra.mxu1 %v3321_v57  ;;  %2898 = vmatprep.subr.bf16.mxu0 %v3696_v58  ;;  %v3394_v57 = vcombine.high %v169_v50, %v173_v51  ;;  %v416_v58 = vld [vmem:[%s5250_s1 + $0xa10] sm:$0xff]  ;;  %v2549_v34 = vpop.f32.mrf.mxu1  ;;  %v4943_v56 = vld [vmem:[%s5251_s0 + $0x44] ss:$24 sps:$4 sm:$0xff]  }
 0x127   :  { %2951 = vmatprep.subr.bf16.mxu1 %v3442_v60  ;;  %v420_v60 = vld [vmem:[%s5250_s1 + $0xa30] sm:$0xff] }
 0x129   :  { %2899 = vmatpush2.bf16.msra.mxu0 %v3695_v32  ;;  %v3647_v32 = vcombine.low %v424_v46, %v428_v47 }
 0x12a   :  { %2952 = vmatpush2.bf16.msra.mxu1 %v3441_v0  ;;  %2900 = vmatprep.subr.bf16.mxu0 %v3688_v25  ;;  %v4859_v0 = vpop.f32.mrf.mxu0  ;;  %v3393_v25 = vcombine.low %v169_v50, %v173_v51  ;;  %v3625_v51 = vcombine.low %v401_v21, %v405_v24 }
 0x12b   :  { %2953 = vmatprep.subr.bf16.mxu1 %v3434_v1  ;;  %v3640_v1 = vcombine.high %v416_v58, %v420_v60 }
 0x12c   :  { %v4875_v36 = vpop.f32.mrf.mxu0 }
 0x12d   :  { %2901 = vmatpush2.bf16.msra.mxu0 %v3687_v6  ;;  %v4867_v6 = vshrl.u32 %v3195_v62, 7 }
 0x12e   :  { %2954 = vmatpush2.bf16.msra.mxu1 %v3433_v7  ;;  %2902 = vmatprep.subr.bf16.mxu0 %v3680_v8  ;;  %v409_v7 = vld [vmem:[%s5250_s1 + $0x9d8] sm:$0xff] }
 0x12f   :  { %2955 = vmatprep.subr.bf16.mxu1 %v3426_v9  ;;  %v413_v8 = vld [vmem:[%s5250_s1 + $0x9f8] sm:$0xff]  ;;  %v3639_v9 = vcombine.low %v416_v58, %v420_v60 }
 0x130   :  { %v3634_v14 = vcombine.high %v409_v7, %v413_v8 }
 0x131   :  { %2903 = vmatpush2.bf16.msra.mxu0 %v3679_v17  ;;  %v273_v17 = vld [vmem:[%s5250_s1 + $0x598] sm:$0xff] }
 0x132   :  { %2956 = vmatpush2.bf16.msra.mxu1 %v3425_v18  ;;  %2904 = vmatprep.subr.bf16.mxu0 %v3672_v19  ;;  %v277_v18 = vld [vmem:[%s5250_s1 + $0x5b8] sm:$0xff]  ;;  %v2551_v19 = vpop.f32.mrf.mxu1 }
 0x133   :  { %2957 = vmatprep.subr.bf16.mxu1 %v3418_v20  ;;  %v3197_v20 = vsub.s32 0, %v4867_v6  ;;  %v3498_v10 = vcombine.high %v273_v17, %v277_v18  ;;  %v3497_v47 = vcombine.low %v273_v17, %v277_v18 }
 0x135   :  { %2905 = vmatpush2.bf16.msra.mxu0 %v3671_v29  ;;  %v2555_v29 = vpop.f32.mrf.mxu1  ;;  %v4918_v46 = vrot.slane %v4893_v27, %v3197_v20  ;;  %v3481_v20 = vcombine.low %v4937_v26, %v261_v61 }
 0x136   :  { %2958 = vmatpush2.bf16.msra.mxu1 %v3417_v30  ;;  %2906 = vmatprep.subr.bf16.mxu0 %v3664_v31  ;;  %v4895_v30 = vpop.f32.mrf.mxu0  ;;  %v3633_v31 = vcombine.low %v409_v7, %v413_v8  ;;  %v3482_v7 = vcombine.high %v4937_v26, %v261_v61  ;;  %v365_v26 = vld [vmem:[%s5250_s1 + $0x878] sm:$0xff] }
 0x137   :  { %2959 = vmatprep.subr.bf16.mxu1 %v3410_v33  ;;  %v3201_v33 = vsub.s32 1, %v4867_v6 }
 0x139   :  { %2907 = vmatpush2.bf16.msra.mxu0 %v3663_v40  ;;  %v269_v40 = vld [vmem:[%s5250_s1 + $0x578] sm:$0xff] }
 0x13a   :  { %2960 = vmatpush2.bf16.msra.mxu1 %v3409_v43  ;;  %2908 = vmatprep.subr.bf16.mxu0 %v3656_v44  ;;  %v4910_v43 = vld [vmem:[%s5250_s1 + $0x958] sm:$0xff] }
 0x13b   :  { %2961 = vmatprep.subr.bf16.mxu1 %v3402_v45  ;;  %v4915_v44 = vld [vmem:[%s5250_s1 + $0x978] sm:$0xff] }
 0x13c   :  { %v3618_v58 = vcombine.high %v4910_v43, %v4915_v44 }
 0x13d   :  { %2909 = vmatpush2.bf16.msra.mxu0 %v3655_v52  ;;  %v2557_v52 = vpop.f32.mrf.mxu1 }
 0x13e   :  { %2962 = vmatpush2.bf16.msra.mxu1 %v3401_v54  ;;  %2910 = vmatprep.subr.bf16.mxu0 %v3648_v55  ;;  %v4929_v55 = vrot.slane %v4893_v27, %v3201_v33  ;;  %v2558_v17 = vadd.f32 %v2557_v52, %v4859_v0 }
 0x13f   :  { %2963 = vmatprep.subr.bf16.mxu1 %v3394_v57  ;;  %v3490_v57 = vcombine.high %v4901_v35, %v269_v40  ;;  %v2559_v3 = vpop.f32.mrf.mxu1 }
 0x140   :  { %v2560_v0 = vadd.f32 %v2559_v3, %v4875_v36  ;;  %v245_v36 = vld [vmem:[%s5250_s1 + $0x4b8] sm:$0xff] }
 0x141   :  { %2911 = vmatpush2.bf16.msra.mxu0 %v3647_v32  ;;  %v3489_v32 = vcombine.low %v4901_v35, %v269_v40 }
 0x142   :  { %2964 = vmatpush2.bf16.msra.mxu1 %v3393_v25  ;;  %2912 = vmatprep.subr.bf16.mxu0 %v3640_v1  ;;  %v2552_v25 = vadd.f32 %v2551_v19, %v4837_v49  ;;  %v2556_v49 = vadd.f32 %v2555_v29, %v4845_v53  ;;  %v381_v53 = vld [vmem:[%s5250_s1 + $0x8f8] sm:$0xff]  ;;  %v2561_v29 = vpop.f32.mrf.mxu1 }
 0x143   :  { %2965 = vmatprep.subr.bf16.mxu1 %v3386_v2  ;;  %v4983_v19 = vld [vmem:[%s5251_s0 + $0x40] ss:$24 sps:$4 sm:$0xff]  }
 0x145   :  { %2913 = vmatpush2.bf16.msra.mxu0 %v3639_v9 }
 0x146   :  { %2966 = vmatpush2.bf16.msra.mxu1 %v3385_v59  ;;  %2988 = vmatprep.subr.bf16.mxu0 %v3506_v42  ;;  %v253_v42 = vld [vmem:[%s5250_s1 + $0x4f8] sm:$0xff] }
 0x147   :  { %3041 = vmatprep.subr.bf16.mxu1 %v3634_v14  ;;  %v377_v14 = vld [vmem:[%s5250_s1 + $0x8d8] sm:$0xff] }
 0x148   :  { %v2598_v45 = vpop.f32.mrf.mxu0  ;;  %2915 = vmatmul.mubr.bf16.vlgmr.msra.gmra.mxu0 %v4923_v12 }
 0x149   :  { %v2599_v50 = vadd.f32 %v2598_v45, %v2546_v38  ;;  %2968 = vmatmul.mubr.bf16.vlgmr.msra.gmra.mxu1 %v4647_v22  ;;  %2989 = vmatpush1.bf16.msra.mxu0 %v3505_v28  ;;  %v2550_v22 = vadd.f32 %v2549_v34, %v4823_v37  ;;  %v389_v37 = vld [vmem:[%s5250_s1 + $0x938] sm:$0xff]  ;;  %v3617_v34 = vcombine.low %v4910_v43, %v4915_v44 }
 0x14a   :  { %3042 = vmatpush1.bf16.msra.mxu1 %v3633_v31  ;;  %v2600_v54 = vpop.f32.mrf.mxu0  ;;  %2990 = vmatprep.subr.bf16.mxu0 %v3498_v10  ;;  %v3610_v8 = vcombine.high %v385_v15, %v389_v37  ;;  %v3609_v21 = vcombine.low %v385_v15, %v389_v37  ;;  %v3602_v10 = vcombine.high %v377_v14, %v381_v53  ;;  %v369_v43 = vld [vmem:[%s5250_s1 + $0x898] sm:$0xff] }
 0x14b   :  { %v2601_v60 = vadd.f32 %v2600_v54, %v2548_v48  ;;  %3043 = vmatprep.subr.bf16.mxu1 %v3626_v39  ;;  %2924 = vmatprep.mubr.bf16.mxu0 %v4943_v56  ;;  %v3235_v1 = vadd.f32 %v4918_v46, %v2599_v50  ;;  %v373_v44 = vld [vmem:[%s5250_s1 + $0x8b8] sm:$0xff]  ;;  %v2562_v45 = vadd.f32 %v2561_v29, %v4895_v30 }
 0x14c   :  { %v2602_v62 = vpop.f32.mrf.mxu0  ;;  %2977 = vmatprep.mubr.bf16.mxu1 %v4671_v41  ;;  %v249_v41 = vld [vmem:[%s5250_s1 + $0x4d8] sm:$0xff]  ;;  %v3601_v50 = vcombine.low %v377_v14, %v381_v53  ;;  %v3594_v52 = vcombine.high %v369_v43, %v373_v44  ;;  %v3593_v61 = vcombine.low %v369_v43, %v373_v44  ;;  %v5103_v44 = vpop.f32.mrf.mxu1 }
 0x14d   :  { %v2603_v2 = vadd.f32 %v2602_v62, %v2550_v22  ;;  %2991 = vmatpush1.bf16.msra.mxu0 %v3497_v47  ;;  %3267 = vst [vmem:[%s5253_s3] sm:$0xff] %v3235_v1  ;;  %v3236_v9 = vadd.f32 %v4929_v55, %v2601_v60  ;;  %v3474_v33 = vcombine.high %v249_v41, %v253_v42  ;;  %v233_v54 = vld [vmem:[%s5250_s1 + $0x458] sm:$0xff] }
 0x14e   :  { %3044 = vmatpush1.bf16.msra.mxu1 %v3625_v51  ;;  %v2604_v4 = vpop.f32.mrf.mxu0  ;;  %2992 = vmatprep.subr.bf16.mxu0 %v3490_v57  ;;  %v3473_v40 = vcombine.low %v249_v41, %v253_v42  ;;  %v237_v57 = vld [vmem:[%s5250_s1 + $0x478] sm:$0xff] }
 0x14f   :  { %v2605_v59 = vadd.f32 %v2604_v4, %v2552_v25  ;;  %3045 = vmatprep.subr.bf16.mxu1 %v3618_v58  ;;  %3268 = vst [vmem:[%s5253_s3 + $0x8] sm:$0xff] %v3236_v9  ;;  %v3243_v24 = vadd.f32 %v4918_v46, %v2603_v2  ;;  %v361_v58 = vld [vmem:[%s5250_s1 + $0x858] sm:$0xff]  ;;  %v3458_v15 = vcombine.high %v233_v54, %v237_v57 }
 0x150   :  { %v2608_v18 = vpop.f32.mrf.mxu0  ;;  %2925 = vmatmul.mubr.bf16.gmra.mxu0 %v4983_v19  ;;  %v3586_v62 = vcombine.high %v361_v58, %v365_v26  ;;  %v353_v25 = vld [vmem:[%s5250_s1 + $0x818] sm:$0xff]  ;;  %v3585_v2 = vcombine.low %v361_v58, %v365_v26 }
 0x151   :  { %v2609_v28 = vadd.f32 %v2608_v18, %v2556_v49  ;;  %2993 = vmatpush1.bf16.msra.mxu0 %v3489_v32  ;;  %2978 = vmatmul.mubr.bf16.gmra.mxu1 %v4701_v13  ;;  %3275 = vst [vmem:[%s5253_s3 + $0x40] sm:$0xff] %v3243_v24  ;;  %v3244_v35 = vadd.f32 %v4929_v55, %v2605_v59  ;;  %v241_v13 = vld [vmem:[%s5250_s1 + $0x498] sm:$0xff] }
 0x152   :  { %3046 = vmatpush1.bf16.msra.mxu1 %v3617_v34  ;;  %v2610_v31 = vpop.f32.mrf.mxu0  ;;  %2994 = vmatprep.subr.bf16.mxu0 %v3482_v7  ;;  %v3466_v51 = vcombine.high %v241_v13, %v245_v36  ;;  %v3465_v60 = vcombine.low %v241_v13, %v245_v36  ;;  %v225_v32 = vld [vmem:[%s5250_s1 + $0x418] sm:$0xff] }
 0x153   :  { %v2611_v38 = vadd.f32 %v2610_v31, %v2558_v17  ;;  %3047 = vmatprep.subr.bf16.mxu1 %v3610_v8  ;;  %3020 = vmatprep.mubr.bf16.mxu0 %v4491_v11  ;;  %3276 = vst [vmem:[%s5253_s3 + $0x48] sm:$0xff] %v3244_v35  ;;  %v3251_v11 = vadd.f32 %v4918_v46, %v2609_v28  ;;  %v357_v1 = vld [vmem:[%s5250_s1 + $0x838] sm:$0xff] }
 0x154   :  { %v2612_v39 = vpop.f32.mrf.mxu0  ;;  %3073 = vmatprep.mubr.bf16.mxu1 %v4719_v23  ;;  %v3578_v4 = vcombine.high %v353_v25, %v357_v1  ;;  %v345_v34 = vld [vmem:[%s5250_s1 + $0x7d8] sm:$0xff]  ;;  %v3577_v9 = vcombine.low %v353_v25, %v357_v1 }
 0x155   :  { %v2613_v47 = vadd.f32 %v2612_v39, %v2560_v0  ;;  %2995 = vmatpush1.bf16.msra.mxu0 %v3481_v20  ;;  %3283 = vst [vmem:[%s5253_s3 + $0x80] sm:$0xff] %v3251_v11  ;;  %v3252_v23 = vadd.f32 %v4929_v55, %v2611_v38  ;;  %v349_v7 = vld [vmem:[%s5250_s1 + $0x7f8] sm:$0xff] }
 0x156   :  { %3048 = vmatpush1.bf16.msra.mxu1 %v3609_v21  ;;  %v2614_v48 = vpop.f32.mrf.mxu0  ;;  %2996 = vmatprep.subr.bf16.mxu0 %v3474_v33  ;;  %v473_v8 = vld [vmem:[%s5250_s1 + $0xbd8] sm:$0xff]  ;;  %v3570_v59 = vcombine.high %v345_v34, %v349_v7  ;;  %v3569_v20 = vcombine.low %v345_v34, %v349_v7 }
 0x157   :  { %v2615_v30 = vadd.f32 %v2614_v48, %v2562_v45  ;;  %3049 = vmatprep.subr.bf16.mxu1 %v3602_v10  ;;  %3284 = vst [vmem:[%s5253_s3 + $0x88] sm:$0xff] %v3252_v23  ;;  %v3259_v22 = vadd.f32 %v4918_v46, %v2613_v47  ;;  %v229_v46 = vld [vmem:[%s5250_s1 + $0x438] sm:$0xff] }
 0x158   :  { %v3450_v3 = vcombine.high %v225_v32, %v229_v46  ;;  %v477_v41 = vld [vmem:[%s5250_s1 + $0xbf8] sm:$0xff]  ;;  %v3449_v49 = vcombine.low %v225_v32, %v229_v46 }
 0x159   :  { %2997 = vmatpush1.bf16.msra.mxu0 %v3473_v40  ;;  %3291 = vst [vmem:[%s5253_s3 + $0xc0] sm:$0xff] %v3259_v22  ;;  %v3260_v37 = vadd.f32 %v4929_v55, %v2615_v30  ;;  %v3457_v55 = vcombine.low %v233_v54, %v237_v57  ;;  %v3698_v42 = vcombine.high %v473_v8, %v477_v41  ;;  %v337_v14 = vld [vmem:[%s5250_s1 + $0x798] sm:$0xff] }
 0x15a   :  { %3050 = vmatpush1.bf16.msra.mxu1 %v3601_v50  ;;  %2998 = vmatprep.subr.bf16.mxu0 %v3466_v51  ;;  %v341_v53 = vld [vmem:[%s5250_s1 + $0x7b8] sm:$0xff]  ;;  %v3697_v21 = vcombine.low %v473_v8, %v477_v41 }
 0x15b   :  { %3051 = vmatprep.subr.bf16.mxu1 %v3594_v52  ;;  %3292 = vst [vmem:[%s5253_s3 + $0xc8] sm:$0xff] %v3260_v37  ;;  %v465_v17 = vld [vmem:[%s5250_s1 + $0xb98] sm:$0xff]  ;;  %v3562_v24 = vcombine.high %v337_v14, %v341_v53  ;;  %v3561_v10 = vcombine.low %v337_v14, %v341_v53  ;;  %v5117_v52 = vpop.f32.mrf.mxu1 }
 0x15c   :  { %v469_v18 = vld [vmem:[%s5250_s1 + $0xbb8] sm:$0xff] }
 0x15d   :  { %2999 = vmatpush1.bf16.msra.mxu0 %v3465_v60  ;;  %v3690_v28 = vcombine.high %v465_v17, %v469_v18  ;;  %v329_v0 = vld [vmem:[%s5250_s1 + $0x758] sm:$0xff]  ;;  %v3689_v35 = vcombine.low %v465_v17, %v469_v18  ;;  %v5131_v37 = vpop.f32.mrf.mxu1 }
 0x15e   :  { %3052 = vmatpush1.bf16.msra.mxu1 %v3593_v61  ;;  %3000 = vmatprep.subr.bf16.mxu0 %v3458_v15  ;;  %v333_v29 = vld [vmem:[%s5250_s1 + $0x778] sm:$0xff] }
 0x15f   :  { %3053 = vmatprep.subr.bf16.mxu1 %v3586_v62  ;;  %v457_v31 = vld [vmem:[%s5250_s1 + $0xb58] sm:$0xff]  ;;  %v3554_v38 = vcombine.high %v329_v0, %v333_v29  ;;  %v3553_v45 = vcombine.low %v329_v0, %v333_v29 }
 0x160   :  { %v461_v33 = vld [vmem:[%s5250_s1 + $0xb78] sm:$0xff] }
 0x161   :  { %3001 = vmatpush1.bf16.msra.mxu0 %v3457_v55  ;;  %v3682_v13 = vcombine.high %v457_v31, %v461_v33  ;;  %v321_v36 = vld [vmem:[%s5250_s1 + $0x718] sm:$0xff]  ;;  %v3681_v11 = vcombine.low %v457_v31, %v461_v33  ;;  %v3205_v31 = vsub.s32 2, %v4867_v6 }
 0x162   :  { %3054 = vmatpush1.bf16.msra.mxu1 %v3585_v2  ;;  %3002 = vmatprep.subr.bf16.mxu0 %v3450_v3  ;;  %v325_v39 = vld [vmem:[%s5250_s1 + $0x738] sm:$0xff] }
 0x163   :  { %3055 = vmatprep.subr.bf16.mxu1 %v3578_v4  ;;  %v449_v40 = vld [vmem:[%s5250_s1 + $0xb18] sm:$0xff]  ;;  %v3546_v47 = vcombine.high %v321_v36, %v325_v39  ;;  %v3545_v54 = vcombine.low %v321_v36, %v325_v39  ;;  %v2657_v4 = vpop.f32.mrf.mxu1  ;;  %v3206_v39 = vrot.slane %v4893_v27, %v3205_v31 }
 0x164   :  { %v453_v43 = vld [vmem:[%s5250_s1 + $0xb38] sm:$0xff] }
 0x165   :  { %3003 = vmatpush1.bf16.msra.mxu0 %v3449_v49  ;;  %v3674_v48 = vcombine.high %v449_v40, %v453_v43  ;;  %v313_v50 = vld [vmem:[%s5250_s1 + $0x6d8] sm:$0xff]  ;;  %v3673_v57 = vcombine.low %v449_v40, %v453_v43  ;;  %v2661_v41 = vpop.f32.mrf.mxu1 }
 0x166   :  { %3056 = vmatpush1.bf16.msra.mxu1 %v3577_v9  ;;  %3004 = vmatprep.subr.bf16.mxu0 %v3570_v59  ;;  %v317_v51 = vld [vmem:[%s5250_s1 + $0x6f8] sm:$0xff] }
 0x167   :  { %3057 = vmatprep.subr.bf16.mxu1 %v3698_v42  ;;  %v441_v23 = vld [vmem:[%s5250_s1 + $0xad8] sm:$0xff]  ;;  %v3538_v58 = vcombine.high %v313_v50, %v317_v51  ;;  %v3537_v62 = vcombine.low %v313_v50, %v317_v51 }
 0x168   :  { %v445_v30 = vld [vmem:[%s5250_s1 + $0xaf8] sm:$0xff] }
 0x169   :  { %3005 = vmatpush2.bf16.msra.mxu0 %v3569_v20  ;;  %v3666_v26 = vcombine.high %v441_v23, %v445_v30  ;;  %v305_v22 = vld [vmem:[%s5250_s1 + $0x698] sm:$0xff]  ;;  %v3665_v32 = vcombine.low %v441_v23, %v445_v30  ;;  %v2663_v20 = vpop.f32.mrf.mxu1 }
 0x16a   :  { %3058 = vmatpush2.bf16.msra.mxu1 %v3697_v21  ;;  %3006 = vmatprep.subr.bf16.mxu0 %v3562_v24  ;;  %v309_v60 = vld [vmem:[%s5250_s1 + $0x6b8] sm:$0xff] }
 0x16b   :  { %3059 = vmatprep.subr.bf16.mxu1 %v3690_v28  ;;  %v433_v61 = vld [vmem:[%s5250_s1 + $0xa98] sm:$0xff]  ;;  %v3530_v46 = vcombine.high %v305_v22, %v309_v60  ;;  %v3529_v34 = vcombine.low %v305_v22, %v309_v60  ;;  %v2665_v0 = vpop.f32.mrf.mxu1 }
 0x16c   :  { %v437_v15 = vld [vmem:[%s5250_s1 + $0xab8] sm:$0xff] }
 0x16d   :  { %3007 = vmatpush2.bf16.msra.mxu0 %v3561_v10  ;;  %v3658_v25 = vcombine.high %v433_v61, %v437_v15  ;;  %v297_v1 = vld [vmem:[%s5250_s1 + $0x658] sm:$0xff]  ;;  %v3657_v7 = vcombine.low %v433_v61, %v437_v15  ;;  %v2667_v29 = vpop.f32.mrf.mxu1 }
 0x16e   :  { %3060 = vmatpush2.bf16.msra.mxu1 %v3689_v35  ;;  %3008 = vmatprep.subr.bf16.mxu0 %v3554_v38  ;;  %v301_v55 = vld [vmem:[%s5250_s1 + $0x678] sm:$0xff]  ;;  %v3209_v38 = vsub.s32 3, %v4867_v6 }
 0x16f   :  { %3061 = vmatprep.subr.bf16.mxu1 %v3682_v13  ;;  %v425_v2 = vld [vmem:[%s5250_s1 + $0xa58] sm:$0xff]  ;;  %v3522_v8 = vcombine.high %v297_v1, %v301_v55  ;;  %v3521_v53 = vcombine.low %v297_v1, %v301_v55 }
 0x170   :  { %v429_v3 = vld [vmem:[%s5250_s1 + $0xa78] sm:$0xff] }
 0x171   :  { %3009 = vmatpush2.bf16.msra.mxu0 %v3553_v45  ;;  %v3650_v49 = vcombine.high %v425_v2, %v429_v3  ;;  %v289_v9 = vld [vmem:[%s5250_s1 + $0x618] sm:$0xff]  ;;  %v3649_v17 = vcombine.low %v425_v2, %v429_v3 }
 0x172   :  { %3062 = vmatpush2.bf16.msra.mxu1 %v3681_v11  ;;  %3010 = vmatprep.subr.bf16.mxu0 %v3546_v47  ;;  %v293_v59 = vld [vmem:[%s5250_s1 + $0x638] sm:$0xff] }
 0x173   :  { %3063 = vmatprep.subr.bf16.mxu1 %v3674_v48  ;;  %v417_v42 = vld [vmem:[%s5250_s1 + $0xa18] sm:$0xff]  ;;  %v3514_v18 = vcombine.high %v289_v9, %v293_v59  ;;  %v3513_v24 = vcombine.low %v289_v9, %v293_v59 }
 0x174   :  { %v421_v14 = vld [vmem:[%s5250_s1 + $0xa38] sm:$0xff] }
 0x175   :  { %3011 = vmatpush2.bf16.msra.mxu0 %v3545_v54  ;;  %v3642_v21 = vcombine.high %v417_v42, %v421_v14  ;;  %v3641_v28 = vcombine.low %v417_v42, %v421_v14 }
 0x176   :  { %3064 = vmatpush2.bf16.msra.mxu1 %v3673_v57  ;;  %3012 = vmatprep.subr.bf16.mxu0 %v3538_v58 }
 0x177   :  { %3065 = vmatprep.subr.bf16.mxu1 %v3666_v26 }
 0x179   :  { %3013 = vmatpush2.bf16.msra.mxu0 %v3537_v62 }
 0x17a   :  { %3066 = vmatpush2.bf16.msra.mxu1 %v3665_v32  ;;  %3014 = vmatprep.subr.bf16.mxu0 %v3530_v46 }
 0x17b   :  { %3067 = vmatprep.subr.bf16.mxu1 %v3658_v25 }
 0x17d   :  { %3015 = vmatpush2.bf16.msra.mxu0 %v3529_v34 }
 0x17e   :  { %3068 = vmatpush2.bf16.msra.mxu1 %v3657_v7  ;;  %3016 = vmatprep.subr.bf16.mxu0 %v3522_v8 }
 0x17f   :  { %3069 = vmatprep.subr.bf16.mxu1 %v3650_v49 }
 0x181   :  { %3017 = vmatpush2.bf16.msra.mxu0 %v3521_v53 }
 0x182   :  { %3070 = vmatpush2.bf16.msra.mxu1 %v3649_v17  ;;  %3018 = vmatprep.subr.bf16.mxu0 %v3514_v18  ;;  %v3213_v18 = vsub.s32 4, %v4867_v6 }
 0x183   :  { %3071 = vmatprep.subr.bf16.mxu1 %v3642_v21 }
 0x185   :  { %3019 = vmatpush2.bf16.msra.mxu0 %v3513_v24 }
 0x186   :  { %3072 = vmatpush2.bf16.msra.mxu1 %v3641_v28  ;;  %v3217_v28 = vsub.s32 5, %v4867_v6 }
 0x188   :  { %v2704_v33 = vpop.f32.mrf.mxu0  ;;  %3021 = vmatmul.mubr.bf16.vlgmr.msra.gmra.mxu0 %v4659_v63 }
 0x189   :  { %v2705_v10 = vadd.f32 %v2704_v33, %v5103_v44  ;;  %v2757_v35 = vpop.f32.mrf.mxu1  ;;  %3074 = vmatmul.mubr.bf16.vlgmr.msra.gmra.mxu1 %v4923_v12  ;;  %3030 = vmatprep.mubr.bf16.mxu0 %v4683_v5  ;;  %v3210_v44 = vrot.slane %v4893_v27, %v3209_v38  ;;  %v3214_v33 = vrot.slane %v4893_v27, %v3213_v18 }
 0x18a   :  { %v2706_v13 = vpop.f32.mrf.mxu0  ;;  %3083 = vmatprep.mubr.bf16.mxu1 %v4943_v56 }
 0x18b   :  { %v2758_v36 = vadd.f32 %v2757_v35, %v2705_v10  ;;  %v2707_v40 = vadd.f32 %v2706_v13, %v5117_v52  ;;  %v2759_v43 = vpop.f32.mrf.mxu1 }
 0x18c   :  { %v2708_v45 = vpop.f32.mrf.mxu0 }
 0x18d   :  { %v2760_v63 = vadd.f32 %v2759_v43, %v2707_v40  ;;  %v2709_v11 = vadd.f32 %v2708_v45, %v5131_v37  ;;  %v2761_v12 = vpop.f32.mrf.mxu1  ;;  %v3237_v48 = vadd.f32 %v3206_v39, %v2758_v36  ;;  %v3218_v36 = vrot.slane %v4893_v27, %v3217_v28 }
 0x18e   :  { %v2710_v47 = vpop.f32.mrf.mxu0 }
 0x18f   :  { %v2762_v50 = vadd.f32 %v2761_v12, %v2709_v11  ;;  %v2711_v5 = vadd.f32 %v2710_v47, %v2657_v4  ;;  %v2763_v51 = vpop.f32.mrf.mxu1  ;;  %3269 = vst [vmem:[%s5253_s3 + $0x10] sm:$0xff] %v3237_v48  ;;  %v3238_v56 = vadd.f32 %v3210_v44, %v2760_v63 }
 0x190   :  { %v2714_v23 = vpop.f32.mrf.mxu0  ;;  %3031 = vmatmul.mubr.bf16.gmra.mxu0 %v4707_v16 }
 0x191   :  { %v2764_v30 = vadd.f32 %v2763_v51, %v2711_v5  ;;  %v2715_v52 = vadd.f32 %v2714_v23, %v2661_v41  ;;  %3084 = vmatmul.mubr.bf16.gmra.mxu1 %v4983_v19  ;;  %v2767_v54 = vpop.f32.mrf.mxu1  ;;  %3270 = vst [vmem:[%s5253_s3 + $0x18] sm:$0xff] %v3238_v56  ;;  %v3245_v58 = vadd.f32 %v3206_v39, %v2762_v50 }
 0x192   :  { %v2716_v57 = vpop.f32.mrf.mxu0 }
 0x193   :  { %v2717_v26 = vadd.f32 %v2716_v57, %v2663_v20  ;;  %v2768_v22 = vadd.f32 %v2767_v54, %v2715_v52  ;;  %v2769_v60 = vpop.f32.mrf.mxu1  ;;  %3277 = vst [vmem:[%s5253_s3 + $0x50] sm:$0xff] %v3245_v58  ;;  %v3246_v61 = vadd.f32 %v3210_v44, %v2764_v30 }
 0x194   :  { %v2718_v16 = vpop.f32.mrf.mxu0 }
 0x195   :  { %v2719_v15 = vadd.f32 %v2718_v16, %v2665_v0  ;;  %v2770_v37 = vadd.f32 %v2769_v60, %v2717_v26  ;;  %v2771_v62 = vpop.f32.mrf.mxu1  ;;  %3278 = vst [vmem:[%s5253_s3 + $0x58] sm:$0xff] %v3246_v61  ;;  %v3253_v32 = vadd.f32 %v3206_v39, %v2768_v22 }
 0x196   :  { %v2720_v19 = vpop.f32.mrf.mxu0 }
 0x197   :  { %v2721_v46 = vadd.f32 %v2720_v19, %v2667_v29  ;;  %v2772_v25 = vadd.f32 %v2771_v62, %v2719_v15  ;;  %v2773_v1 = vpop.f32.mrf.mxu1  ;;  %3285 = vst [vmem:[%s5253_s3 + $0x90] sm:$0xff] %v3253_v32  ;;  %v3254_v55 = vadd.f32 %v3210_v44, %v2770_v37 }
 0x199   :  { %v2774_v2 = vadd.f32 %v2773_v1, %v2721_v46  ;;  %3286 = vst [vmem:[%s5253_s3 + $0x98] sm:$0xff] %v3254_v55  ;;  %v3261_v3 = vadd.f32 %v3206_v39, %v2772_v25 }
 0x19b   :  { %3293 = vst [vmem:[%s5253_s3 + $0xd0] sm:$0xff] %v3261_v3  ;;  %v3262_v4 = vadd.f32 %v3210_v44, %v2774_v2  ;;  %v3221_v3 = vsub.s32 6, %v4867_v6 }
 0x19d   :  { %3294 = vst [vmem:[%s5253_s3 + $0xd8] sm:$0xff] %v3262_v4 }
 0x1c8   :  { %v2810_v34 = vpop.f32.mrf.mxu0 }
 0x1c9   :  { %v2863_v41 = vpop.f32.mrf.mxu1 }
 0x1ca   :  { %v2812_v7 = vpop.f32.mrf.mxu0  ;;  %v2864_v24 = vadd.f32 %v2863_v41, %v2810_v34 }
 0x1cb   :  { %v2865_v59 = vpop.f32.mrf.mxu1 }
 0x1cc   :  { %v2814_v8 = vpop.f32.mrf.mxu0  ;;  %v2866_v29 = vadd.f32 %v2865_v59, %v2812_v7 }
 0x1cd   :  { %v2867_v14 = vpop.f32.mrf.mxu1 }
 0x1ce   :  { %v2816_v49 = vpop.f32.mrf.mxu0  ;;  %v2868_v38 = vadd.f32 %v2867_v14, %v2814_v8  ;;  %v3225_v8 = vsub.s32 7, %v4867_v6 }
 0x1cf   :  { %v2869_v17 = vpop.f32.mrf.mxu1 }
 0x1d0   :  { %v2820_v9 = vpop.f32.mrf.mxu0  ;;  %v2870_v40 = vadd.f32 %v2869_v17, %v2816_v49  ;;  %v3226_v17 = vrot.slane %v4893_v27, %v3225_v8 }
 0x1d1   :  { %v2873_v20 = vpop.f32.mrf.mxu1 }
 0x1d2   :  { %v2822_v42 = vpop.f32.mrf.mxu0  ;;  %v2874_v11 = vadd.f32 %v2873_v20, %v2820_v9  ;;  %v3222_v9 = vrot.slane %v4893_v27, %v3221_v3 }
 0x1d3   :  { %v2875_v10 = vpop.f32.mrf.mxu1 }
 0x1d4   :  { %v2824_v53 = vpop.f32.mrf.mxu0  ;;  %v2876_v50 = vadd.f32 %v2875_v10, %v2822_v42 }
 0x1d5   :  { %v2877_v63 = vpop.f32.mrf.mxu1 }
 0x1d6   :  { %v2826_v21 = vpop.f32.mrf.mxu0  ;;  %v2878_v30 = vadd.f32 %v2877_v63, %v2824_v53 }
 0x1d7   :  { %v2879_v23 = vpop.f32.mrf.mxu1 }
 0x1d8   :  { %v2880_v58 = vadd.f32 %v2879_v23, %v2826_v21 }
 0x208   :  { %v2916_v0 = vpop.f32.mrf.mxu0 }
 0x209   :  { %v2917_v31 = vadd.f32 %v2916_v0, %v2864_v24  ;;  %v2969_v62 = vpop.f32.mrf.mxu1 }
 0x20a   :  { %v2918_v35 = vpop.f32.mrf.mxu0 }
 0x20b   :  { %v2919_v13 = vadd.f32 %v2918_v35, %v2866_v29  ;;  %v3239_v43 = vadd.f32 %v3214_v33, %v2917_v31  ;;  %v2971_v19 = vpop.f32.mrf.mxu1 }
 0x20c   :  { %v2920_v39 = vpop.f32.mrf.mxu0 }
 0x20d   :  { %v2921_v45 = vadd.f32 %v2920_v39, %v2868_v38  ;;  %3271 = vst [vmem:[%s5253_s3 + $0x20] sm:$0xff] %v3239_v43  ;;  %v3240_v12 = vadd.f32 %v3218_v36, %v2919_v13  ;;  %v2973_v32 = vpop.f32.mrf.mxu1 }
 0x20e   :  { %v2922_v44 = vpop.f32.mrf.mxu0 }
 0x20f   :  { %v2923_v47 = vadd.f32 %v2922_v44, %v2870_v40  ;;  %3272 = vst [vmem:[%s5253_s3 + $0x28] sm:$0xff] %v3240_v12  ;;  %v3247_v5 = vadd.f32 %v3214_v33, %v2921_v45  ;;  %v2975_v46 = vpop.f32.mrf.mxu1 }
 0x210   :  { %v2926_v48 = vpop.f32.mrf.mxu0 }
 0x211   :  { %v2927_v51 = vadd.f32 %v2926_v48, %v2874_v11  ;;  %3279 = vst [vmem:[%s5253_s3 + $0x60] sm:$0xff] %v3247_v5  ;;  %v3248_v52 = vadd.f32 %v3218_v36, %v2923_v47  ;;  %v2979_v25 = vpop.f32.mrf.mxu1 }
 0x212   :  { %v2928_v56 = vpop.f32.mrf.mxu0 }
 0x213   :  { %v2929_v54 = vadd.f32 %v2928_v56, %v2876_v50  ;;  %3280 = vst [vmem:[%s5253_s3 + $0x68] sm:$0xff] %v3248_v52  ;;  %v3255_v26 = vadd.f32 %v3214_v33, %v2927_v51  ;;  %v2981_v1 = vpop.f32.mrf.mxu1 }
 0x214   :  { %v2930_v57 = vpop.f32.mrf.mxu0 }
 0x215   :  { %v2931_v22 = vadd.f32 %v2930_v57, %v2878_v30  ;;  %3287 = vst [vmem:[%s5253_s3 + $0xa0] sm:$0xff] %v3255_v26  ;;  %v3256_v16 = vadd.f32 %v3218_v36, %v2929_v54  ;;  %v2983_v55 = vpop.f32.mrf.mxu1 }
 0x216   :  { %v2932_v60 = vpop.f32.mrf.mxu0 }
 0x217   :  { %v2933_v61 = vadd.f32 %v2932_v60, %v2880_v58  ;;  %3288 = vst [vmem:[%s5253_s3 + $0xa8] sm:$0xff] %v3256_v16  ;;  %v3263_v15 = vadd.f32 %v3214_v33, %v2931_v22  ;;  %v2985_v2 = vpop.f32.mrf.mxu1 }
 0x219   :  { %3295 = vst [vmem:[%s5253_s3 + $0xe0] sm:$0xff] %v3263_v15  ;;  %v3264_v37 = vadd.f32 %v3218_v36, %v2933_v61 }
 0x21b   :  { %3296 = vst [vmem:[%s5253_s3 + $0xe8] sm:$0xff] %v3264_v37 }
 0x248   :  { %v3022_v4 = vpop.f32.mrf.mxu0 }
 0x249   :  { %v3023_v34 = vadd.f32 %v3022_v4, %v2969_v62  ;;  %v3075_v7 = vpop.f32.mrf.mxu1 }
 0x24a   :  { %v3024_v41 = vpop.f32.mrf.mxu0 }
 0x24b   :  { %v3076_v49 = vadd.f32 %v3075_v7, %v3023_v34  ;;  %v3025_v59 = vadd.f32 %v3024_v41, %v2971_v19  ;;  %v3077_v42 = vpop.f32.mrf.mxu1 }
 0x24c   :  { %v3026_v14 = vpop.f32.mrf.mxu0 }
 0x24d   :  { %v3078_v53 = vadd.f32 %v3077_v42, %v3025_v59  ;;  %v3027_v18 = vadd.f32 %v3026_v14, %v2973_v32  ;;  %v3079_v20 = vpop.f32.mrf.mxu1  ;;  %v3241_v24 = vadd.f32 %v3222_v9, %v3076_v49 }
 0x24e   :  { %v3028_v21 = vpop.f32.mrf.mxu0 }
 0x24f   :  { %v3080_v28 = vadd.f32 %v3079_v20, %v3027_v18  ;;  %v3029_v0 = vadd.f32 %v3028_v21, %v2975_v46  ;;  %v3081_v29 = vpop.f32.mrf.mxu1  ;;  %3273 = vst [vmem:[%s5253_s3 + $0x30] sm:$0xff] %v3241_v24  ;;  %v3242_v6 = vadd.f32 %v3226_v17, %v3078_v53 }
 0x250   :  { %v3032_v31 = vpop.f32.mrf.mxu0 }
 0x251   :  { %v3082_v33 = vadd.f32 %v3081_v29, %v3029_v0  ;;  %v3033_v10 = vadd.f32 %v3032_v31, %v2979_v25  ;;  %v3085_v35 = vpop.f32.mrf.mxu1  ;;  %3274 = vst [vmem:[%s5253_s3 + $0x38] sm:$0xff] %v3242_v6  ;;  %v3249_v27 = vadd.f32 %v3222_v9, %v3080_v28 }
 0x252   :  { %v3034_v38 = vpop.f32.mrf.mxu0 }
 0x253   :  { %v3086_v13 = vadd.f32 %v3085_v35, %v3033_v10  ;;  %v3035_v36 = vadd.f32 %v3034_v38, %v2981_v1  ;;  %v3087_v39 = vpop.f32.mrf.mxu1  ;;  %3281 = vst [vmem:[%s5253_s3 + $0x70] sm:$0xff] %v3249_v27  ;;  %v3250_v43 = vadd.f32 %v3226_v17, %v3082_v33 }
 0x254   :  { %v3036_v40 = vpop.f32.mrf.mxu0 }
 0x255   :  { %v3088_v45 = vadd.f32 %v3087_v39, %v3035_v36  ;;  %v3037_v63 = vadd.f32 %v3036_v40, %v2983_v55  ;;  %v3089_v44 = vpop.f32.mrf.mxu1  ;;  %3282 = vst [vmem:[%s5253_s3 + $0x78] sm:$0xff] %v3250_v43  ;;  %v3257_v12 = vadd.f32 %v3222_v9, %v3086_v13 }
 0x256   :  { %v3038_v11 = vpop.f32.mrf.mxu0 }
 0x257   :  { %v3090_v47 = vadd.f32 %v3089_v44, %v3037_v63  ;;  %v3039_v48 = vadd.f32 %v3038_v11, %v2985_v2  ;;  %v3091_v50 = vpop.f32.mrf.mxu1  ;;  %3289 = vst [vmem:[%s5253_s3 + $0xb0] sm:$0xff] %v3257_v12  ;;  %v3258_v5 = vadd.f32 %v3226_v17, %v3088_v45 }
 0x259   :  { %v3092_v51 = vadd.f32 %v3091_v50, %v3039_v48  ;;  %3290 = vst [vmem:[%s5253_s3 + $0xb8] sm:$0xff] %v3258_v5  ;;  %v3265_v23 = vadd.f32 %v3222_v9, %v3090_v47 }
 0x25b   :  { %3297 = vst [vmem:[%s5253_s3 + $0xf0] sm:$0xff] %v3265_v23  ;;  %v3266_v56 = vadd.f32 %v3226_v17, %v3092_v51 }
 0x25d   :  { %3298 = vst [vmem:[%s5253_s3 + $0xf8] sm:$0xff] %v3266_v56 }

// kernel: plan_ankh_prostt5_forward.11
= control target key start
LH: loop header
LB: loop body
LE: loop exit
PB: predicated region body
PF: predicated region fallthrough
CT: control target
= control target key end

     0   :  { %s1185_s9 = smov 0   ;;  %s1187_s10 = smov 0   ;;  %s1327_s0 = inlined_call_operand.vmem [shape: bf16[16,4608], index: 0, kind: input, shape index: {}]   ;;  %s1328_s1 = inlined_call_operand.vmem [shape: bf16[4608,128], index: 1, kind: input, shape index: {}]   ;;  %s1329_s2 = inlined_call_operand.vmem [shape: f32[16,128], index: 2, kind: output, shape index: {}]  }
   0x1   :  { %s1189_s11 = smov 0   ;;  %s1191_s12 = smov 0  }
   0x2   :  { %s1193_s13 = smov 0  }
   0x3 LB: > { %s24_s14 = sadd.s32 1, %s1163_s12  ;;  %p47_p1 = scmp.ne.s32.totalorder %s1155_s10, %s1151_s9  ;;  %s1167_s13 = sphi %s1193_s13, %s12_s13   ;;  %s1163_s12 = sphi %s1191_s12, %s1333_s12   ;;  %s1159_s11 = sphi %s1189_s11, %s1332_s11   ;;  %s1155_s10 = sphi %s1187_s10, %s1331_s10   ;;  %s1151_s9 = sphi %s1185_s9, %s1330_s9  }
   0x4   : > { %p25_p0 = scmp.ge.s32.totalorder %s24_s14, 6  ;;  %p48_p2 = scmp.eq.s32.totalorder %s1167_s13, 0 }
   0x5   : > { %s40_s16 = sadd.s32 1, %s1155_s10  ;;  %p899_p5 = scmp.ge.s32.totalorder %s1167_s13, 6 }
   0x6   : > { %s1335_s14 = smov (%p25_p0, %s24_s14), 0  ;;  %p49_p3 = por %p48_p2, %p47_p1 }
   0x7   : > { %s36_s15 = ssub.s32 %s1163_s12, %s1335_s14  ;;  %129 = sbr.rel (%p899_p5) target bundleno = 20 (0x14), region = 16 }
   0x8   : > { %p38_p4 = scmp.eq.s32.totalorder %s36_s15, 0 }
   0xa   : > { %s1220_s17 = scalar_select %p38_p4, %s1155_s10, %s40_s16  }
   0xc   : > { %132 = sbr.rel (!%p49_p3) target bundleno = 20 (0x14), region = 20  ;;  %s134_s18 = sand.u32 (%p49_p3), 1, %s1155_s10  }
   0xd   : > { %s962_s19 = smul.u32 (%p49_p3), 24, %s1163_s12 }
   0xe   : > { %s1029_s20 = smul.u32 (%p49_p3), 48, %s134_s18 }
   0xf   : > { %s142_s23 = scalar_lea.vmem (%p49_p3), %s1327_s0, %s962_s19 }
  0x10   : > { %v155_v0 = vld [vmem:[%s142_s23] sm:$0xff] (%p49_p3)  ;;  %v157_v1 = vld [vmem:[%s142_s23 + $0x8] sm:$0xff] (%p49_p3)  ;;  %v159_v2 = vld [vmem:[%s142_s23 + $0x10] sm:$0xff] (%p49_p3)  ;;  %s136_s24 = scalar_lea.vmem (%p49_p3), [#allocation2], %s1029_s20 }
  0x11   : > { %156 = vst [vmem:[%s136_s24] sm:$0xff] %v155_v0  ;;  %158 = vst [vmem:[%s136_s24 + $0x8] sm:$0xff] %v157_v1  ;;  %v161_v3 = vld [vmem:[%s142_s23 + $0x90] sm:$0xff]  ;;  %v163_v4 = vld [vmem:[%s142_s23 + $0x98] sm:$0xff] }
  0x12   : > { %160 = vst [vmem:[%s136_s24 + $0x10] sm:$0xff] %v159_v2  ;;  %v165_v5 = vld [vmem:[%s142_s23 + $0xa0] sm:$0xff]  ;;  %162 = vst [vmem:[%s136_s24 + $0x18] sm:$0xff] %v161_v3 }
  0x13   : > { %164 = vst [vmem:[%s136_s24 + $0x20] sm:$0xff] %v163_v4  ;;  %166 = vst [vmem:[%s136_s24 + $0x28] sm:$0xff] %v165_v5 }
  0x14 PF: > { %p901_p6 = scmp.ge.s32.totalorder %s1167_s13, 1  ;;  %p183_p7 = scmp.lt.s32.totalorder %s1167_s13, 7 }
  0x16   : > { %p184_p8 = pnand %p901_p6, %p183_p7 }
  0x17   : > { %s190_s25 = sand.u32 (!%p184_p8), 1, %s1151_s9   ;;  %s224_s26 = smul.u32 (!%p184_p8), 96, %s1159_s11 }
  0x18   : > { %187 = sbr.rel (%p184_p8) target bundleno = 308 (0x134), region = 47  ;;  %p903_p10 = scmp.ne.s32.totalorder (!%p184_p8), %s1159_s11, 0 }
  0x19   : > { %s1030_s27 = smul.u32 (!%p184_p8), 48, %s190_s25  ;;  %p225_p9 = scmp.lt.s32.totalorder (!%p184_p8), %s224_s26, 575 }
  0x1b   : > { %s1237_s4 = scalar_lea.vmem (!%p184_p8), [#allocation2], %s1030_s27 }
  0x1d   : > { %s1337_s26 = smov (!%p225_p9, %s224_s26), 575  ;;  %246 = sbr.rel (%p903_p10) target bundleno = 36 (0x24), region = 55 }
  0x1e   : > { %s902_s28 = sshll.u32 %s1337_s26, 2 }
  0x1f   : > { %s1235_s3 = scalar_lea.vmem %s1328_s1, %s902_s28 }
  0x22   : > { %v1169_v6 = vmov 0.0  }
  0x23   : > { %247 = vst [vmem:[%s1329_s2] sm:$0xff] %v1169_v6  ;;  %248 = vst [vmem:[%s1329_s2 + $0x8] sm:$0xff] %v1169_v6 }
  0x24 PF: > { %v1072_v7 = vld [vmem:[%s1235_s3 + $0x78] sm:$0xff]   ;;  %v1076_v11 = vld [vmem:[%s1235_s3 + $0x70] sm:$0xff]   ;;  %v1080_v15 = vld [vmem:[%s1235_s3 + $0x68] sm:$0xff]  }
  0x25   : > { %v1073_v8 = vld [vmem:[%s1235_s3 + $0xf8] sm:$0xff]   ;;  %963 = vmatprep.subr.bf16.mxu0 %v1072_v7  ;;  %v1077_v12 = vld [vmem:[%s1235_s3 + $0xf0] sm:$0xff]   ;;  %v1081_v16 = vld [vmem:[%s1235_s3 + $0xe8] sm:$0xff]  }
  0x26   : > { %v1074_v9 = vld [vmem:[%s1235_s3 + $0x38] sm:$0xff]   ;;  %985 = vmatprep.subr.bf16.mxu1 %v1073_v8  ;;  %v1078_v13 = vld [vmem:[%s1235_s3 + $0x30] sm:$0xff]   ;;  %v1082_v17 = vld [vmem:[%s1235_s3 + $0x28] sm:$0xff]  }
  0x27   : > { %v1075_v10 = vld [vmem:[%s1235_s3 + $0xb8] sm:$0xff]   ;;  %964 = vmatpush3.bf16.msra.mxu0 %v1074_v9  ;;  %v1079_v14 = vld [vmem:[%s1235_s3 + $0xb0] sm:$0xff]   ;;  %v1083_v18 = vld [vmem:[%s1235_s3 + $0xa8] sm:$0xff]  }
  0x28   : > { %986 = vmatpush3.bf16.msra.mxu1 %v1075_v10  ;;  %965 = vmatprep.subr.bf16.mxu0 %v1076_v11  ;;  %v1084_v19 = vld [vmem:[%s1235_s3 + $0x60] sm:$0xff]   ;;  %v1088_v23 = vld [vmem:[%s1235_s3 + $0x58] sm:$0xff]   ;;  %v1092_v27 = vld [vmem:[%s1235_s3 + $0x50] sm:$0xff]  }
  0x29   : > { %987 = vmatprep.subr.bf16.mxu1 %v1077_v12  ;;  %v1085_v20 = vld [vmem:[%s1235_s3 + $0xe0] sm:$0xff]   ;;  %v1089_v24 = vld [vmem:[%s1235_s3 + $0xd8] sm:$0xff]   ;;  %v1093_v28 = vld [vmem:[%s1235_s3 + $0xd0] sm:$0xff]  }
  0x2a   : > { %v1086_v21 = vld [vmem:[%s1235_s3 + $0x20] sm:$0xff]   ;;  %v1090_v25 = vld [vmem:[%s1235_s3 + $0x18] sm:$0xff]   ;;  %v1094_v29 = vld [vmem:[%s1235_s3 + $0x10] sm:$0xff]  }
  0x2b   : > { %966 = vmatpush3.bf16.msra.mxu0 %v1078_v13  ;;  %v1087_v22 = vld [vmem:[%s1235_s3 + $0xa0] sm:$0xff]   ;;  %v1091_v26 = vld [vmem:[%s1235_s3 + $0x98] sm:$0xff]   ;;  %v1095_v30 = vld [vmem:[%s1235_s3 + $0x90] sm:$0xff]  }
  0x2c   : > { %988 = vmatpush3.bf16.msra.mxu1 %v1079_v14  ;;  %967 = vmatprep.subr.bf16.mxu0 %v1080_v15  ;;  %v1096_v31 = vld [vmem:[%s1235_s3 + $0x48] sm:$0xff]   ;;  %v1100_v35 = vld [vmem:[%s1235_s3 + $0x40] sm:$0xff]   ;;  %v1110_v43 = vld [vmem:[%s1235_s3 + $0x178] sm:$0xff]  }
  0x2d   : > { %989 = vmatprep.subr.bf16.mxu1 %v1081_v16  ;;  %v1097_v32 = vld [vmem:[%s1235_s3 + $0xc8] sm:$0xff]   ;;  %v1101_v36 = vld [vmem:[%s1235_s3 + $0xc0] sm:$0xff]   ;;  %v1111_v44 = vld [vmem:[%s1235_s3 + $0x138] sm:$0xff]  }
  0x2e   : > { %v1098_v33 = vld [vmem:[%s1235_s3 + $0x8] sm:$0xff]   ;;  %v1102_v37 = vld [vmem:[%s1235_s3] sm:$0xff]   ;;  %v1112_v45 = vld [vmem:[%s1235_s3 + $0x170] sm:$0xff]  }
  0x2f   : > { %968 = vmatpush3.bf16.msra.mxu0 %v1082_v17  ;;  %v1099_v34 = vld [vmem:[%s1235_s3 + $0x88] sm:$0xff]   ;;  %v1103_v38 = vld [vmem:[%s1235_s3 + $0x80] sm:$0xff]   ;;  %v1113_v46 = vld [vmem:[%s1235_s3 + $0x130] sm:$0xff]  }
  0x30   : > { %990 = vmatpush3.bf16.msra.mxu1 %v1083_v18  ;;  %969 = vmatprep.subr.bf16.mxu0 %v1084_v19  ;;  %v1104_v39 = vld [vmem:[%s1237_s4] ss:$24 sps:$4 sm:$0xff]   ;;  %v1106_v40 = vld [vmem:[%s1237_s4 + $0x4] ss:$24 sps:$4 sm:$0xff]   ;;  %v1128_v54 = vld [vmem:[%s1237_s4 + $0x14] ss:$24 sps:$4 sm:$0xff]  }
  0x31   : > { %991 = vmatprep.subr.bf16.mxu1 %v1085_v20  ;;  %v1107_v41 = vld [vmem:[%s1237_s4 + $0x8] ss:$24 sps:$4 sm:$0xff]   ;;  %v1109_v42 = vld [vmem:[%s1237_s4 + $0xc] ss:$24 sps:$4 sm:$0xff]   ;;  %703 = vmatprep.mubr.bf16.mxu0 %v1106_v40 }
  0x32   : > { %744 = vmatprep.mubr.bf16.mxu1 %v1109_v42  ;;  %v1114_v47 = vld [vmem:[%s1235_s3 + $0x168] sm:$0xff]   ;;  %v1116_v49 = vld [vmem:[%s1235_s3 + $0x160] sm:$0xff]   ;;  %v1118_v51 = vld [vmem:[%s1235_s3 + $0x158] sm:$0xff]  }
  0x33   : > { %970 = vmatpush3.bf16.msra.mxu0 %v1086_v21  ;;  %v1115_v48 = vld [vmem:[%s1235_s3 + $0x128] sm:$0xff]   ;;  %v1117_v50 = vld [vmem:[%s1235_s3 + $0x120] sm:$0xff]   ;;  %v1119_v52 = vld [vmem:[%s1235_s3 + $0x118] sm:$0xff]  }
  0x34   : > { %992 = vmatpush3.bf16.msra.mxu1 %v1087_v22  ;;  %971 = vmatprep.subr.bf16.mxu0 %v1088_v23  ;;  %v1120_v53 = vld [vmem:[%s1235_s3 + $0x150] sm:$0xff]   ;;  %v1122_v56 = vld [vmem:[%s1235_s3 + $0x148] sm:$0xff]   ;;  %v1124_v58 = vld [vmem:[%s1235_s3 + $0x140] sm:$0xff]  }
  0x35   : > { %993 = vmatprep.subr.bf16.mxu1 %v1089_v24  ;;  %v1121_v55 = vld [vmem:[%s1235_s3 + $0x110] sm:$0xff]   ;;  %v1123_v57 = vld [vmem:[%s1235_s3 + $0x108] sm:$0xff]   ;;  %v1125_v59 = vld [vmem:[%s1235_s3 + $0x100] sm:$0xff]  }
  0x36   : > { %v1126_v60 = vld [vmem:[%s1237_s4 + $0x10] ss:$24 sps:$4 sm:$0xff]  }
  0x37   : > { %972 = vmatpush3.bf16.msra.mxu0 %v1090_v25  ;;  %v249_v13 = vld [vmem:[%s1329_s2] sm:$0xff]  ;;  %v250_v20 = vld [vmem:[%s1329_s2 + $0x8] sm:$0xff] }
  0x38   : > { %994 = vmatpush3.bf16.msra.mxu1 %v1091_v26  ;;  %973 = vmatprep.subr.bf16.mxu0 %v1092_v27 }
  0x39   : > { %995 = vmatprep.subr.bf16.mxu1 %v1093_v28 }
  0x3b   : > { %974 = vmatpush3.bf16.msra.mxu0 %v1094_v29 }
  0x3c   : > { %996 = vmatpush3.bf16.msra.mxu1 %v1095_v30  ;;  %975 = vmatprep.subr.bf16.mxu0 %v1096_v31 }
  0x3d   : > { %997 = vmatprep.subr.bf16.mxu1 %v1097_v32 }
  0x3f   : > { %976 = vmatpush3.bf16.msra.mxu0 %v1098_v33 }
  0x40   : > { %998 = vmatpush3.bf16.msra.mxu1 %v1099_v34  ;;  %977 = vmatprep.subr.bf16.mxu0 %v1100_v35 }
  0x41   : > { %999 = vmatprep.subr.bf16.mxu1 %v1101_v36 }
  0x43   : > { %978 = vmatpush3.bf16.msra.mxu0 %v1102_v37 }
  0x44   : > { %1000 = vmatpush3.bf16.msra.mxu1 %v1103_v38  ;;  %1007 = vmatprep.subr.bf16.mxu0 %v1110_v43 }
  0x46   : > { %704 = vmatmul.mubr.bf16.vlgmr.msra.gmra.mxu0 %v1104_v39 }
  0x47   : > { %745 = vmatmul.mubr.bf16.vlgmr.msra.gmra.mxu1 %v1107_v41  ;;  %1008 = vmatpush3.bf16.msra.mxu0 %v1111_v44 }
  0x48   : > { %1009 = vmatprep.subr.bf16.mxu0 %v1112_v45  ;;  %785 = vmatprep.mubr.bf16.mxu0 %v1128_v54 }
  0x4b   : > { %1010 = vmatpush3.bf16.msra.mxu0 %v1113_v46 }
  0x4c   : > { %1011 = vmatprep.subr.bf16.mxu0 %v1114_v47 }
  0x4f   : > { %1012 = vmatpush3.bf16.msra.mxu0 %v1115_v48 }
  0x50   : > { %1013 = vmatprep.subr.bf16.mxu0 %v1116_v49 }
  0x53   : > { %1014 = vmatpush3.bf16.msra.mxu0 %v1117_v50 }
  0x54   : > { %1015 = vmatprep.subr.bf16.mxu0 %v1118_v51 }
  0x57   : > { %1016 = vmatpush3.bf16.msra.mxu0 %v1119_v52 }
  0x58   : > { %1017 = vmatprep.subr.bf16.mxu0 %v1120_v53 }
  0x5b   : > { %1018 = vmatpush3.bf16.msra.mxu0 %v1121_v55 }
  0x5c   : > { %1019 = vmatprep.subr.bf16.mxu0 %v1122_v56 }
  0x5f   : > { %1020 = vmatpush3.bf16.msra.mxu0 %v1123_v57 }
  0x60   : > { %1021 = vmatprep.subr.bf16.mxu0 %v1124_v58 }
  0x63   : > { %1022 = vmatpush3.bf16.msra.mxu0 %v1125_v59 }
  0x66   : > { %786 = vmatmul.mubr.bf16.vlgmr.msra.gmra.mxu0 %v1126_v60 }
 0x106   : > { %v979_v61 = vpop.f32.mrf.mxu0 }
 0x107   : > { %v1001_v62 = vpop.f32.mrf.mxu1 }
 0x108   : > { %v980_v63 = vpop.f32.mrf.mxu0 }
 0x109   : > { %v1002_v0 = vpop.f32.mrf.mxu1  ;;  %v981_v4 = vadd.f32 %v980_v63, %v979_v61 }
 0x10a   : > { %v982_v1 = vpop.f32.mrf.mxu0  ;;  %v1003_v5 = vadd.f32 %v1002_v0, %v1001_v62 }
 0x10b   : > { %v1004_v2 = vpop.f32.mrf.mxu1 }
 0x10c   : > { %v983_v3 = vpop.f32.mrf.mxu0  ;;  %v747_v9 = vadd.f32 %v1003_v5, %v981_v4 }
 0x10d   : > { %v1005_v6 = vpop.f32.mrf.mxu1  ;;  %v984_v10 = vadd.f32 %v983_v3, %v982_v1 }
 0x10e   : > { %v1006_v11 = vadd.f32 %v1005_v6, %v1004_v2 }
 0x110   : > { %v750_v17 = vadd.f32 %v1006_v11, %v984_v10 }
 0x126   : > { %v1023_v7 = vpop.f32.mrf.mxu0 }
 0x128   : > { %v1024_v8 = vpop.f32.mrf.mxu0 }
 0x129   : > { %v1025_v12 = vadd.f32 %v1024_v8, %v1023_v7 }
 0x12a   : > { %v1026_v14 = vpop.f32.mrf.mxu0 }
 0x12b   : > { %v788_v15 = vadd.f32 %v1025_v12, %v747_v9 }
 0x12c   : > { %v1027_v16 = vpop.f32.mrf.mxu0 }
 0x12d   : > { %v794_v18 = vadd.f32 %v788_v15, %v249_v13  ;;  %v1028_v19 = vadd.f32 %v1027_v16, %v1026_v14 }
 0x12f   : > { %796 = vst [vmem:[%s1329_s2] sm:$0xff] %v794_v18  ;;  %v791_v21 = vadd.f32 %v1028_v19, %v750_v17 }
 0x131   : > { %v795_v22 = vadd.f32 %v791_v21, %v250_v20 }
 0x133   : > { %797 = vst [vmem:[%s1329_s2 + $0x8] sm:$0xff] %v795_v22 }
 0x134 PF: > { %s12_s13 = sadd.s32 1, %s1167_s13   ;;  %s1330_s9 = smov %s1155_s10 }
 0x135   : > { %p9_p11 = scmp.ge.s32.totalorder %s12_s13, 8   ;;  %s1331_s10 = smov %s1220_s17 }
 0x136   : > { %s1332_s11 = smov %s1163_s12  ;;  %s1333_s12 = smov %s1335_s14 }
 0x137   :  { %11 = sbr.rel (!%p9_p11) target bundleno = 3 (0x3), region = 93 }

</bundles_post_ra>
